<compile_context>
chip_gen: v6e
topology: v6e:2x2x1
jax: 0.10.0
libtpu: 0.0.40
codegen_flags: <defaults>
</compile_context>

<pallas_src>
import math
import functools

import jax
import jax.numpy as jnp
from jax.experimental import pallas as pl
from jax.experimental.pallas import tpu as pltpu


def _round_up(x, m):
    return ((x + m - 1) // m) * m


def _vmem_limit_bytes():
    cap = 128 * 1024 * 1024
    try:
        cap = int(getattr(pltpu.get_tpu_info(), "vmem_capacity_bytes", cap))
    except Exception:
        pass
    # ~60% of physical VMEM, clamped: ~38 MiB on v7x (64 MiB), ~76 MiB on v5e/v6e.
    return max(32 * 1024 * 1024, min(int(cap * 0.6), 100 * 1024 * 1024))


_VMEM_LIMIT = _vmem_limit_bytes()
_NEG = -1e9
_LN_EPS = 1e-5


def _dff_chunk(dff):
    if dff <= 512:
        return dff
    for c in (512, 256, 128):
        if dff % c == 0:
            return c
    return dff


# ----------------------------------------------------------------------------- in-kernel helpers

def _layer_norm(y, g, b):
    mean = jnp.mean(y, axis=-1, keepdims=True)
    var = jnp.mean(jnp.square(y - mean), axis=-1, keepdims=True)
    return (y - mean) * jax.lax.rsqrt(var + _LN_EPS) * g + b


def _mha_heads(q_s, k_s, v_s, q_off, k_off, v_off, ctx_s, bias, *, num_heads, dk, scale):
    """Per-head attention.  q/k/v slices are loaded from bf16 VMEM scratches and the
    per-head context is STORED into ctx_s (no running f32 accumulator, no per-head
    output-projection GEMMs)."""
    for h in range(num_heads):
        qh = q_s[:, pl.ds(q_off + h * dk, dk)]
        kh = k_s[:, pl.ds(k_off + h * dk, dk)]
        vh = v_s[:, pl.ds(v_off + h * dk, dk)]
        # (Sq, dk) x (Sk, dk) contracted on dk  ->  (Sq, Sk), f32 accumulation
        s = jax.lax.dot_general(qh, kh, (((1,), (1,)), ((), ())),
                                preferred_element_type=jnp.float32)
        s = s * scale + bias
        s = s - jnp.max(s, axis=-1, keepdims=True)
        p = jnp.exp(s)
        p = p * pl.reciprocal(jnp.sum(p, axis=-1, keepdims=True), approx=True)
        oh = jnp.dot(p.astype(jnp.bfloat16), vh, preferred_element_type=jnp.float32)
        ctx_s[:, pl.ds(h * dk, dk)] = oh.astype(jnp.bfloat16)


def _ffn(yb, w1_ref, b1_ref, w2_ref, dff, chunk):
    """dff-chunked FFN: the (S, chunk) ReLU intermediate stays bounded in VMEM."""
    acc = None
    for c in range(0, dff, chunk):
        h = jnp.dot(yb, w1_ref[:, pl.ds(c, chunk)], preferred_element_type=jnp.float32)
        h = jnp.maximum(h + b1_ref[:, pl.ds(c, chunk)], 0.0)
        part = jnp.dot(h.astype(jnp.bfloat16), w2_ref[pl.ds(c, chunk), :],
                       preferred_element_type=jnp.float32)
        acc = part if acc is None else acc + part
    return acc


# ----------------------------------------------------------------------------- fused encoder layer

def _enc_layer_kernel(x_ref, km_ref,
                      wqkv_ref, bqkv_ref, wo_ref, bo_ref, g1_ref, be1_ref,
                      w1_ref, b1_ref, w2_ref, b2_ref, g2_ref, be2_ref,
                      o_ref, qkv_s, ctx_s,
                      *, num_heads, scale, dff, dff_chunk):
    x = x_ref[0]                                  # (S, D) bf16
    xf = x.astype(jnp.float32)
    D = x.shape[1]
    dk = D // num_heads

    bias = jnp.where(km_ref[0] > 0.0, 0.0, _NEG)  # (1, S) key-pad, broadcasts over rows

    # --- self-attention
    qkv = jnp.dot(x, wqkv_ref[...], preferred_element_type=jnp.float32) + bqkv_ref[...]
    qkv_s[...] = qkv.astype(jnp.bfloat16)
    _mha_heads(qkv_s, qkv_s, qkv_s, 0, D, 2 * D, ctx_s, bias,
               num_heads=num_heads, dk=dk, scale=scale)
    proj = jnp.dot(ctx_s[...], wo_ref[...], preferred_element_type=jnp.float32) + bo_ref[...]
    y = _layer_norm(xf + proj, g1_ref[...], be1_ref[...])

    # --- FFN
    yb = y.astype(jnp.bfloat16)
    z = y + _ffn(yb, w1_ref, b1_ref, w2_ref, dff, dff_chunk) + b2_ref[...]
    z = _layer_norm(z, g2_ref[...], be2_ref[...])
    o_ref[0] = z.astype(o_ref.dtype)


def encoder_layer(x, kmask, lp, num_heads):
    B, S, D = x.shape
    dff = lp["w1"].shape[1]
    kern = functools.partial(_enc_layer_kernel, num_heads=num_heads,
                             scale=1.0 / math.sqrt(D // num_heads),
                             dff=dff, dff_chunk=_dff_chunk(dff))
    w = lambda r, c: pl.BlockSpec((r, c), lambda b: (0, 0))
    m = lp["mha"]
    return pl.pallas_call(
        kern,
        out_shape=jax.ShapeDtypeStruct((B, S, D), x.dtype),
        grid=(B,),
        in_specs=[
            pl.BlockSpec((1, S, D), lambda b: (b, 0, 0)),
            pl.BlockSpec((1, 1, S), lambda b: (b, 0, 0)),
            w(D, 3 * D), w(1, 3 * D), w(D, D), w(1, D), w(1, D), w(1, D),
            w(D, dff), w(1, dff), w(dff, D), w(1, D), w(1, D), w(1, D),
        ],
        out_specs=pl.BlockSpec((1, S, D), lambda b: (b, 0, 0)),
        scratch_shapes=[pltpu.VMEM((S, 3 * D), jnp.bfloat16),
                        pltpu.VMEM((S, D), jnp.bfloat16)],
        compiler_params=pltpu.CompilerParams(
            dimension_semantics=("parallel",), vmem_limit_bytes=_VMEM_LIMIT),
    )(x, kmask,
      m["wqkv"], m["bqkv"], m["wo"], m["bo"], lp["ln1_g"], lp["ln1_b"],
      lp["w1"], lp["b1"], lp["w2"], lp["b2"], lp["ln2_g"], lp["ln2_b"])


# ----------------------------------------------------------------------------- fused decoder layer

def _dec_layer_kernel(x_ref, enc_ref, qm_ref, km_ref,
                      swqkv_ref, sbqkv_ref, swo_ref, sbo_ref, g1_ref, be1_ref,
                      cwq_ref, cbq_ref, cwkv_ref, cbkv_ref, cwo_ref, cbo_ref, g2_ref, be2_ref,
                      w1_ref, b1_ref, w2_ref, b2_ref, g3_ref, be3_ref,
                      o_ref, qkv_s, kv_s, ctx_s,
                      *, num_heads, scale, dff, dff_chunk):
    x = x_ref[0]                                  # (Sd, D) bf16
    e = enc_ref[0]                                # (Se, D) bf16
    xf = x.astype(jnp.float32)
    Sd, D = x.shape
    dk = D // num_heads

    # --- masked causal self-attention (bias built in-register; never hits HBM)
    row = jax.lax.broadcasted_iota(jnp.int32, (Sd, Sd), 0)
    col = jax.lax.broadcasted_iota(jnp.int32, (Sd, Sd), 1)
    keep = (col <= row) & (qm_ref[0] > 0.0)       # query-pad mask (Sd,1) per the spec
    self_bias = jnp.where(keep, 0.0, _NEG)

    qkv = jnp.dot(x, swqkv_ref[...], preferred_element_type=jnp.float32) + sbqkv_ref[...]
    qkv_s[...] = qkv.astype(jnp.bfloat16)
    _mha_heads(qkv_s, qkv_s, qkv_s, 0, D, 2 * D, ctx_s, self_bias,
               num_heads=num_heads, dk=dk, scale=scale)
    proj = jnp.dot(ctx_s[...], swo_ref[...], preferred_element_type=jnp.float32) + sbo_ref[...]
    y = _layer_norm(xf + proj, g1_ref[...], be1_ref[...])

    # --- cross-attention (Q from decoder stream, fused KV from encoder output)
    cross_bias = jnp.where(km_ref[0] > 0.0, 0.0, _NEG)     # (1, Se)
    yb = y.astype(jnp.bfloat16)
    q = jnp.dot(yb, cwq_ref[...], preferred_element_type=jnp.float32) + cbq_ref[...]
    qkv_s[:, pl.ds(0, D)] = q.astype(jnp.bfloat16)          # reuse scratch for cross Q
    kv = jnp.dot(e, cwkv_ref[...], preferred_element_type=jnp.float32) + cbkv_ref[...]
    kv_s[...] = kv.astype(jnp.bfloat16)
    _mha_heads(qkv_s, kv_s, kv_s, 0, 0, D, ctx_s, cross_bias,
               num_heads=num_heads, dk=dk, scale=scale)
    proj = jnp.dot(ctx_s[...], cwo_ref[...], preferred_element_type=jnp.float32) + cbo_ref[...]
    y = _layer_norm(y + proj, g2_ref[...], be2_ref[...])

    # --- FFN
    yb = y.astype(jnp.bfloat16)
    z = y + _ffn(yb, w1_ref, b1_ref, w2_ref, dff, dff_chunk) + b2_ref[...]
    z = _layer_norm(z, g3_ref[...], be3_ref[...])
    o_ref[0] = z.astype(o_ref.dtype)


def decoder_layer(x, enc_out, qmask, kmask, lp, num_heads):
    B, Sd, D = x.shape
    Se = enc_out.shape[1]
    dff = lp["w1"].shape[1]
    kern = functools.partial(_dec_layer_kernel, num_heads=num_heads,
                             scale=1.0 / math.sqrt(D // num_heads),
                             dff=dff, dff_chunk=_dff_chunk(dff))
    w = lambda r, c: pl.BlockSpec((r, c), lambda b: (0, 0))
    sm, cm = lp["self_mha"], lp["cross_mha"]
    return pl.pallas_call(
        kern,
        out_shape=jax.ShapeDtypeStruct((B, Sd, D), x.dtype),
        grid=(B,),
        in_specs=[
            pl.BlockSpec((1, Sd, D), lambda b: (b, 0, 0)),
            pl.BlockSpec((1, Se, D), lambda b: (b, 0, 0)),
            pl.BlockSpec((1, Sd, 1), lambda b: (b, 0, 0)),
            pl.BlockSpec((1, 1, Se), lambda b: (b, 0, 0)),
            w(D, 3 * D), w(1, 3 * D), w(D, D), w(1, D), w(1, D), w(1, D),
            w(D, D), w(1, D), w(D, 2 * D), w(1, 2 * D), w(D, D), w(1, D), w(1, D), w(1, D),
            w(D, dff), w(1, dff), w(dff, D), w(1, D), w(1, D), w(1, D),
        ],
        out_specs=pl.BlockSpec((1, Sd, D), lambda b: (b, 0, 0)),
        scratch_shapes=[pltpu.VMEM((Sd, 3 * D), jnp.bfloat16),
                        pltpu.VMEM((Se, 2 * D), jnp.bfloat16),
                        pltpu.VMEM((Sd, D), jnp.bfloat16)],
        compiler_params=pltpu.CompilerParams(
            dimension_semantics=("parallel",), vmem_limit_bytes=_VMEM_LIMIT),
    )(x, enc_out, qmask, kmask,
      sm["wqkv"], sm["bqkv"], sm["wo"], sm["bo"], lp["ln1_g"], lp["ln1_b"],
      cm["wq"], cm["bq"], cm["wkv"], cm["bkv"], cm["wo"], cm["bo"], lp["ln2_g"], lp["ln2_b"],
      lp["w1"], lp["b1"], lp["w2"], lp["b2"], lp["ln3_g"], lp["ln3_b"])


# ----------------------------------------------------------------------------- tiled vocab projection

def _linear_kernel(x_ref, w_ref, b_ref, o_ref, acc_ref):
    @pl.when(pl.program_id(2) == 0)
    def _init():
        acc_ref[...] = jnp.zeros_like(acc_ref)

    acc_ref[...] += jnp.dot(x_ref[...], w_ref[...], preferred_element_type=jnp.float32)

    @pl.when(pl.program_id(2) == pl.num_programs(2) - 1)
    def _finalize():
        o_ref[...] = (acc_ref[...] + b_ref[...]).astype(o_ref.dtype)


def linear(x2d, w, b):
    """x2d: [M, K] bf16   w: [K, N] bf16   b: [N] f32  ->  [M, N] f32."""
    M, K = x2d.shape
    _, N = w.shape
    tm = min(256, _round_up(M, 8))
    tn = min(256, _round_up(N, 128))
    tk = min(512, _round_up(K, 128))
    Mp, Np, Kp = _round_up(M, tm), _round_up(N, tn), _round_up(K, tk)

    xp = x2d if (Mp, Kp) == (M, K) else jnp.pad(x2d, ((0, Mp - M), (0, Kp - K)))
    wp = w if (Kp, Np) == (K, N) else jnp.pad(w, ((0, Kp - K), (0, Np - N)))
    bp = (b if Np == N else jnp.pad(b, (0, Np - N))).reshape(1, Np)

    out = pl.pallas_call(
        _linear_kernel,
        out_shape=jax.ShapeDtypeStruct((Mp, Np), jnp.float32),
        grid=(Mp // tm, Np // tn, Kp // tk),
        in_specs=[
            pl.BlockSpec((tm, tk), lambda i, j, k: (i, k)),
            pl.BlockSpec((tk, tn), lambda i, j, k: (k, j)),
            pl.BlockSpec((1, tn), lambda i, j, k: (0, j)),
        ],
        out_specs=pl.BlockSpec((tm, tn), lambda i, j, k: (i, j)),
        scratch_shapes=[pltpu.VMEM((tm, tn), jnp.float32)],
        compiler_params=pltpu.CompilerParams(
            dimension_semantics=("parallel", "parallel", "arbitrary"),
            vmem_limit_bytes=_VMEM_LIMIT),
    )(xp, wp, bp)

    if (Mp, Np) != (M, N):
        out = out[:M, :N]
    return out


# ----------------------------------------------------------------------------- model glue

def positional_encoding(max_len, d_model):
    pos = jnp.arange(max_len, dtype=jnp.float32)[:, None]
    i = jnp.arange(d_model // 2, dtype=jnp.float32)[None, :]
    angle = pos / jnp.power(10000.0, (2.0 * i) / d_model)
    pe = jnp.zeros((max_len, d_model), jnp.float32)
    pe = pe.at[:, 0::2].set(jnp.sin(angle))
    pe = pe.at[:, 1::2].set(jnp.cos(angle))
    return pe


def encoder(params, tokens, kmask, num_heads):
    S = tokens.shape[1]
    D = params["emb"].shape[1]
    # TODO(synk): embedding gather + PE add left to XLA (gather has no Pallas win).
    x = (params["emb"][tokens] * math.sqrt(D) + params["pe"][:S][None]).astype(jnp.bfloat16)
    for lp in params["layers"]:
        x = encoder_layer(x, kmask, lp, num_heads)
    return x


def decoder(params, tokens, enc_out, qmask, kmask, num_heads):
    S = tokens.shape[1]
    D = params["emb"].shape[1]
    x = (params["emb"][tokens] * math.sqrt(D) + params["pe"][:S][None]).astype(jnp.bfloat16)
    for lp in params["layers"]:
        x = decoder_layer(x, enc_out, qmask, kmask, lp, num_heads)
    return x


def transformer_forward(params, enc_input, dec_input, cfg):
    B, Se = enc_input.shape
    _, Sd = dec_input.shape

    # Compact masks (the full [B, H, Sq, Sk] bias is never materialized; the causal
    # part is rebuilt in-kernel from broadcasted_iota).  Target padding is applied
    # along the QUERY axis, exactly as the reference module's dec_mask does.
    enc_kmask = (enc_input != cfg["enc_pad"]).astype(jnp.float32)[:, None, :]   # [B,1,Se]
    dec_qmask = (dec_input != cfg["dec_pad"]).astype(jnp.float32)[:, :, None]   # [B,Sd,1]

    enc_out = encoder(params["encoder"], enc_input, enc_kmask, cfg["num_heads"])
    dec_out = decoder(params["decoder"], dec_input, enc_out, dec_qmask, enc_kmask,
                      cfg["num_heads"])

    D = dec_out.shape[-1]
    logits = linear(dec_out.reshape(B * Sd, D), params["final_w"], params["final_b"])
    return logits.reshape(B, Sd, cfg["dec_vocab"])


# ----------------------------------------------------------------------------- params

def init_params(key, cfg):
    D, dff = cfg["d_model"], cfg["dff"]
    keys = iter(jax.random.split(key, 1024))

    def dense(fan_in, fan_out):
        w = (jax.random.normal(next(keys), (fan_in, fan_out), jnp.float32) * 0.02
             ).astype(jnp.bfloat16)
        return w, jnp.zeros((1, fan_out), jnp.float32)

    def ln():
        return jnp.ones((1, D), jnp.float32), jnp.zeros((1, D), jnp.float32)

    def self_mha():
        wq, bq = dense(D, D); wk, bk = dense(D, D); wv, bv = dense(D, D); wo, bo = dense(D, D)
        return dict(wqkv=jnp.concatenate([wq, wk, wv], axis=1),
                    bqkv=jnp.concatenate([bq, bk, bv], axis=1), wo=wo, bo=bo)

    def cross_mha():
        wq, bq = dense(D, D); wk, bk = dense(D, D); wv, bv = dense(D, D); wo, bo = dense(D, D)
        return dict(wq=wq, bq=bq, wkv=jnp.concatenate([wk, wv], axis=1),
                    bkv=jnp.concatenate([bk, bv], axis=1), wo=wo, bo=bo)

    def enc_layer():
        m = self_mha(); w1, b1 = dense(D, dff); w2, b2 = dense(dff, D)
        g1, be1 = ln(); g2, be2 = ln()
        return dict(mha=m, w1=w1, b1=b1, w2=w2, b2=b2,
                    ln1_g=g1, ln1_b=be1, ln2_g=g2, ln2_b=be2)

    def dec_layer():
        sm = self_mha(); cm = cross_mha(); w1, b1 = dense(D, dff); w2, b2 = dense(dff, D)
        g1, be1 = ln(); g2, be2 = ln(); g3, be3 = ln()
        return dict(self_mha=sm, cross_mha=cm, w1=w1, b1=b1, w2=w2, b2=b2,
                    ln1_g=g1, ln1_b=be1, ln2_g=g2, ln2_b=be2, ln3_g=g3, ln3_b=be3)

    pe = positional_encoding(cfg["max_len"], D)
    enc = dict(emb=jax.random.normal(next(keys), (cfg["enc_vocab"], D), jnp.float32) * 0.02,
               pe=pe, layers=[enc_layer() for _ in range(cfg["num_layers"])])
    dec = dict(emb=jax.random.normal(next(keys), (cfg["dec_vocab"], D), jnp.float32) * 0.02,
               pe=pe, layers=[dec_layer() for _ in range(cfg["num_layers"])])
    fw, _ = dense(D, cfg["dec_vocab"])
    fb = jnp.zeros((cfg["dec_vocab"],), jnp.float32)
    return dict(encoder=enc, decoder=dec, final_w=fw, final_b=fb)


# ----------------------------------------------------------------------------- main

if __name__ == "__main__":
    cfg = dict(
        enc_vocab=50, dec_vocab=60, d_model=32, num_heads=4, dff=64,
        num_layers=2, max_len=64, enc_pad=0, dec_pad=0,
    )
    key = jax.random.PRNGKey(0)
    pkey, ekey, dkey = jax.random.split(key, 3)

    params = init_params(pkey, cfg)

    B, S_enc, S_dec = 2, 8, 8
    enc_input = jax.random.randint(ekey, (B, S_enc), 1, cfg["enc_vocab"], dtype=jnp.int32)
    dec_input = jax.random.randint(dkey, (B, S_dec), 1, cfg["dec_vocab"], dtype=jnp.int32)
    # introduce some padding tokens so the masks are non-trivial
    enc_input = enc_input.at[:, -2:].set(cfg["enc_pad"])
    dec_input = dec_input.at[:, -1:].set(cfg["dec_pad"])

    fwd = jax.jit(functools.partial(transformer_forward, cfg=cfg))
    out = jax.block_until_ready(fwd(params, enc_input, dec_input))

    assert out.shape == (B, S_dec, cfg["dec_vocab"]), out.shape
    assert bool(jnp.all(jnp.isfinite(out)))
    print("KERNEL_OK")
</pallas_src>

<mosaic_0001>
module attributes {stable_mosaic.version = 11 : i64} {
  func.func @_enc_layer_kernel(%arg0: i32, %arg1: memref<1x8x32xbf16, #tpu.memory_space<vmem>>, %arg2: memref<1x1x8xf32, #tpu.memory_space<vmem>>, %arg3: memref<32x96xbf16, #tpu.memory_space<vmem>>, %arg4: memref<1x96xf32, #tpu.memory_space<vmem>>, %arg5: memref<32x32xbf16, #tpu.memory_space<vmem>>, %arg6: memref<1x32xf32, #tpu.memory_space<vmem>>, %arg7: memref<1x32xf32, #tpu.memory_space<vmem>>, %arg8: memref<1x32xf32, #tpu.memory_space<vmem>>, %arg9: memref<32x64xbf16, #tpu.memory_space<vmem>>, %arg10: memref<1x64xf32, #tpu.memory_space<vmem>>, %arg11: memref<64x32xbf16, #tpu.memory_space<vmem>>, %arg12: memref<1x32xf32, #tpu.memory_space<vmem>>, %arg13: memref<1x32xf32, #tpu.memory_space<vmem>>, %arg14: memref<1x32xf32, #tpu.memory_space<vmem>>, %arg15: memref<1x8x32xbf16, #tpu.memory_space<vmem>>, %arg16: memref<8x96xbf16, #tpu.memory_space<vmem>>, %arg17: memref<8x32xbf16, #tpu.memory_space<vmem>>) attributes {dimension_semantics = [#tpu.dimension_semantics<parallel>], iteration_bounds = array<i64: 2>, scalar_prefetch = 0 : i64, scratch_operands = 2 : i64, tpu.core_type = #tpu.core_type<tc>, window_params = [{transform_indices = @transform_0, window_bounds = array<i64: 1, 8, 32>}, {transform_indices = @transform_1, window_bounds = array<i64: 1, 1, 8>}, {pipeline_mode = #tpu.pipeline_mode<synchronous>, transform_indices = @transform_2, window_bounds = array<i64: 32, 96>}, {pipeline_mode = #tpu.pipeline_mode<synchronous>, transform_indices = @transform_3, window_bounds = array<i64: 1, 96>}, {pipeline_mode = #tpu.pipeline_mode<synchronous>, transform_indices = @transform_4, window_bounds = array<i64: 32, 32>}, {pipeline_mode = #tpu.pipeline_mode<synchronous>, transform_indices = @transform_5, window_bounds = array<i64: 1, 32>}, {pipeline_mode = #tpu.pipeline_mode<synchronous>, transform_indices = @transform_6, window_bounds = array<i64: 1, 32>}, {pipeline_mode = #tpu.pipeline_mode<synchronous>, transform_indices = @transform_7, window_bounds = array<i64: 1, 32>}, {pipeline_mode = #tpu.pipeline_mode<synchronous>, transform_indices = @transform_8, window_bounds = array<i64: 32, 64>}, {pipeline_mode = #tpu.pipeline_mode<synchronous>, transform_indices = @transform_9, window_bounds = array<i64: 1, 64>}, {pipeline_mode = #tpu.pipeline_mode<synchronous>, transform_indices = @transform_10, window_bounds = array<i64: 64, 32>}, {pipeline_mode = #tpu.pipeline_mode<synchronous>, transform_indices = @transform_11, window_bounds = array<i64: 1, 32>}, {pipeline_mode = #tpu.pipeline_mode<synchronous>, transform_indices = @transform_12, window_bounds = array<i64: 1, 32>}, {pipeline_mode = #tpu.pipeline_mode<synchronous>, transform_indices = @transform_13, window_bounds = array<i64: 1, 32>}, {transform_indices = @transform_14, window_bounds = array<i64: 1, 8, 32>}]} {
    %c0 = arith.constant 0 : index
    %c0_0 = arith.constant 0 : index
    %c0_1 = arith.constant 0 : index
    %0 = vector.load %arg1[%c0, %c0_0, %c0_1] : memref<1x8x32xbf16, #tpu.memory_space<vmem>>, vector<1x8x32xbf16>
    %1 = vector.shape_cast %0 : vector<1x8x32xbf16> to vector<8x32xbf16>
    %2 = arith.extf %1 : vector<8x32xbf16> to vector<8x32xf32>
    %c0_2 = arith.constant 0 : index
    %c0_3 = arith.constant 0 : index
    %c0_4 = arith.constant 0 : index
    %3 = vector.load %arg2[%c0_2, %c0_3, %c0_4] : memref<1x1x8xf32, #tpu.memory_space<vmem>>, vector<1x1x8xf32>
    %4 = vector.shape_cast %3 : vector<1x1x8xf32> to vector<1x8xf32>
    %cst = arith.constant 0.000000e+00 : f32
    %5 = vector.broadcast %cst : f32 to vector<1x8xf32>
    %6 = arith.cmpf ogt, %4, %5 : vector<1x8xf32>
    %cst_5 = arith.constant 0.000000e+00 : f32
    %cst_6 = arith.constant -1.000000e+09 : f32
    %7 = vector.broadcast %cst_5 : f32 to vector<1x8xf32>
    %8 = vector.broadcast %cst_6 : f32 to vector<1x8xf32>
    %9 = arith.select %6, %7, %8 : vector<1x8xi1>, vector<1x8xf32>
    %c0_7 = arith.constant 0 : index
    %c0_8 = arith.constant 0 : index
    %10 = vector.load %arg3[%c0_7, %c0_8] : memref<32x96xbf16, #tpu.memory_space<vmem>>, vector<32x96xbf16>
    %cst_9 = arith.constant dense<0.000000e+00> : vector<8x96xf32>
    %11 = tpu.matmul %1, %10, %cst_9 {dimension_numbers = #tpu.dot_dimension_numbers<[1], [0], [0], [1], [0, 0, 1, 1], [], []>} : vector<8x32xbf16>, vector<32x96xbf16>, vector<8x96xf32> -> vector<8x96xf32>
    %c0_10 = arith.constant 0 : index
    %c0_11 = arith.constant 0 : index
    %12 = vector.load %arg4[%c0_10, %c0_11] : memref<1x96xf32, #tpu.memory_space<vmem>>, vector<1x96xf32>
    %13 = vector.broadcast %12 : vector<1x96xf32> to vector<8x96xf32>
    %14 = arith.addf %11, %13 : vector<8x96xf32>
    %15 = arith.truncf %14 : vector<8x96xf32> to vector<8x96xbf16>
    %c0_12 = arith.constant 0 : index
    %c0_13 = arith.constant 0 : index
    %16 = vector.load %arg16[%c0_12, %c0_13] : memref<8x96xbf16, #tpu.memory_space<vmem>>, vector<8x96xbf16>
    tpu.vector_store %arg16[%c0_12, %c0_13], %15 {strides = array<i32>} : memref<8x96xbf16, #tpu.memory_space<vmem>>, vector<8x96xbf16>,
    %c0_14 = arith.constant 0 : index
    %c0_15 = arith.constant 0 : index
    %17 = vector.load %arg16[%c0_14, %c0_15] : memref<8x96xbf16, #tpu.memory_space<vmem>>, vector<8x8xbf16>
    %c0_16 = arith.constant 0 : index
    %c32 = arith.constant 32 : index
    %18 = vector.load %arg16[%c0_16, %c32] : memref<8x96xbf16, #tpu.memory_space<vmem>>, vector<8x8xbf16>
    %c0_17 = arith.constant 0 : index
    %c64 = arith.constant 64 : index
    %19 = vector.load %arg16[%c0_17, %c64] : memref<8x96xbf16, #tpu.memory_space<vmem>>, vector<8x8xbf16>
    %cst_18 = arith.constant dense<0.000000e+00> : vector<8x8xf32>
    %20 = tpu.matmul %17, %18, %cst_18 {dimension_numbers = #tpu.dot_dimension_numbers<[1], [1], [0], [0], [0, 0, 1, 0], [], []>} : vector<8x8xbf16>, vector<8x8xbf16>, vector<8x8xf32> -> vector<8x8xf32>
    %cst_19 = arith.constant 0.353553385 : f32
    %21 = vector.broadcast %cst_19 : f32 to vector<8x8xf32>
    %22 = arith.mulf %20, %21 : vector<8x8xf32>
    %23 = vector.broadcast %9 : vector<1x8xf32> to vector<8x8xf32>
    %24 = arith.addf %22, %23 : vector<8x8xf32>
    %cst_20 = arith.constant dense<0xFF800000> : vector<8xf32>
    %25 = vector.multi_reduction <maximumf>, %24, %cst_20 [1] : vector<8x8xf32> to vector<8xf32>
    %26 = vector.shape_cast %25 : vector<8xf32> to vector<8x1xf32>
    %27 = vector.broadcast %26 : vector<8x1xf32> to vector<8x8xf32>
    %28 = arith.subf %24, %27 : vector<8x8xf32>
    %29 = math.exp %28 : vector<8x8xf32>
    %cst_21 = arith.constant dense<0.000000e+00> : vector<8xf32>
    %30 = vector.multi_reduction <add>, %29, %cst_21 [1] : vector<8x8xf32> to vector<8xf32>
    %31 = vector.shape_cast %30 : vector<8xf32> to vector<8x1xf32>
    %32 = tpu.reciprocal %31 {approx = true} : vector<8x1xf32> -> vector<8x1xf32>
    %33 = vector.broadcast %32 : vector<8x1xf32> to vector<8x8xf32>
    %34 = arith.mulf %29, %33 : vector<8x8xf32>
    %35 = arith.truncf %34 : vector<8x8xf32> to vector<8x8xbf16>
    %cst_22 = arith.constant dense<0.000000e+00> : vector<8x8xf32>
    %36 = tpu.matmul %35, %19, %cst_22 {dimension_numbers = #tpu.dot_dimension_numbers<[1], [0], [0], [1], [0, 0, 1, 1], [], []>} : vector<8x8xbf16>, vector<8x8xbf16>, vector<8x8xf32> -> vector<8x8xf32>
    %37 = arith.truncf %36 : vector<8x8xf32> to vector<8x8xbf16>
    %c0_23 = arith.constant 0 : index
    %c0_24 = arith.constant 0 : index
    %38 = vector.load %arg17[%c0_23, %c0_24] : memref<8x32xbf16, #tpu.memory_space<vmem>>, vector<8x8xbf16>
    tpu.vector_store %arg17[%c0_23, %c0_24], %37 {strides = array<i32>} : memref<8x32xbf16, #tpu.memory_space<vmem>>, vector<8x8xbf16>,
    %c0_25 = arith.constant 0 : index
    %c8 = arith.constant 8 : index
    %39 = vector.load %arg16[%c0_25, %c8] : memref<8x96xbf16, #tpu.memory_space<vmem>>, vector<8x8xbf16>
    %c0_26 = arith.constant 0 : index
    %c40 = arith.constant 40 : index
    %40 = vector.load %arg16[%c0_26, %c40] : memref<8x96xbf16, #tpu.memory_space<vmem>>, vector<8x8xbf16>
    %c0_27 = arith.constant 0 : index
    %c72 = arith.constant 72 : index
    %41 = vector.load %arg16[%c0_27, %c72] : memref<8x96xbf16, #tpu.memory_space<vmem>>, vector<8x8xbf16>
    %cst_28 = arith.constant dense<0.000000e+00> : vector<8x8xf32>
    %42 = tpu.matmul %39, %40, %cst_28 {dimension_numbers = #tpu.dot_dimension_numbers<[1], [1], [0], [0], [0, 0, 1, 0], [], []>} : vector<8x8xbf16>, vector<8x8xbf16>, vector<8x8xf32> -> vector<8x8xf32>
    %cst_29 = arith.constant 0.353553385 : f32
    %43 = vector.broadcast %cst_29 : f32 to vector<8x8xf32>
    %44 = arith.mulf %42, %43 : vector<8x8xf32>
    %45 = vector.broadcast %9 : vector<1x8xf32> to vector<8x8xf32>
    %46 = arith.addf %44, %45 : vector<8x8xf32>
    %cst_30 = arith.constant dense<0xFF800000> : vector<8xf32>
    %47 = vector.multi_reduction <maximumf>, %46, %cst_30 [1] : vector<8x8xf32> to vector<8xf32>
    %48 = vector.shape_cast %47 : vector<8xf32> to vector<8x1xf32>
    %49 = vector.broadcast %48 : vector<8x1xf32> to vector<8x8xf32>
    %50 = arith.subf %46, %49 : vector<8x8xf32>
    %51 = math.exp %50 : vector<8x8xf32>
    %cst_31 = arith.constant dense<0.000000e+00> : vector<8xf32>
    %52 = vector.multi_reduction <add>, %51, %cst_31 [1] : vector<8x8xf32> to vector<8xf32>
    %53 = vector.shape_cast %52 : vector<8xf32> to vector<8x1xf32>
    %54 = tpu.reciprocal %53 {approx = true} : vector<8x1xf32> -> vector<8x1xf32>
    %55 = vector.broadcast %54 : vector<8x1xf32> to vector<8x8xf32>
    %56 = arith.mulf %51, %55 : vector<8x8xf32>
    %57 = arith.truncf %56 : vector<8x8xf32> to vector<8x8xbf16>
    %cst_32 = arith.constant dense<0.000000e+00> : vector<8x8xf32>
    %58 = tpu.matmul %57, %41, %cst_32 {dimension_numbers = #tpu.dot_dimension_numbers<[1], [0], [0], [1], [0, 0, 1, 1], [], []>} : vector<8x8xbf16>, vector<8x8xbf16>, vector<8x8xf32> -> vector<8x8xf32>
    %59 = arith.truncf %58 : vector<8x8xf32> to vector<8x8xbf16>
    %c0_33 = arith.constant 0 : index
    %c8_34 = arith.constant 8 : index
    %60 = vector.load %arg17[%c0_33, %c8_34] : memref<8x32xbf16, #tpu.memory_space<vmem>>, vector<8x8xbf16>
    tpu.vector_store %arg17[%c0_33, %c8_34], %59 {strides = array<i32>} : memref<8x32xbf16, #tpu.memory_space<vmem>>, vector<8x8xbf16>,
    %c0_35 = arith.constant 0 : index
    %c16 = arith.constant 16 : index
    %61 = vector.load %arg16[%c0_35, %c16] : memref<8x96xbf16, #tpu.memory_space<vmem>>, vector<8x8xbf16>
    %c0_36 = arith.constant 0 : index
    %c48 = arith.constant 48 : index
    %62 = vector.load %arg16[%c0_36, %c48] : memref<8x96xbf16, #tpu.memory_space<vmem>>, vector<8x8xbf16>
    %c0_37 = arith.constant 0 : index
    %c80 = arith.constant 80 : index
    %63 = vector.load %arg16[%c0_37, %c80] : memref<8x96xbf16, #tpu.memory_space<vmem>>, vector<8x8xbf16>
    %cst_38 = arith.constant dense<0.000000e+00> : vector<8x8xf32>
    %64 = tpu.matmul %61, %62, %cst_38 {dimension_numbers = #tpu.dot_dimension_numbers<[1], [1], [0], [0], [0, 0, 1, 0], [], []>} : vector<8x8xbf16>, vector<8x8xbf16>, vector<8x8xf32> -> vector<8x8xf32>
    %cst_39 = arith.constant 0.353553385 : f32
    %65 = vector.broadcast %cst_39 : f32 to vector<8x8xf32>
    %66 = arith.mulf %64, %65 : vector<8x8xf32>
    %67 = vector.broadcast %9 : vector<1x8xf32> to vector<8x8xf32>
    %68 = arith.addf %66, %67 : vector<8x8xf32>
    %cst_40 = arith.constant dense<0xFF800000> : vector<8xf32>
    %69 = vector.multi_reduction <maximumf>, %68, %cst_40 [1] : vector<8x8xf32> to vector<8xf32>
    %70 = vector.shape_cast %69 : vector<8xf32> to vector<8x1xf32>
    %71 = vector.broadcast %70 : vector<8x1xf32> to vector<8x8xf32>
    %72 = arith.subf %68, %71 : vector<8x8xf32>
    %73 = math.exp %72 : vector<8x8xf32>
    %cst_41 = arith.constant dense<0.000000e+00> : vector<8xf32>
    %74 = vector.multi_reduction <add>, %73, %cst_41 [1] : vector<8x8xf32> to vector<8xf32>
    %75 = vector.shape_cast %74 : vector<8xf32> to vector<8x1xf32>
    %76 = tpu.reciprocal %75 {approx = true} : vector<8x1xf32> -> vector<8x1xf32>
    %77 = vector.broadcast %76 : vector<8x1xf32> to vector<8x8xf32>
    %78 = arith.mulf %73, %77 : vector<8x8xf32>
    %79 = arith.truncf %78 : vector<8x8xf32> to vector<8x8xbf16>
    %cst_42 = arith.constant dense<0.000000e+00> : vector<8x8xf32>
    %80 = tpu.matmul %79, %63, %cst_42 {dimension_numbers = #tpu.dot_dimension_numbers<[1], [0], [0], [1], [0, 0, 1, 1], [], []>} : vector<8x8xbf16>, vector<8x8xbf16>, vector<8x8xf32> -> vector<8x8xf32>
    %81 = arith.truncf %80 : vector<8x8xf32> to vector<8x8xbf16>
    %c0_43 = arith.constant 0 : index
    %c16_44 = arith.constant 16 : index
    %82 = vector.load %arg17[%c0_43, %c16_44] : memref<8x32xbf16, #tpu.memory_space<vmem>>, vector<8x8xbf16>
    tpu.vector_store %arg17[%c0_43, %c16_44], %81 {strides = array<i32>} : memref<8x32xbf16, #tpu.memory_space<vmem>>, vector<8x8xbf16>,
    %c0_45 = arith.constant 0 : index
    %c24 = arith.constant 24 : index
    %83 = vector.load %arg16[%c0_45, %c24] : memref<8x96xbf16, #tpu.memory_space<vmem>>, vector<8x8xbf16>
    %c0_46 = arith.constant 0 : index
    %c56 = arith.constant 56 : index
    %84 = vector.load %arg16[%c0_46, %c56] : memref<8x96xbf16, #tpu.memory_space<vmem>>, vector<8x8xbf16>
    %c0_47 = arith.constant 0 : index
    %c88 = arith.constant 88 : index
    %85 = vector.load %arg16[%c0_47, %c88] : memref<8x96xbf16, #tpu.memory_space<vmem>>, vector<8x8xbf16>
    %cst_48 = arith.constant dense<0.000000e+00> : vector<8x8xf32>
    %86 = tpu.matmul %83, %84, %cst_48 {dimension_numbers = #tpu.dot_dimension_numbers<[1], [1], [0], [0], [0, 0, 1, 0], [], []>} : vector<8x8xbf16>, vector<8x8xbf16>, vector<8x8xf32> -> vector<8x8xf32>
    %cst_49 = arith.constant 0.353553385 : f32
    %87 = vector.broadcast %cst_49 : f32 to vector<8x8xf32>
    %88 = arith.mulf %86, %87 : vector<8x8xf32>
    %89 = vector.broadcast %9 : vector<1x8xf32> to vector<8x8xf32>
    %90 = arith.addf %88, %89 : vector<8x8xf32>
    %cst_50 = arith.constant dense<0xFF800000> : vector<8xf32>
    %91 = vector.multi_reduction <maximumf>, %90, %cst_50 [1] : vector<8x8xf32> to vector<8xf32>
    %92 = vector.shape_cast %91 : vector<8xf32> to vector<8x1xf32>
    %93 = vector.broadcast %92 : vector<8x1xf32> to vector<8x8xf32>
    %94 = arith.subf %90, %93 : vector<8x8xf32>
    %95 = math.exp %94 : vector<8x8xf32>
    %cst_51 = arith.constant dense<0.000000e+00> : vector<8xf32>
    %96 = vector.multi_reduction <add>, %95, %cst_51 [1] : vector<8x8xf32> to vector<8xf32>
    %97 = vector.shape_cast %96 : vector<8xf32> to vector<8x1xf32>
    %98 = tpu.reciprocal %97 {approx = true} : vector<8x1xf32> -> vector<8x1xf32>
    %99 = vector.broadcast %98 : vector<8x1xf32> to vector<8x8xf32>
    %100 = arith.mulf %95, %99 : vector<8x8xf32>
    %101 = arith.truncf %100 : vector<8x8xf32> to vector<8x8xbf16>
    %cst_52 = arith.constant dense<0.000000e+00> : vector<8x8xf32>
    %102 = tpu.matmul %101, %85, %cst_52 {dimension_numbers = #tpu.dot_dimension_numbers<[1], [0], [0], [1], [0, 0, 1, 1], [], []>} : vector<8x8xbf16>, vector<8x8xbf16>, vector<8x8xf32> -> vector<8x8xf32>
    %103 = arith.truncf %102 : vector<8x8xf32> to vector<8x8xbf16>
    %c0_53 = arith.constant 0 : index
    %c24_54 = arith.constant 24 : index
    %104 = vector.load %arg17[%c0_53, %c24_54] : memref<8x32xbf16, #tpu.memory_space<vmem>>, vector<8x8xbf16>
    tpu.vector_store %arg17[%c0_53, %c24_54], %103 {strides = array<i32>} : memref<8x32xbf16, #tpu.memory_space<vmem>>, vector<8x8xbf16>,
    %c0_55 = arith.constant 0 : index
    %c0_56 = arith.constant 0 : index
    %105 = vector.load %arg17[%c0_55, %c0_56] : memref<8x32xbf16, #tpu.memory_space<vmem>>, vector<8x32xbf16>
    %c0_57 = arith.constant 0 : index
    %c0_58 = arith.constant 0 : index
    %106 = vector.load %arg5[%c0_57, %c0_58] : memref<32x32xbf16, #tpu.memory_space<vmem>>, vector<32x32xbf16>
    %cst_59 = arith.constant dense<0.000000e+00> : vector<8x32xf32>
    %107 = tpu.matmul %105, %106, %cst_59 {dimension_numbers = #tpu.dot_dimension_numbers<[1], [0], [0], [1], [0, 0, 1, 1], [], []>} : vector<8x32xbf16>, vector<32x32xbf16>, vector<8x32xf32> -> vector<8x32xf32>
    %c0_60 = arith.constant 0 : index
    %c0_61 = arith.constant 0 : index
    %108 = vector.load %arg6[%c0_60, %c0_61] : memref<1x32xf32, #tpu.memory_space<vmem>>, vector<1x32xf32>
    %109 = vector.broadcast %108 : vector<1x32xf32> to vector<8x32xf32>
    %110 = arith.addf %107, %109 : vector<8x32xf32>
    %111 = arith.addf %2, %110 : vector<8x32xf32>
    %c0_62 = arith.constant 0 : index
    %c0_63 = arith.constant 0 : index
    %112 = vector.load %arg7[%c0_62, %c0_63] : memref<1x32xf32, #tpu.memory_space<vmem>>, vector<1x32xf32>
    %c0_64 = arith.constant 0 : index
    %c0_65 = arith.constant 0 : index
    %113 = vector.load %arg8[%c0_64, %c0_65] : memref<1x32xf32, #tpu.memory_space<vmem>>, vector<1x32xf32>
    %cst_66 = arith.constant dense<0.000000e+00> : vector<8xf32>
    %114 = vector.multi_reduction <add>, %111, %cst_66 [1] : vector<8x32xf32> to vector<8xf32>
    %115 = vector.shape_cast %114 : vector<8xf32> to vector<8x1xf32>
    %cst_67 = arith.constant 3.200000e+01 : f32
    %116 = vector.broadcast %cst_67 : f32 to vector<8x1xf32>
    %117 = arith.divf %115, %116 : vector<8x1xf32>
    %118 = vector.broadcast %117 : vector<8x1xf32> to vector<8x32xf32>
    %119 = arith.subf %111, %118 : vector<8x32xf32>
    %120 = arith.mulf %119, %119 : vector<8x32xf32>
    %cst_68 = arith.constant dense<0.000000e+00> : vector<8xf32>
    %121 = vector.multi_reduction <add>, %120, %cst_68 [1] : vector<8x32xf32> to vector<8xf32>
    %122 = vector.shape_cast %121 : vector<8xf32> to vector<8x1xf32>
    %cst_69 = arith.constant 3.200000e+01 : f32
    %123 = vector.broadcast %cst_69 : f32 to vector<8x1xf32>
    %124 = arith.divf %122, %123 : vector<8x1xf32>
    %125 = vector.broadcast %117 : vector<8x1xf32> to vector<8x32xf32>
    %126 = arith.subf %111, %125 : vector<8x32xf32>
    %cst_70 = arith.constant 9.99999974E-6 : f32
    %127 = vector.broadcast %cst_70 : f32 to vector<8x1xf32>
    %128 = arith.addf %124, %127 : vector<8x1xf32>
    %129 = math.rsqrt %128 : vector<8x1xf32>
    %130 = vector.broadcast %129 : vector<8x1xf32> to vector<8x32xf32>
    %131 = arith.mulf %126, %130 : vector<8x32xf32>
    %132 = vector.broadcast %112 : vector<1x32xf32> to vector<8x32xf32>
    %133 = arith.mulf %131, %132 : vector<8x32xf32>
    %134 = vector.broadcast %113 : vector<1x32xf32> to vector<8x32xf32>
    %135 = arith.addf %133, %134 : vector<8x32xf32>
    %136 = arith.truncf %135 : vector<8x32xf32> to vector<8x32xbf16>
    %c0_71 = arith.constant 0 : index
    %c0_72 = arith.constant 0 : index
    %137 = vector.load %arg9[%c0_71, %c0_72] : memref<32x64xbf16, #tpu.memory_space<vmem>>, vector<32x64xbf16>
    %cst_73 = arith.constant dense<0.000000e+00> : vector<8x64xf32>
    %138 = tpu.matmul %136, %137, %cst_73 {dimension_numbers = #tpu.dot_dimension_numbers<[1], [0], [0], [1], [0, 0, 1, 1], [], []>} : vector<8x32xbf16>, vector<32x64xbf16>, vector<8x64xf32> -> vector<8x64xf32>
    %c0_74 = arith.constant 0 : index
    %c0_75 = arith.constant 0 : index
    %139 = vector.load %arg10[%c0_74, %c0_75] : memref<1x64xf32, #tpu.memory_space<vmem>>, vector<1x64xf32>
    %140 = vector.broadcast %139 : vector<1x64xf32> to vector<8x64xf32>
    %141 = arith.addf %138, %140 : vector<8x64xf32>
    %cst_76 = arith.constant 0.000000e+00 : f32
    %142 = vector.broadcast %cst_76 : f32 to vector<8x64xf32>
    %143 = arith.maximumf %141, %142 : vector<8x64xf32>
    %144 = arith.truncf %143 : vector<8x64xf32> to vector<8x64xbf16>
    %c0_77 = arith.constant 0 : index
    %c0_78 = arith.constant 0 : index
    %145 = vector.load %arg11[%c0_77, %c0_78] : memref<64x32xbf16, #tpu.memory_space<vmem>>, vector<64x32xbf16>
    %cst_79 = arith.constant dense<0.000000e+00> : vector<8x32xf32>
    %146 = tpu.matmul %144, %145, %cst_79 {dimension_numbers = #tpu.dot_dimension_numbers<[1], [0], [0], [1], [0, 0, 1, 1], [], []>} : vector<8x64xbf16>, vector<64x32xbf16>, vector<8x32xf32> -> vector<8x32xf32>
    %147 = arith.addf %135, %146 : vector<8x32xf32>
    %c0_80 = arith.constant 0 : index
    %c0_81 = arith.constant 0 : index
    %148 = vector.load %arg12[%c0_80, %c0_81] : memref<1x32xf32, #tpu.memory_space<vmem>>, vector<1x32xf32>
    %149 = vector.broadcast %148 : vector<1x32xf32> to vector<8x32xf32>
    %150 = arith.addf %147, %149 : vector<8x32xf32>
    %c0_82 = arith.constant 0 : index
    %c0_83 = arith.constant 0 : index
    %151 = vector.load %arg13[%c0_82, %c0_83] : memref<1x32xf32, #tpu.memory_space<vmem>>, vector<1x32xf32>
    %c0_84 = arith.constant 0 : index
    %c0_85 = arith.constant 0 : index
    %152 = vector.load %arg14[%c0_84, %c0_85] : memref<1x32xf32, #tpu.memory_space<vmem>>, vector<1x32xf32>
    %cst_86 = arith.constant dense<0.000000e+00> : vector<8xf32>
    %153 = vector.multi_reduction <add>, %150, %cst_86 [1] : vector<8x32xf32> to vector<8xf32>
    %154 = vector.shape_cast %153 : vector<8xf32> to vector<8x1xf32>
    %cst_87 = arith.constant 3.200000e+01 : f32
    %155 = vector.broadcast %cst_87 : f32 to vector<8x1xf32>
    %156 = arith.divf %154, %155 : vector<8x1xf32>
    %157 = vector.broadcast %156 : vector<8x1xf32> to vector<8x32xf32>
    %158 = arith.subf %150, %157 : vector<8x32xf32>
    %159 = arith.mulf %158, %158 : vector<8x32xf32>
    %cst_88 = arith.constant dense<0.000000e+00> : vector<8xf32>
    %160 = vector.multi_reduction <add>, %159, %cst_88 [1] : vector<8x32xf32> to vector<8xf32>
    %161 = vector.shape_cast %160 : vector<8xf32> to vector<8x1xf32>
    %cst_89 = arith.constant 3.200000e+01 : f32
    %162 = vector.broadcast %cst_89 : f32 to vector<8x1xf32>
    %163 = arith.divf %161, %162 : vector<8x1xf32>
    %164 = vector.broadcast %156 : vector<8x1xf32> to vector<8x32xf32>
    %165 = arith.subf %150, %164 : vector<8x32xf32>
    %cst_90 = arith.constant 9.99999974E-6 : f32
    %166 = vector.broadcast %cst_90 : f32 to vector<8x1xf32>
    %167 = arith.addf %163, %166 : vector<8x1xf32>
    %168 = math.rsqrt %167 : vector<8x1xf32>
    %169 = vector.broadcast %168 : vector<8x1xf32> to vector<8x32xf32>
    %170 = arith.mulf %165, %169 : vector<8x32xf32>
    %171 = vector.broadcast %151 : vector<1x32xf32> to vector<8x32xf32>
    %172 = arith.mulf %170, %171 : vector<8x32xf32>
    %173 = vector.broadcast %152 : vector<1x32xf32> to vector<8x32xf32>
    %174 = arith.addf %172, %173 : vector<8x32xf32>
    %175 = arith.truncf %174 : vector<8x32xf32> to vector<8x32xbf16>
    %c0_91 = arith.constant 0 : index
    %c0_92 = arith.constant 0 : index
    %c0_93 = arith.constant 0 : index
    %176 = vector.load %arg15[%c0_91, %c0_92, %c0_93] : memref<1x8x32xbf16, #tpu.memory_space<vmem>>, vector<1x8x32xbf16>
    %177 = vector.shape_cast %176 : vector<1x8x32xbf16> to vector<8x32xbf16>
    %178 = vector.shape_cast %175 : vector<8x32xbf16> to vector<1x8x32xbf16>
    tpu.vector_store %arg15[%c0_91, %c0_92, %c0_93], %178 {strides = array<i32>} : memref<1x8x32xbf16, #tpu.memory_space<vmem>>, vector<1x8x32xbf16>,
    return
  }
  func.func @transform_0(%arg0: i32) -> (i32, i32, i32) {
    %c0_i32 = arith.constant 0 : i32
    %c0_i32_0 = arith.constant 0 : i32
    %c0_i32_1 = arith.constant 0 : i32
    return %arg0, %c0_i32, %c0_i32_0 : i32, i32, i32
  }
  func.func @transform_1(%arg0: i32) -> (i32, i32, i32) {
    %c0_i32 = arith.constant 0 : i32
    %c0_i32_0 = arith.constant 0 : i32
    %c0_i32_1 = arith.constant 0 : i32
    return %arg0, %c0_i32, %c0_i32_0 : i32, i32, i32
  }
  func.func @transform_2(%arg0: i32) -> (i32, i32) {
    %c0_i32 = arith.constant 0 : i32
    %c0_i32_0 = arith.constant 0 : i32
    %c0_i32_1 = arith.constant 0 : i32
    return %c0_i32, %c0_i32_0 : i32, i32
  }
  func.func @transform_3(%arg0: i32) -> (i32, i32) {
    %c0_i32 = arith.constant 0 : i32
    %c0_i32_0 = arith.constant 0 : i32
    %c0_i32_1 = arith.constant 0 : i32
    return %c0_i32, %c0_i32_0 : i32, i32
  }
  func.func @transform_4(%arg0: i32) -> (i32, i32) {
    %c0_i32 = arith.constant 0 : i32
    %c0_i32_0 = arith.constant 0 : i32
    %c0_i32_1 = arith.constant 0 : i32
    return %c0_i32, %c0_i32_0 : i32, i32
  }
  func.func @transform_5(%arg0: i32) -> (i32, i32) {
    %c0_i32 = arith.constant 0 : i32
    %c0_i32_0 = arith.constant 0 : i32
    %c0_i32_1 = arith.constant 0 : i32
    return %c0_i32, %c0_i32_0 : i32, i32
  }
  func.func @transform_6(%arg0: i32) -> (i32, i32) {
    %c0_i32 = arith.constant 0 : i32
    %c0_i32_0 = arith.constant 0 : i32
    %c0_i32_1 = arith.constant 0 : i32
    return %c0_i32, %c0_i32_0 : i32, i32
  }
  func.func @transform_7(%arg0: i32) -> (i32, i32) {
    %c0_i32 = arith.constant 0 : i32
    %c0_i32_0 = arith.constant 0 : i32
    %c0_i32_1 = arith.constant 0 : i32
    return %c0_i32, %c0_i32_0 : i32, i32
  }
  func.func @transform_8(%arg0: i32) -> (i32, i32) {
    %c0_i32 = arith.constant 0 : i32
    %c0_i32_0 = arith.constant 0 : i32
    %c0_i32_1 = arith.constant 0 : i32
    return %c0_i32, %c0_i32_0 : i32, i32
  }
  func.func @transform_9(%arg0: i32) -> (i32, i32) {
    %c0_i32 = arith.constant 0 : i32
    %c0_i32_0 = arith.constant 0 : i32
    %c0_i32_1 = arith.constant 0 : i32
    return %c0_i32, %c0_i32_0 : i32, i32
  }
  func.func @transform_10(%arg0: i32) -> (i32, i32) {
    %c0_i32 = arith.constant 0 : i32
    %c0_i32_0 = arith.constant 0 : i32
    %c0_i32_1 = arith.constant 0 : i32
    return %c0_i32, %c0_i32_0 : i32, i32
  }
  func.func @transform_11(%arg0: i32) -> (i32, i32) {
    %c0_i32 = arith.constant 0 : i32
    %c0_i32_0 = arith.constant 0 : i32
    %c0_i32_1 = arith.constant 0 : i32
    return %c0_i32, %c0_i32_0 : i32, i32
  }
  func.func @transform_12(%arg0: i32) -> (i32, i32) {
    %c0_i32 = arith.constant 0 : i32
    %c0_i32_0 = arith.constant 0 : i32
    %c0_i32_1 = arith.constant 0 : i32
    return %c0_i32, %c0_i32_0 : i32, i32
  }
  func.func @transform_13(%arg0: i32) -> (i32, i32) {
    %c0_i32 = arith.constant 0 : i32
    %c0_i32_0 = arith.constant 0 : i32
    %c0_i32_1 = arith.constant 0 : i32
    return %c0_i32, %c0_i32_0 : i32, i32
  }
  func.func @transform_14(%arg0: i32) -> (i32, i32, i32) {
    %c0_i32 = arith.constant 0 : i32
    %c0_i32_0 = arith.constant 0 : i32
    %c0_i32_1 = arith.constant 0 : i32
    return %arg0, %c0_i32, %c0_i32_0 : i32, i32, i32
  }
}

module attributes {stable_mosaic.version = 11 : i64} {
  func.func @_linear_kernel(%arg0: i32, %arg1: i32, %arg2: i32, %arg3: memref<16x128xbf16, #tpu.memory_space<vmem>>, %arg4: memref<128x128xbf16, #tpu.memory_space<vmem>>, %arg5: memref<1x128xf32, #tpu.memory_space<vmem>>, %arg6: memref<16x128xf32, #tpu.memory_space<vmem>>, %arg7: memref<16x128xf32, #tpu.memory_space<vmem>>) attributes {dimension_semantics = [#tpu.dimension_semantics<parallel>, #tpu.dimension_semantics<parallel>, #tpu.dimension_semantics<arbitrary>], iteration_bounds = array<i64: 1, 1, 1>, scalar_prefetch = 0 : i64, scratch_operands = 1 : i64, tpu.core_type = #tpu.core_type<tc>, window_params = [{transform_indices = @transform_0, window_bounds = array<i64: 16, 128>}, {transform_indices = @transform_1, window_bounds = array<i64: 128, 128>}, {transform_indices = @transform_2, window_bounds = array<i64: 1, 128>}, {transform_indices = @transform_3, window_bounds = array<i64: 16, 128>}]} {
    %c0_i32 = arith.constant 0 : i32
    %0 = arith.cmpi eq, %arg2, %c0_i32 : i32
    %1 = arith.extui %0 : i1 to i32
    %c0_i32_0 = arith.constant 0 : i32
    %2 = arith.cmpi ne, %1, %c0_i32_0 : i32
    scf.if %2 {
      %cst_10 = arith.constant 0.000000e+00 : f32
      %12 = vector.broadcast %cst_10 : f32 to vector<16x128xf32>
      %c0_11 = arith.constant 0 : index
      %c0_12 = arith.constant 0 : index
      %13 = vector.load %arg7[%c0_11, %c0_12] : memref<16x128xf32, #tpu.memory_space<vmem>>, vector<16x128xf32>
      tpu.vector_store %arg7[%c0_11, %c0_12], %12 {strides = array<i32>} : memref<16x128xf32, #tpu.memory_space<vmem>>, vector<16x128xf32>,
    } else {
    }
    %c0 = arith.constant 0 : index
    %c0_1 = arith.constant 0 : index
    %3 = vector.load %arg7[%c0, %c0_1] : memref<16x128xf32, #tpu.memory_space<vmem>>, vector<16x128xf32>
    %c0_2 = arith.constant 0 : index
    %c0_3 = arith.constant 0 : index
    %4 = vector.load %arg3[%c0_2, %c0_3] : memref<16x128xbf16, #tpu.memory_space<vmem>>, vector<16x128xbf16>
    %c0_4 = arith.constant 0 : index
    %c0_5 = arith.constant 0 : index
    %5 = vector.load %arg4[%c0_4, %c0_5] : memref<128x128xbf16, #tpu.memory_space<vmem>>, vector<128x128xbf16>
    %cst = arith.constant dense<0.000000e+00> : vector<16x128xf32>
    %6 = tpu.matmul %4, %5, %cst {dimension_numbers = #tpu.dot_dimension_numbers<[1], [0], [0], [1], [0, 0, 1, 1], [], []>} : vector<16x128xbf16>, vector<128x128xbf16>, vector<16x128xf32> -> vector<16x128xf32>
    %7 = arith.addf %3, %6 : vector<16x128xf32>
    %c0_6 = arith.constant 0 : index
    %c0_7 = arith.constant 0 : index
    %8 = vector.load %arg7[%c0_6, %c0_7] : memref<16x128xf32, #tpu.memory_space<vmem>>, vector<16x128xf32>
    tpu.vector_store %arg7[%c0_6, %c0_7], %7 {strides = array<i32>} : memref<16x128xf32, #tpu.memory_space<vmem>>, vector<16x128xf32>,
    %c0_i32_8 = arith.constant 0 : i32
    %9 = arith.cmpi eq, %arg2, %c0_i32_8 : i32
    %10 = arith.extui %9 : i1 to i32
    %c0_i32_9 = arith.constant 0 : i32
    %11 = arith.cmpi ne, %10, %c0_i32_9 : i32
    scf.if %11 {
      %c0_10 = arith.constant 0 : index
      %c0_11 = arith.constant 0 : index
      %12 = vector.load %arg7[%c0_10, %c0_11] : memref<16x128xf32, #tpu.memory_space<vmem>>, vector<16x128xf32>
      %c0_12 = arith.constant 0 : index
      %c0_13 = arith.constant 0 : index
      %13 = vector.load %arg5[%c0_12, %c0_13] : memref<1x128xf32, #tpu.memory_space<vmem>>, vector<1x128xf32>
      %14 = vector.broadcast %13 : vector<1x128xf32> to vector<16x128xf32>
      %15 = arith.addf %12, %14 : vector<16x128xf32>
      %c0_14 = arith.constant 0 : index
      %c0_15 = arith.constant 0 : index
      %16 = vector.load %arg6[%c0_14, %c0_15] : memref<16x128xf32, #tpu.memory_space<vmem>>, vector<16x128xf32>
      tpu.vector_store %arg6[%c0_14, %c0_15], %15 {strides = array<i32>} : memref<16x128xf32, #tpu.memory_space<vmem>>, vector<16x128xf32>,
    } else {
    }
    return
  }
  func.func @transform_0(%arg0: i32, %arg1: i32, %arg2: i32) -> (i32, i32) {
    %c0_i32 = arith.constant 0 : i32
    return %arg0, %arg2 : i32, i32
  }
  func.func @transform_1(%arg0: i32, %arg1: i32, %arg2: i32) -> (i32, i32) {
    %c0_i32 = arith.constant 0 : i32
    return %arg2, %arg1 : i32, i32
  }
  func.func @transform_2(%arg0: i32, %arg1: i32, %arg2: i32) -> (i32, i32) {
    %c0_i32 = arith.constant 0 : i32
    %c0_i32_0 = arith.constant 0 : i32
    return %c0_i32, %arg1 : i32, i32
  }
  func.func @transform_3(%arg0: i32, %arg1: i32, %arg2: i32) -> (i32, i32) {
    %c0_i32 = arith.constant 0 : i32
    return %arg0, %arg1 : i32, i32
  }
}

module attributes {stable_mosaic.version = 11 : i64} {
  func.func @_dec_layer_kernel(%arg0: i32, %arg1: memref<1x8x32xbf16, #tpu.memory_space<vmem>>, %arg2: memref<1x8x32xbf16, #tpu.memory_space<vmem>>, %arg3: memref<1x8x1xf32, #tpu.memory_space<vmem>>, %arg4: memref<1x1x8xf32, #tpu.memory_space<vmem>>, %arg5: memref<32x96xbf16, #tpu.memory_space<vmem>>, %arg6: memref<1x96xf32, #tpu.memory_space<vmem>>, %arg7: memref<32x32xbf16, #tpu.memory_space<vmem>>, %arg8: memref<1x32xf32, #tpu.memory_space<vmem>>, %arg9: memref<1x32xf32, #tpu.memory_space<vmem>>, %arg10: memref<1x32xf32, #tpu.memory_space<vmem>>, %arg11: memref<32x32xbf16, #tpu.memory_space<vmem>>, %arg12: memref<1x32xf32, #tpu.memory_space<vmem>>, %arg13: memref<32x64xbf16, #tpu.memory_space<vmem>>, %arg14: memref<1x64xf32, #tpu.memory_space<vmem>>, %arg15: memref<32x32xbf16, #tpu.memory_space<vmem>>, %arg16: memref<1x32xf32, #tpu.memory_space<vmem>>, %arg17: memref<1x32xf32, #tpu.memory_space<vmem>>, %arg18: memref<1x32xf32, #tpu.memory_space<vmem>>, %arg19: memref<32x64xbf16, #tpu.memory_space<vmem>>, %arg20: memref<1x64xf32, #tpu.memory_space<vmem>>, %arg21: memref<64x32xbf16, #tpu.memory_space<vmem>>, %arg22: memref<1x32xf32, #tpu.memory_space<vmem>>, %arg23: memref<1x32xf32, #tpu.memory_space<vmem>>, %arg24: memref<1x32xf32, #tpu.memory_space<vmem>>, %arg25: memref<1x8x32xbf16, #tpu.memory_space<vmem>>, %arg26: memref<8x96xbf16, #tpu.memory_space<vmem>>, %arg27: memref<8x64xbf16, #tpu.memory_space<vmem>>, %arg28: memref<8x32xbf16, #tpu.memory_space<vmem>>) attributes {dimension_semantics = [#tpu.dimension_semantics<parallel>], iteration_bounds = array<i64: 2>, scalar_prefetch = 0 : i64, scratch_operands = 3 : i64, tpu.core_type = #tpu.core_type<tc>, window_params = [{transform_indices = @transform_0, window_bounds = array<i64: 1, 8, 32>}, {transform_indices = @transform_1, window_bounds = array<i64: 1, 8, 32>}, {transform_indices = @transform_2, window_bounds = array<i64: 1, 8, 1>}, {transform_indices = @transform_3, window_bounds = array<i64: 1, 1, 8>}, {pipeline_mode = #tpu.pipeline_mode<synchronous>, transform_indices = @transform_4, window_bounds = array<i64: 32, 96>}, {pipeline_mode = #tpu.pipeline_mode<synchronous>, transform_indices = @transform_5, window_bounds = array<i64: 1, 96>}, {pipeline_mode = #tpu.pipeline_mode<synchronous>, transform_indices = @transform_6, window_bounds = array<i64: 32, 32>}, {pipeline_mode = #tpu.pipeline_mode<synchronous>, transform_indices = @transform_7, window_bounds = array<i64: 1, 32>}, {pipeline_mode = #tpu.pipeline_mode<synchronous>, transform_indices = @transform_8, window_bounds = array<i64: 1, 32>}, {pipeline_mode = #tpu.pipeline_mode<synchronous>, transform_indices = @transform_9, window_bounds = array<i64: 1, 32>}, {pipeline_mode = #tpu.pipeline_mode<synchronous>, transform_indices = @transform_10, window_bounds = array<i64: 32, 32>}, {pipeline_mode = #tpu.pipeline_mode<synchronous>, transform_indices = @transform_11, window_bounds = array<i64: 1, 32>}, {pipeline_mode = #tpu.pipeline_mode<synchronous>, transform_indices = @transform_12, window_bounds = array<i64: 32, 64>}, {pipeline_mode = #tpu.pipeline_mode<synchronous>, transform_indices = @transform_13, window_bounds = array<i64: 1, 64>}, {pipeline_mode = #tpu.pipeline_mode<synchronous>, transform_indices = @transform_14, window_bounds = array<i64: 32, 32>}, {pipeline_mode = #tpu.pipeline_mode<synchronous>, transform_indices = @transform_15, window_bounds = array<i64: 1, 32>}, {pipeline_mode = #tpu.pipeline_mode<synchronous>, transform_indices = @transform_16, window_bounds = array<i64: 1, 32>}, {pipeline_mode = #tpu.pipeline_mode<synchronous>, transform_indices = @transform_17, window_bounds = array<i64: 1, 32>}, {pipeline_mode = #tpu.pipeline_mode<synchronous>, transform_indices = @transform_18, window_bounds = array<i64: 32, 64>}, {pipeline_mode = #tpu.pipeline_mode<synchronous>, transform_indices = @transform_19, window_bounds = array<i64: 1, 64>}, {pipeline_mode = #tpu.pipeline_mode<synchronous>, transform_indices = @transform_20, window_bounds = array<i64: 64, 32>}, {pipeline_mode = #tpu.pipeline_mode<synchronous>, transform_indices = @transform_21, window_bounds = array<i64: 1, 32>}, {pipeline_mode = #tpu.pipeline_mode<synchronous>, transform_indices = @transform_22, window_bounds = array<i64: 1, 32>}, {pipeline_mode = #tpu.pipeline_mode<synchronous>, transform_indices = @transform_23, window_bounds = array<i64: 1, 32>}, {transform_indices = @transform_24, window_bounds = array<i64: 1, 8, 32>}]} {
    %c0 = arith.constant 0 : index
    %c0_0 = arith.constant 0 : index
    %c0_1 = arith.constant 0 : index
    %0 = vector.load %arg1[%c0, %c0_0, %c0_1] : memref<1x8x32xbf16, #tpu.memory_space<vmem>>, vector<1x8x32xbf16>
    %1 = vector.shape_cast %0 : vector<1x8x32xbf16> to vector<8x32xbf16>
    %c0_2 = arith.constant 0 : index
    %c0_3 = arith.constant 0 : index
    %c0_4 = arith.constant 0 : index
    %2 = vector.load %arg2[%c0_2, %c0_3, %c0_4] : memref<1x8x32xbf16, #tpu.memory_space<vmem>>, vector<1x8x32xbf16>
    %3 = vector.shape_cast %2 : vector<1x8x32xbf16> to vector<8x32xbf16>
    %4 = arith.extf %1 : vector<8x32xbf16> to vector<8x32xf32>
    %5 = tpu.iota {dimensions = array<i32: 0>} : vector<8x8xi32>
    %6 = tpu.iota {dimensions = array<i32: 1>} : vector<8x8xi32>
    %7 = arith.cmpi sle, %6, %5 : vector<8x8xi32>
    %c0_5 = arith.constant 0 : index
    %c0_6 = arith.constant 0 : index
    %c0_7 = arith.constant 0 : index
    %8 = vector.load %arg3[%c0_5, %c0_6, %c0_7] : memref<1x8x1xf32, #tpu.memory_space<vmem>>, vector<1x8x1xf32>
    %9 = vector.shape_cast %8 : vector<1x8x1xf32> to vector<8x1xf32>
    %cst = arith.constant 0.000000e+00 : f32
    %10 = vector.broadcast %cst : f32 to vector<8x1xf32>
    %11 = arith.cmpf ogt, %9, %10 : vector<8x1xf32>
    %12 = vector.broadcast %11 : vector<8x1xi1> to vector<8x8xi1>
    %13 = arith.andi %7, %12 : vector<8x8xi1>
    %cst_8 = arith.constant 0.000000e+00 : f32
    %cst_9 = arith.constant -1.000000e+09 : f32
    %14 = vector.broadcast %cst_8 : f32 to vector<8x8xf32>
    %15 = vector.broadcast %cst_9 : f32 to vector<8x8xf32>
    %16 = arith.select %13, %14, %15 : vector<8x8xi1>, vector<8x8xf32>
    %c0_10 = arith.constant 0 : index
    %c0_11 = arith.constant 0 : index
    %17 = vector.load %arg5[%c0_10, %c0_11] : memref<32x96xbf16, #tpu.memory_space<vmem>>, vector<32x96xbf16>
    %cst_12 = arith.constant dense<0.000000e+00> : vector<8x96xf32>
    %18 = tpu.matmul %1, %17, %cst_12 {dimension_numbers = #tpu.dot_dimension_numbers<[1], [0], [0], [1], [0, 0, 1, 1], [], []>} : vector<8x32xbf16>, vector<32x96xbf16>, vector<8x96xf32> -> vector<8x96xf32>
    %c0_13 = arith.constant 0 : index
    %c0_14 = arith.constant 0 : index
    %19 = vector.load %arg6[%c0_13, %c0_14] : memref<1x96xf32, #tpu.memory_space<vmem>>, vector<1x96xf32>
    %20 = vector.broadcast %19 : vector<1x96xf32> to vector<8x96xf32>
    %21 = arith.addf %18, %20 : vector<8x96xf32>
    %22 = arith.truncf %21 : vector<8x96xf32> to vector<8x96xbf16>
    %c0_15 = arith.constant 0 : index
    %c0_16 = arith.constant 0 : index
    %23 = vector.load %arg26[%c0_15, %c0_16] : memref<8x96xbf16, #tpu.memory_space<vmem>>, vector<8x96xbf16>
    tpu.vector_store %arg26[%c0_15, %c0_16], %22 {strides = array<i32>} : memref<8x96xbf16, #tpu.memory_space<vmem>>, vector<8x96xbf16>,
    %c0_17 = arith.constant 0 : index
    %c0_18 = arith.constant 0 : index
    %24 = vector.load %arg26[%c0_17, %c0_18] : memref<8x96xbf16, #tpu.memory_space<vmem>>, vector<8x8xbf16>
    %c0_19 = arith.constant 0 : index
    %c32 = arith.constant 32 : index
    %25 = vector.load %arg26[%c0_19, %c32] : memref<8x96xbf16, #tpu.memory_space<vmem>>, vector<8x8xbf16>
    %c0_20 = arith.constant 0 : index
    %c64 = arith.constant 64 : index
    %26 = vector.load %arg26[%c0_20, %c64] : memref<8x96xbf16, #tpu.memory_space<vmem>>, vector<8x8xbf16>
    %cst_21 = arith.constant dense<0.000000e+00> : vector<8x8xf32>
    %27 = tpu.matmul %24, %25, %cst_21 {dimension_numbers = #tpu.dot_dimension_numbers<[1], [1], [0], [0], [0, 0, 1, 0], [], []>} : vector<8x8xbf16>, vector<8x8xbf16>, vector<8x8xf32> -> vector<8x8xf32>
    %cst_22 = arith.constant 0.353553385 : f32
    %28 = vector.broadcast %cst_22 : f32 to vector<8x8xf32>
    %29 = arith.mulf %27, %28 : vector<8x8xf32>
    %30 = arith.addf %29, %16 : vector<8x8xf32>
    %cst_23 = arith.constant dense<0xFF800000> : vector<8xf32>
    %31 = vector.multi_reduction <maximumf>, %30, %cst_23 [1] : vector<8x8xf32> to vector<8xf32>
    %32 = vector.shape_cast %31 : vector<8xf32> to vector<8x1xf32>
    %33 = vector.broadcast %32 : vector<8x1xf32> to vector<8x8xf32>
    %34 = arith.subf %30, %33 : vector<8x8xf32>
    %35 = math.exp %34 : vector<8x8xf32>
    %cst_24 = arith.constant dense<0.000000e+00> : vector<8xf32>
    %36 = vector.multi_reduction <add>, %35, %cst_24 [1] : vector<8x8xf32> to vector<8xf32>
    %37 = vector.shape_cast %36 : vector<8xf32> to vector<8x1xf32>
    %38 = tpu.reciprocal %37 {approx = true} : vector<8x1xf32> -> vector<8x1xf32>
    %39 = vector.broadcast %38 : vector<8x1xf32> to vector<8x8xf32>
    %40 = arith.mulf %35, %39 : vector<8x8xf32>
    %41 = arith.truncf %40 : vector<8x8xf32> to vector<8x8xbf16>
    %cst_25 = arith.constant dense<0.000000e+00> : vector<8x8xf32>
    %42 = tpu.matmul %41, %26, %cst_25 {dimension_numbers = #tpu.dot_dimension_numbers<[1], [0], [0], [1], [0, 0, 1, 1], [], []>} : vector<8x8xbf16>, vector<8x8xbf16>, vector<8x8xf32> -> vector<8x8xf32>
    %43 = arith.truncf %42 : vector<8x8xf32> to vector<8x8xbf16>
    %c0_26 = arith.constant 0 : index
    %c0_27 = arith.constant 0 : index
    %44 = vector.load %arg28[%c0_26, %c0_27] : memref<8x32xbf16, #tpu.memory_space<vmem>>, vector<8x8xbf16>
    tpu.vector_store %arg28[%c0_26, %c0_27], %43 {strides = array<i32>} : memref<8x32xbf16, #tpu.memory_space<vmem>>, vector<8x8xbf16>,
    %c0_28 = arith.constant 0 : index
    %c8 = arith.constant 8 : index
    %45 = vector.load %arg26[%c0_28, %c8] : memref<8x96xbf16, #tpu.memory_space<vmem>>, vector<8x8xbf16>
    %c0_29 = arith.constant 0 : index
    %c40 = arith.constant 40 : index
    %46 = vector.load %arg26[%c0_29, %c40] : memref<8x96xbf16, #tpu.memory_space<vmem>>, vector<8x8xbf16>
    %c0_30 = arith.constant 0 : index
    %c72 = arith.constant 72 : index
    %47 = vector.load %arg26[%c0_30, %c72] : memref<8x96xbf16, #tpu.memory_space<vmem>>, vector<8x8xbf16>
    %cst_31 = arith.constant dense<0.000000e+00> : vector<8x8xf32>
    %48 = tpu.matmul %45, %46, %cst_31 {dimension_numbers = #tpu.dot_dimension_numbers<[1], [1], [0], [0], [0, 0, 1, 0], [], []>} : vector<8x8xbf16>, vector<8x8xbf16>, vector<8x8xf32> -> vector<8x8xf32>
    %cst_32 = arith.constant 0.353553385 : f32
    %49 = vector.broadcast %cst_32 : f32 to vector<8x8xf32>
    %50 = arith.mulf %48, %49 : vector<8x8xf32>
    %51 = arith.addf %50, %16 : vector<8x8xf32>
    %cst_33 = arith.constant dense<0xFF800000> : vector<8xf32>
    %52 = vector.multi_reduction <maximumf>, %51, %cst_33 [1] : vector<8x8xf32> to vector<8xf32>
    %53 = vector.shape_cast %52 : vector<8xf32> to vector<8x1xf32>
    %54 = vector.broadcast %53 : vector<8x1xf32> to vector<8x8xf32>
    %55 = arith.subf %51, %54 : vector<8x8xf32>
    %56 = math.exp %55 : vector<8x8xf32>
    %cst_34 = arith.constant dense<0.000000e+00> : vector<8xf32>
    %57 = vector.multi_reduction <add>, %56, %cst_34 [1] : vector<8x8xf32> to vector<8xf32>
    %58 = vector.shape_cast %57 : vector<8xf32> to vector<8x1xf32>
    %59 = tpu.reciprocal %58 {approx = true} : vector<8x1xf32> -> vector<8x1xf32>
    %60 = vector.broadcast %59 : vector<8x1xf32> to vector<8x8xf32>
    %61 = arith.mulf %56, %60 : vector<8x8xf32>
    %62 = arith.truncf %61 : vector<8x8xf32> to vector<8x8xbf16>
    %cst_35 = arith.constant dense<0.000000e+00> : vector<8x8xf32>
    %63 = tpu.matmul %62, %47, %cst_35 {dimension_numbers = #tpu.dot_dimension_numbers<[1], [0], [0], [1], [0, 0, 1, 1], [], []>} : vector<8x8xbf16>, vector<8x8xbf16>, vector<8x8xf32> -> vector<8x8xf32>
    %64 = arith.truncf %63 : vector<8x8xf32> to vector<8x8xbf16>
    %c0_36 = arith.constant 0 : index
    %c8_37 = arith.constant 8 : index
    %65 = vector.load %arg28[%c0_36, %c8_37] : memref<8x32xbf16, #tpu.memory_space<vmem>>, vector<8x8xbf16>
    tpu.vector_store %arg28[%c0_36, %c8_37], %64 {strides = array<i32>} : memref<8x32xbf16, #tpu.memory_space<vmem>>, vector<8x8xbf16>,
    %c0_38 = arith.constant 0 : index
    %c16 = arith.constant 16 : index
    %66 = vector.load %arg26[%c0_38, %c16] : memref<8x96xbf16, #tpu.memory_space<vmem>>, vector<8x8xbf16>
    %c0_39 = arith.constant 0 : index
    %c48 = arith.constant 48 : index
    %67 = vector.load %arg26[%c0_39, %c48] : memref<8x96xbf16, #tpu.memory_space<vmem>>, vector<8x8xbf16>
    %c0_40 = arith.constant 0 : index
    %c80 = arith.constant 80 : index
    %68 = vector.load %arg26[%c0_40, %c80] : memref<8x96xbf16, #tpu.memory_space<vmem>>, vector<8x8xbf16>
    %cst_41 = arith.constant dense<0.000000e+00> : vector<8x8xf32>
    %69 = tpu.matmul %66, %67, %cst_41 {dimension_numbers = #tpu.dot_dimension_numbers<[1], [1], [0], [0], [0, 0, 1, 0], [], []>} : vector<8x8xbf16>, vector<8x8xbf16>, vector<8x8xf32> -> vector<8x8xf32>
    %cst_42 = arith.constant 0.353553385 : f32
    %70 = vector.broadcast %cst_42 : f32 to vector<8x8xf32>
    %71 = arith.mulf %69, %70 : vector<8x8xf32>
    %72 = arith.addf %71, %16 : vector<8x8xf32>
    %cst_43 = arith.constant dense<0xFF800000> : vector<8xf32>
    %73 = vector.multi_reduction <maximumf>, %72, %cst_43 [1] : vector<8x8xf32> to vector<8xf32>
    %74 = vector.shape_cast %73 : vector<8xf32> to vector<8x1xf32>
    %75 = vector.broadcast %74 : vector<8x1xf32> to vector<8x8xf32>
    %76 = arith.subf %72, %75 : vector<8x8xf32>
    %77 = math.exp %76 : vector<8x8xf32>
    %cst_44 = arith.constant dense<0.000000e+00> : vector<8xf32>
    %78 = vector.multi_reduction <add>, %77, %cst_44 [1] : vector<8x8xf32> to vector<8xf32>
    %79 = vector.shape_cast %78 : vector<8xf32> to vector<8x1xf32>
    %80 = tpu.reciprocal %79 {approx = true} : vector<8x1xf32> -> vector<8x1xf32>
    %81 = vector.broadcast %80 : vector<8x1xf32> to vector<8x8xf32>
    %82 = arith.mulf %77, %81 : vector<8x8xf32>
    %83 = arith.truncf %82 : vector<8x8xf32> to vector<8x8xbf16>
    %cst_45 = arith.constant dense<0.000000e+00> : vector<8x8xf32>
    %84 = tpu.matmul %83, %68, %cst_45 {dimension_numbers = #tpu.dot_dimension_numbers<[1], [0], [0], [1], [0, 0, 1, 1], [], []>} : vector<8x8xbf16>, vector<8x8xbf16>, vector<8x8xf32> -> vector<8x8xf32>
    %85 = arith.truncf %84 : vector<8x8xf32> to vector<8x8xbf16>
    %c0_46 = arith.constant 0 : index
    %c16_47 = arith.constant 16 : index
    %86 = vector.load %arg28[%c0_46, %c16_47] : memref<8x32xbf16, #tpu.memory_space<vmem>>, vector<8x8xbf16>
    tpu.vector_store %arg28[%c0_46, %c16_47], %85 {strides = array<i32>} : memref<8x32xbf16, #tpu.memory_space<vmem>>, vector<8x8xbf16>,
    %c0_48 = arith.constant 0 : index
    %c24 = arith.constant 24 : index
    %87 = vector.load %arg26[%c0_48, %c24] : memref<8x96xbf16, #tpu.memory_space<vmem>>, vector<8x8xbf16>
    %c0_49 = arith.constant 0 : index
    %c56 = arith.constant 56 : index
    %88 = vector.load %arg26[%c0_49, %c56] : memref<8x96xbf16, #tpu.memory_space<vmem>>, vector<8x8xbf16>
    %c0_50 = arith.constant 0 : index
    %c88 = arith.constant 88 : index
    %89 = vector.load %arg26[%c0_50, %c88] : memref<8x96xbf16, #tpu.memory_space<vmem>>, vector<8x8xbf16>
    %cst_51 = arith.constant dense<0.000000e+00> : vector<8x8xf32>
    %90 = tpu.matmul %87, %88, %cst_51 {dimension_numbers = #tpu.dot_dimension_numbers<[1], [1], [0], [0], [0, 0, 1, 0], [], []>} : vector<8x8xbf16>, vector<8x8xbf16>, vector<8x8xf32> -> vector<8x8xf32>
    %cst_52 = arith.constant 0.353553385 : f32
    %91 = vector.broadcast %cst_52 : f32 to vector<8x8xf32>
    %92 = arith.mulf %90, %91 : vector<8x8xf32>
    %93 = arith.addf %92, %16 : vector<8x8xf32>
    %cst_53 = arith.constant dense<0xFF800000> : vector<8xf32>
    %94 = vector.multi_reduction <maximumf>, %93, %cst_53 [1] : vector<8x8xf32> to vector<8xf32>
    %95 = vector.shape_cast %94 : vector<8xf32> to vector<8x1xf32>
    %96 = vector.broadcast %95 : vector<8x1xf32> to vector<8x8xf32>
    %97 = arith.subf %93, %96 : vector<8x8xf32>
    %98 = math.exp %97 : vector<8x8xf32>
    %cst_54 = arith.constant dense<0.000000e+00> : vector<8xf32>
    %99 = vector.multi_reduction <add>, %98, %cst_54 [1] : vector<8x8xf32> to vector<8xf32>
    %100 = vector.shape_cast %99 : vector<8xf32> to vector<8x1xf32>
    %101 = tpu.reciprocal %100 {approx = true} : vector<8x1xf32> -> vector<8x1xf32>
    %102 = vector.broadcast %101 : vector<8x1xf32> to vector<8x8xf32>
    %103 = arith.mulf %98, %102 : vector<8x8xf32>
    %104 = arith.truncf %103 : vector<8x8xf32> to vector<8x8xbf16>
    %cst_55 = arith.constant dense<0.000000e+00> : vector<8x8xf32>
    %105 = tpu.matmul %104, %89, %cst_55 {dimension_numbers = #tpu.dot_dimension_numbers<[1], [0], [0], [1], [0, 0, 1, 1], [], []>} : vector<8x8xbf16>, vector<8x8xbf16>, vector<8x8xf32> -> vector<8x8xf32>
    %106 = arith.truncf %105 : vector<8x8xf32> to vector<8x8xbf16>
    %c0_56 = arith.constant 0 : index
    %c24_57 = arith.constant 24 : index
    %107 = vector.load %arg28[%c0_56, %c24_57] : memref<8x32xbf16, #tpu.memory_space<vmem>>, vector<8x8xbf16>
    tpu.vector_store %arg28[%c0_56, %c24_57], %106 {strides = array<i32>} : memref<8x32xbf16, #tpu.memory_space<vmem>>, vector<8x8xbf16>,
    %c0_58 = arith.constant 0 : index
    %c0_59 = arith.constant 0 : index
    %108 = vector.load %arg28[%c0_58, %c0_59] : memref<8x32xbf16, #tpu.memory_space<vmem>>, vector<8x32xbf16>
    %c0_60 = arith.constant 0 : index
    %c0_61 = arith.constant 0 : index
    %109 = vector.load %arg7[%c0_60, %c0_61] : memref<32x32xbf16, #tpu.memory_space<vmem>>, vector<32x32xbf16>
    %cst_62 = arith.constant dense<0.000000e+00> : vector<8x32xf32>
    %110 = tpu.matmul %108, %109, %cst_62 {dimension_numbers = #tpu.dot_dimension_numbers<[1], [0], [0], [1], [0, 0, 1, 1], [], []>} : vector<8x32xbf16>, vector<32x32xbf16>, vector<8x32xf32> -> vector<8x32xf32>
    %c0_63 = arith.constant 0 : index
    %c0_64 = arith.constant 0 : index
    %111 = vector.load %arg8[%c0_63, %c0_64] : memref<1x32xf32, #tpu.memory_space<vmem>>, vector<1x32xf32>
    %112 = vector.broadcast %111 : vector<1x32xf32> to vector<8x32xf32>
    %113 = arith.addf %110, %112 : vector<8x32xf32>
    %114 = arith.addf %4, %113 : vector<8x32xf32>
    %c0_65 = arith.constant 0 : index
    %c0_66 = arith.constant 0 : index
    %115 = vector.load %arg9[%c0_65, %c0_66] : memref<1x32xf32, #tpu.memory_space<vmem>>, vector<1x32xf32>
    %c0_67 = arith.constant 0 : index
    %c0_68 = arith.constant 0 : index
    %116 = vector.load %arg10[%c0_67, %c0_68] : memref<1x32xf32, #tpu.memory_space<vmem>>, vector<1x32xf32>
    %cst_69 = arith.constant dense<0.000000e+00> : vector<8xf32>
    %117 = vector.multi_reduction <add>, %114, %cst_69 [1] : vector<8x32xf32> to vector<8xf32>
    %118 = vector.shape_cast %117 : vector<8xf32> to vector<8x1xf32>
    %cst_70 = arith.constant 3.200000e+01 : f32
    %119 = vector.broadcast %cst_70 : f32 to vector<8x1xf32>
    %120 = arith.divf %118, %119 : vector<8x1xf32>
    %121 = vector.broadcast %120 : vector<8x1xf32> to vector<8x32xf32>
    %122 = arith.subf %114, %121 : vector<8x32xf32>
    %123 = arith.mulf %122, %122 : vector<8x32xf32>
    %cst_71 = arith.constant dense<0.000000e+00> : vector<8xf32>
    %124 = vector.multi_reduction <add>, %123, %cst_71 [1] : vector<8x32xf32> to vector<8xf32>
    %125 = vector.shape_cast %124 : vector<8xf32> to vector<8x1xf32>
    %cst_72 = arith.constant 3.200000e+01 : f32
    %126 = vector.broadcast %cst_72 : f32 to vector<8x1xf32>
    %127 = arith.divf %125, %126 : vector<8x1xf32>
    %128 = vector.broadcast %120 : vector<8x1xf32> to vector<8x32xf32>
    %129 = arith.subf %114, %128 : vector<8x32xf32>
    %cst_73 = arith.constant 9.99999974E-6 : f32
    %130 = vector.broadcast %cst_73 : f32 to vector<8x1xf32>
    %131 = arith.addf %127, %130 : vector<8x1xf32>
    %132 = math.rsqrt %131 : vector<8x1xf32>
    %133 = vector.broadcast %132 : vector<8x1xf32> to vector<8x32xf32>
    %134 = arith.mulf %129, %133 : vector<8x32xf32>
    %135 = vector.broadcast %115 : vector<1x32xf32> to vector<8x32xf32>
    %136 = arith.mulf %134, %135 : vector<8x32xf32>
    %137 = vector.broadcast %116 : vector<1x32xf32> to vector<8x32xf32>
    %138 = arith.addf %136, %137 : vector<8x32xf32>
    %c0_74 = arith.constant 0 : index
    %c0_75 = arith.constant 0 : index
    %c0_76 = arith.constant 0 : index
    %139 = vector.load %arg4[%c0_74, %c0_75, %c0_76] : memref<1x1x8xf32, #tpu.memory_space<vmem>>, vector<1x1x8xf32>
    %140 = vector.shape_cast %139 : vector<1x1x8xf32> to vector<1x8xf32>
    %cst_77 = arith.constant 0.000000e+00 : f32
    %141 = vector.broadcast %cst_77 : f32 to vector<1x8xf32>
    %142 = arith.cmpf ogt, %140, %141 : vector<1x8xf32>
    %cst_78 = arith.constant 0.000000e+00 : f32
    %cst_79 = arith.constant -1.000000e+09 : f32
    %143 = vector.broadcast %cst_78 : f32 to vector<1x8xf32>
    %144 = vector.broadcast %cst_79 : f32 to vector<1x8xf32>
    %145 = arith.select %142, %143, %144 : vector<1x8xi1>, vector<1x8xf32>
    %146 = arith.truncf %138 : vector<8x32xf32> to vector<8x32xbf16>
    %c0_80 = arith.constant 0 : index
    %c0_81 = arith.constant 0 : index
    %147 = vector.load %arg11[%c0_80, %c0_81] : memref<32x32xbf16, #tpu.memory_space<vmem>>, vector<32x32xbf16>
    %cst_82 = arith.constant dense<0.000000e+00> : vector<8x32xf32>
    %148 = tpu.matmul %146, %147, %cst_82 {dimension_numbers = #tpu.dot_dimension_numbers<[1], [0], [0], [1], [0, 0, 1, 1], [], []>} : vector<8x32xbf16>, vector<32x32xbf16>, vector<8x32xf32> -> vector<8x32xf32>
    %c0_83 = arith.constant 0 : index
    %c0_84 = arith.constant 0 : index
    %149 = vector.load %arg12[%c0_83, %c0_84] : memref<1x32xf32, #tpu.memory_space<vmem>>, vector<1x32xf32>
    %150 = vector.broadcast %149 : vector<1x32xf32> to vector<8x32xf32>
    %151 = arith.addf %148, %150 : vector<8x32xf32>
    %152 = arith.truncf %151 : vector<8x32xf32> to vector<8x32xbf16>
    %c0_85 = arith.constant 0 : index
    %c0_86 = arith.constant 0 : index
    %153 = vector.load %arg26[%c0_85, %c0_86] : memref<8x96xbf16, #tpu.memory_space<vmem>>, vector<8x32xbf16>
    tpu.vector_store %arg26[%c0_85, %c0_86], %152 {strides = array<i32>} : memref<8x96xbf16, #tpu.memory_space<vmem>>, vector<8x32xbf16>,
    %c0_87 = arith.constant 0 : index
    %c0_88 = arith.constant 0 : index
    %154 = vector.load %arg13[%c0_87, %c0_88] : memref<32x64xbf16, #tpu.memory_space<vmem>>, vector<32x64xbf16>
    %cst_89 = arith.constant dense<0.000000e+00> : vector<8x64xf32>
    %155 = tpu.matmul %3, %154, %cst_89 {dimension_numbers = #tpu.dot_dimension_numbers<[1], [0], [0], [1], [0, 0, 1, 1], [], []>} : vector<8x32xbf16>, vector<32x64xbf16>, vector<8x64xf32> -> vector<8x64xf32>
    %c0_90 = arith.constant 0 : index
    %c0_91 = arith.constant 0 : index
    %156 = vector.load %arg14[%c0_90, %c0_91] : memref<1x64xf32, #tpu.memory_space<vmem>>, vector<1x64xf32>
    %157 = vector.broadcast %156 : vector<1x64xf32> to vector<8x64xf32>
    %158 = arith.addf %155, %157 : vector<8x64xf32>
    %159 = arith.truncf %158 : vector<8x64xf32> to vector<8x64xbf16>
    %c0_92 = arith.constant 0 : index
    %c0_93 = arith.constant 0 : index
    %160 = vector.load %arg27[%c0_92, %c0_93] : memref<8x64xbf16, #tpu.memory_space<vmem>>, vector<8x64xbf16>
    tpu.vector_store %arg27[%c0_92, %c0_93], %159 {strides = array<i32>} : memref<8x64xbf16, #tpu.memory_space<vmem>>, vector<8x64xbf16>,
    %c0_94 = arith.constant 0 : index
    %c0_95 = arith.constant 0 : index
    %161 = vector.load %arg26[%c0_94, %c0_95] : memref<8x96xbf16, #tpu.memory_space<vmem>>, vector<8x8xbf16>
    %c0_96 = arith.constant 0 : index
    %c0_97 = arith.constant 0 : index
    %162 = vector.load %arg27[%c0_96, %c0_97] : memref<8x64xbf16, #tpu.memory_space<vmem>>, vector<8x8xbf16>
    %c0_98 = arith.constant 0 : index
    %c32_99 = arith.constant 32 : index
    %163 = vector.load %arg27[%c0_98, %c32_99] : memref<8x64xbf16, #tpu.memory_space<vmem>>, vector<8x8xbf16>
    %cst_100 = arith.constant dense<0.000000e+00> : vector<8x8xf32>
    %164 = tpu.matmul %161, %162, %cst_100 {dimension_numbers = #tpu.dot_dimension_numbers<[1], [1], [0], [0], [0, 0, 1, 0], [], []>} : vector<8x8xbf16>, vector<8x8xbf16>, vector<8x8xf32> -> vector<8x8xf32>
    %cst_101 = arith.constant 0.353553385 : f32
    %165 = vector.broadcast %cst_101 : f32 to vector<8x8xf32>
    %166 = arith.mulf %164, %165 : vector<8x8xf32>
    %167 = vector.broadcast %145 : vector<1x8xf32> to vector<8x8xf32>
    %168 = arith.addf %166, %167 : vector<8x8xf32>
    %cst_102 = arith.constant dense<0xFF800000> : vector<8xf32>
    %169 = vector.multi_reduction <maximumf>, %168, %cst_102 [1] : vector<8x8xf32> to vector<8xf32>
    %170 = vector.shape_cast %169 : vector<8xf32> to vector<8x1xf32>
    %171 = vector.broadcast %170 : vector<8x1xf32> to vector<8x8xf32>
    %172 = arith.subf %168, %171 : vector<8x8xf32>
    %173 = math.exp %172 : vector<8x8xf32>
    %cst_103 = arith.constant dense<0.000000e+00> : vector<8xf32>
    %174 = vector.multi_reduction <add>, %173, %cst_103 [1] : vector<8x8xf32> to vector<8xf32>
    %175 = vector.shape_cast %174 : vector<8xf32> to vector<8x1xf32>
    %176 = tpu.reciprocal %175 {approx = true} : vector<8x1xf32> -> vector<8x1xf32>
    %177 = vector.broadcast %176 : vector<8x1xf32> to vector<8x8xf32>
    %178 = arith.mulf %173, %177 : vector<8x8xf32>
    %179 = arith.truncf %178 : vector<8x8xf32> to vector<8x8xbf16>
    %cst_104 = arith.constant dense<0.000000e+00> : vector<8x8xf32>
    %180 = tpu.matmul %179, %163, %cst_104 {dimension_numbers = #tpu.dot_dimension_numbers<[1], [0], [0], [1], [0, 0, 1, 1], [], []>} : vector<8x8xbf16>, vector<8x8xbf16>, vector<8x8xf32> -> vector<8x8xf32>
    %181 = arith.truncf %180 : vector<8x8xf32> to vector<8x8xbf16>
    %c0_105 = arith.constant 0 : index
    %c0_106 = arith.constant 0 : index
    %182 = vector.load %arg28[%c0_105, %c0_106] : memref<8x32xbf16, #tpu.memory_space<vmem>>, vector<8x8xbf16>
    tpu.vector_store %arg28[%c0_105, %c0_106], %181 {strides = array<i32>} : memref<8x32xbf16, #tpu.memory_space<vmem>>, vector<8x8xbf16>,
    %c0_107 = arith.constant 0 : index
    %c8_108 = arith.constant 8 : index
    %183 = vector.load %arg26[%c0_107, %c8_108] : memref<8x96xbf16, #tpu.memory_space<vmem>>, vector<8x8xbf16>
    %c0_109 = arith.constant 0 : index
    %c8_110 = arith.constant 8 : index
    %184 = vector.load %arg27[%c0_109, %c8_110] : memref<8x64xbf16, #tpu.memory_space<vmem>>, vector<8x8xbf16>
    %c0_111 = arith.constant 0 : index
    %c40_112 = arith.constant 40 : index
    %185 = vector.load %arg27[%c0_111, %c40_112] : memref<8x64xbf16, #tpu.memory_space<vmem>>, vector<8x8xbf16>
    %cst_113 = arith.constant dense<0.000000e+00> : vector<8x8xf32>
    %186 = tpu.matmul %183, %184, %cst_113 {dimension_numbers = #tpu.dot_dimension_numbers<[1], [1], [0], [0], [0, 0, 1, 0], [], []>} : vector<8x8xbf16>, vector<8x8xbf16>, vector<8x8xf32> -> vector<8x8xf32>
    %cst_114 = arith.constant 0.353553385 : f32
    %187 = vector.broadcast %cst_114 : f32 to vector<8x8xf32>
    %188 = arith.mulf %186, %187 : vector<8x8xf32>
    %189 = vector.broadcast %145 : vector<1x8xf32> to vector<8x8xf32>
    %190 = arith.addf %188, %189 : vector<8x8xf32>
    %cst_115 = arith.constant dense<0xFF800000> : vector<8xf32>
    %191 = vector.multi_reduction <maximumf>, %190, %cst_115 [1] : vector<8x8xf32> to vector<8xf32>
    %192 = vector.shape_cast %191 : vector<8xf32> to vector<8x1xf32>
    %193 = vector.broadcast %192 : vector<8x1xf32> to vector<8x8xf32>
    %194 = arith.subf %190, %193 : vector<8x8xf32>
    %195 = math.exp %194 : vector<8x8xf32>
    %cst_116 = arith.constant dense<0.000000e+00> : vector<8xf32>
    %196 = vector.multi_reduction <add>, %195, %cst_116 [1] : vector<8x8xf32> to vector<8xf32>
    %197 = vector.shape_cast %196 : vector<8xf32> to vector<8x1xf32>
    %198 = tpu.reciprocal %197 {approx = true} : vector<8x1xf32> -> vector<8x1xf32>
    %199 = vector.broadcast %198 : vector<8x1xf32> to vector<8x8xf32>
    %200 = arith.mulf %195, %199 : vector<8x8xf32>
    %201 = arith.truncf %200 : vector<8x8xf32> to vector<8x8xbf16>
    %cst_117 = arith.constant dense<0.000000e+00> : vector<8x8xf32>
    %202 = tpu.matmul %201, %185, %cst_117 {dimension_numbers = #tpu.dot_dimension_numbers<[1], [0], [0], [1], [0, 0, 1, 1], [], []>} : vector<8x8xbf16>, vector<8x8xbf16>, vector<8x8xf32> -> vector<8x8xf32>
    %203 = arith.truncf %202 : vector<8x8xf32> to vector<8x8xbf16>
    %c0_118 = arith.constant 0 : index
    %c8_119 = arith.constant 8 : index
    %204 = vector.load %arg28[%c0_118, %c8_119] : memref<8x32xbf16, #tpu.memory_space<vmem>>, vector<8x8xbf16>
    tpu.vector_store %arg28[%c0_118, %c8_119], %203 {strides = array<i32>} : memref<8x32xbf16, #tpu.memory_space<vmem>>, vector<8x8xbf16>,
    %c0_120 = arith.constant 0 : index
    %c16_121 = arith.constant 16 : index
    %205 = vector.load %arg26[%c0_120, %c16_121] : memref<8x96xbf16, #tpu.memory_space<vmem>>, vector<8x8xbf16>
    %c0_122 = arith.constant 0 : index
    %c16_123 = arith.constant 16 : index
    %206 = vector.load %arg27[%c0_122, %c16_123] : memref<8x64xbf16, #tpu.memory_space<vmem>>, vector<8x8xbf16>
    %c0_124 = arith.constant 0 : index
    %c48_125 = arith.constant 48 : index
    %207 = vector.load %arg27[%c0_124, %c48_125] : memref<8x64xbf16, #tpu.memory_space<vmem>>, vector<8x8xbf16>
    %cst_126 = arith.constant dense<0.000000e+00> : vector<8x8xf32>
    %208 = tpu.matmul %205, %206, %cst_126 {dimension_numbers = #tpu.dot_dimension_numbers<[1], [1], [0], [0], [0, 0, 1, 0], [], []>} : vector<8x8xbf16>, vector<8x8xbf16>, vector<8x8xf32> -> vector<8x8xf32>
    %cst_127 = arith.constant 0.353553385 : f32
    %209 = vector.broadcast %cst_127 : f32 to vector<8x8xf32>
    %210 = arith.mulf %208, %209 : vector<8x8xf32>
    %211 = vector.broadcast %145 : vector<1x8xf32> to vector<8x8xf32>
    %212 = arith.addf %210, %211 : vector<8x8xf32>
    %cst_128 = arith.constant dense<0xFF800000> : vector<8xf32>
    %213 = vector.multi_reduction <maximumf>, %212, %cst_128 [1] : vector<8x8xf32> to vector<8xf32>
    %214 = vector.shape_cast %213 : vector<8xf32> to vector<8x1xf32>
    %215 = vector.broadcast %214 : vector<8x1xf32> to vector<8x8xf32>
    %216 = arith.subf %212, %215 : vector<8x8xf32>
    %217 = math.exp %216 : vector<8x8xf32>
    %cst_129 = arith.constant dense<0.000000e+00> : vector<8xf32>
    %218 = vector.multi_reduction <add>, %217, %cst_129 [1] : vector<8x8xf32> to vector<8xf32>
    %219 = vector.shape_cast %218 : vector<8xf32> to vector<8x1xf32>
    %220 = tpu.reciprocal %219 {approx = true} : vector<8x1xf32> -> vector<8x1xf32>
    %221 = vector.broadcast %220 : vector<8x1xf32> to vector<8x8xf32>
    %222 = arith.mulf %217, %221 : vector<8x8xf32>
    %223 = arith.truncf %222 : vector<8x8xf32> to vector<8x8xbf16>
    %cst_130 = arith.constant dense<0.000000e+00> : vector<8x8xf32>
    %224 = tpu.matmul %223, %207, %cst_130 {dimension_numbers = #tpu.dot_dimension_numbers<[1], [0], [0], [1], [0, 0, 1, 1], [], []>} : vector<8x8xbf16>, vector<8x8xbf16>, vector<8x8xf32> -> vector<8x8xf32>
    %225 = arith.truncf %224 : vector<8x8xf32> to vector<8x8xbf16>
    %c0_131 = arith.constant 0 : index
    %c16_132 = arith.constant 16 : index
    %226 = vector.load %arg28[%c0_131, %c16_132] : memref<8x32xbf16, #tpu.memory_space<vmem>>, vector<8x8xbf16>
    tpu.vector_store %arg28[%c0_131, %c16_132], %225 {strides = array<i32>} : memref<8x32xbf16, #tpu.memory_space<vmem>>, vector<8x8xbf16>,
    %c0_133 = arith.constant 0 : index
    %c24_134 = arith.constant 24 : index
    %227 = vector.load %arg26[%c0_133, %c24_134] : memref<8x96xbf16, #tpu.memory_space<vmem>>, vector<8x8xbf16>
    %c0_135 = arith.constant 0 : index
    %c24_136 = arith.constant 24 : index
    %228 = vector.load %arg27[%c0_135, %c24_136] : memref<8x64xbf16, #tpu.memory_space<vmem>>, vector<8x8xbf16>
    %c0_137 = arith.constant 0 : index
    %c56_138 = arith.constant 56 : index
    %229 = vector.load %arg27[%c0_137, %c56_138] : memref<8x64xbf16, #tpu.memory_space<vmem>>, vector<8x8xbf16>
    %cst_139 = arith.constant dense<0.000000e+00> : vector<8x8xf32>
    %230 = tpu.matmul %227, %228, %cst_139 {dimension_numbers = #tpu.dot_dimension_numbers<[1], [1], [0], [0], [0, 0, 1, 0], [], []>} : vector<8x8xbf16>, vector<8x8xbf16>, vector<8x8xf32> -> vector<8x8xf32>
    %cst_140 = arith.constant 0.353553385 : f32
    %231 = vector.broadcast %cst_140 : f32 to vector<8x8xf32>
    %232 = arith.mulf %230, %231 : vector<8x8xf32>
    %233 = vector.broadcast %145 : vector<1x8xf32> to vector<8x8xf32>
    %234 = arith.addf %232, %233 : vector<8x8xf32>
    %cst_141 = arith.constant dense<0xFF800000> : vector<8xf32>
    %235 = vector.multi_reduction <maximumf>, %234, %cst_141 [1] : vector<8x8xf32> to vector<8xf32>
    %236 = vector.shape_cast %235 : vector<8xf32> to vector<8x1xf32>
    %237 = vector.broadcast %236 : vector<8x1xf32> to vector<8x8xf32>
    %238 = arith.subf %234, %237 : vector<8x8xf32>
    %239 = math.exp %238 : vector<8x8xf32>
    %cst_142 = arith.constant dense<0.000000e+00> : vector<8xf32>
    %240 = vector.multi_reduction <add>, %239, %cst_142 [1] : vector<8x8xf32> to vector<8xf32>
    %241 = vector.shape_cast %240 : vector<8xf32> to vector<8x1xf32>
    %242 = tpu.reciprocal %241 {approx = true} : vector<8x1xf32> -> vector<8x1xf32>
    %243 = vector.broadcast %242 : vector<8x1xf32> to vector<8x8xf32>
    %244 = arith.mulf %239, %243 : vector<8x8xf32>
    %245 = arith.truncf %244 : vector<8x8xf32> to vector<8x8xbf16>
    %cst_143 = arith.constant dense<0.000000e+00> : vector<8x8xf32>
    %246 = tpu.matmul %245, %229, %cst_143 {dimension_numbers = #tpu.dot_dimension_numbers<[1], [0], [0], [1], [0, 0, 1, 1], [], []>} : vector<8x8xbf16>, vector<8x8xbf16>, vector<8x8xf32> -> vector<8x8xf32>
    %247 = arith.truncf %246 : vector<8x8xf32> to vector<8x8xbf16>
    %c0_144 = arith.constant 0 : index
    %c24_145 = arith.constant 24 : index
    %248 = vector.load %arg28[%c0_144, %c24_145] : memref<8x32xbf16, #tpu.memory_space<vmem>>, vector<8x8xbf16>
    tpu.vector_store %arg28[%c0_144, %c24_145], %247 {strides = array<i32>} : memref<8x32xbf16, #tpu.memory_space<vmem>>, vector<8x8xbf16>,
    %c0_146 = arith.constant 0 : index
    %c0_147 = arith.constant 0 : index
    %249 = vector.load %arg28[%c0_146, %c0_147] : memref<8x32xbf16, #tpu.memory_space<vmem>>, vector<8x32xbf16>
    %c0_148 = arith.constant 0 : index
    %c0_149 = arith.constant 0 : index
    %250 = vector.load %arg15[%c0_148, %c0_149] : memref<32x32xbf16, #tpu.memory_space<vmem>>, vector<32x32xbf16>
    %cst_150 = arith.constant dense<0.000000e+00> : vector<8x32xf32>
    %251 = tpu.matmul %249, %250, %cst_150 {dimension_numbers = #tpu.dot_dimension_numbers<[1], [0], [0], [1], [0, 0, 1, 1], [], []>} : vector<8x32xbf16>, vector<32x32xbf16>, vector<8x32xf32> -> vector<8x32xf32>
    %c0_151 = arith.constant 0 : index
    %c0_152 = arith.constant 0 : index
    %252 = vector.load %arg16[%c0_151, %c0_152] : memref<1x32xf32, #tpu.memory_space<vmem>>, vector<1x32xf32>
    %253 = vector.broadcast %252 : vector<1x32xf32> to vector<8x32xf32>
    %254 = arith.addf %251, %253 : vector<8x32xf32>
    %255 = arith.addf %138, %254 : vector<8x32xf32>
    %c0_153 = arith.constant 0 : index
    %c0_154 = arith.constant 0 : index
    %256 = vector.load %arg17[%c0_153, %c0_154] : memref<1x32xf32, #tpu.memory_space<vmem>>, vector<1x32xf32>
    %c0_155 = arith.constant 0 : index
    %c0_156 = arith.constant 0 : index
    %257 = vector.load %arg18[%c0_155, %c0_156] : memref<1x32xf32, #tpu.memory_space<vmem>>, vector<1x32xf32>
    %cst_157 = arith.constant dense<0.000000e+00> : vector<8xf32>
    %258 = vector.multi_reduction <add>, %255, %cst_157 [1] : vector<8x32xf32> to vector<8xf32>
    %259 = vector.shape_cast %258 : vector<8xf32> to vector<8x1xf32>
    %cst_158 = arith.constant 3.200000e+01 : f32
    %260 = vector.broadcast %cst_158 : f32 to vector<8x1xf32>
    %261 = arith.divf %259, %260 : vector<8x1xf32>
    %262 = vector.broadcast %261 : vector<8x1xf32> to vector<8x32xf32>
    %263 = arith.subf %255, %262 : vector<8x32xf32>
    %264 = arith.mulf %263, %263 : vector<8x32xf32>
    %cst_159 = arith.constant dense<0.000000e+00> : vector<8xf32>
    %265 = vector.multi_reduction <add>, %264, %cst_159 [1] : vector<8x32xf32> to vector<8xf32>
    %266 = vector.shape_cast %265 : vector<8xf32> to vector<8x1xf32>
    %cst_160 = arith.constant 3.200000e+01 : f32
    %267 = vector.broadcast %cst_160 : f32 to vector<8x1xf32>
    %268 = arith.divf %266, %267 : vector<8x1xf32>
    %269 = vector.broadcast %261 : vector<8x1xf32> to vector<8x32xf32>
    %270 = arith.subf %255, %269 : vector<8x32xf32>
    %cst_161 = arith.constant 9.99999974E-6 : f32
    %271 = vector.broadcast %cst_161 : f32 to vector<8x1xf32>
    %272 = arith.addf %268, %271 : vector<8x1xf32>
    %273 = math.rsqrt %272 : vector<8x1xf32>
    %274 = vector.broadcast %273 : vector<8x1xf32> to vector<8x32xf32>
    %275 = arith.mulf %270, %274 : vector<8x32xf32>
    %276 = vector.broadcast %256 : vector<1x32xf32> to vector<8x32xf32>
    %277 = arith.mulf %275, %276 : vector<8x32xf32>
    %278 = vector.broadcast %257 : vector<1x32xf32> to vector<8x32xf32>
    %279 = arith.addf %277, %278 : vector<8x32xf32>
    %280 = arith.truncf %279 : vector<8x32xf32> to vector<8x32xbf16>
    %c0_162 = arith.constant 0 : index
    %c0_163 = arith.constant 0 : index
    %281 = vector.load %arg19[%c0_162, %c0_163] : memref<32x64xbf16, #tpu.memory_space<vmem>>, vector<32x64xbf16>
    %cst_164 = arith.constant dense<0.000000e+00> : vector<8x64xf32>
    %282 = tpu.matmul %280, %281, %cst_164 {dimension_numbers = #tpu.dot_dimension_numbers<[1], [0], [0], [1], [0, 0, 1, 1], [], []>} : vector<8x32xbf16>, vector<32x64xbf16>, vector<8x64xf32> -> vector<8x64xf32>
    %c0_165 = arith.constant 0 : index
    %c0_166 = arith.constant 0 : index
    %283 = vector.load %arg20[%c0_165, %c0_166] : memref<1x64xf32, #tpu.memory_space<vmem>>, vector<1x64xf32>
    %284 = vector.broadcast %283 : vector<1x64xf32> to vector<8x64xf32>
    %285 = arith.addf %282, %284 : vector<8x64xf32>
    %cst_167 = arith.constant 0.000000e+00 : f32
    %286 = vector.broadcast %cst_167 : f32 to vector<8x64xf32>
    %287 = arith.maximumf %285, %286 : vector<8x64xf32>
    %288 = arith.truncf %287 : vector<8x64xf32> to vector<8x64xbf16>
    %c0_168 = arith.constant 0 : index
    %c0_169 = arith.constant 0 : index
    %289 = vector.load %arg21[%c0_168, %c0_169] : memref<64x32xbf16, #tpu.memory_space<vmem>>, vector<64x32xbf16>
    %cst_170 = arith.constant dense<0.000000e+00> : vector<8x32xf32>
    %290 = tpu.matmul %288, %289, %cst_170 {dimension_numbers = #tpu.dot_dimension_numbers<[1], [0], [0], [1], [0, 0, 1, 1], [], []>} : vector<8x64xbf16>, vector<64x32xbf16>, vector<8x32xf32> -> vector<8x32xf32>
    %291 = arith.addf %279, %290 : vector<8x32xf32>
    %c0_171 = arith.constant 0 : index
    %c0_172 = arith.constant 0 : index
    %292 = vector.load %arg22[%c0_171, %c0_172] : memref<1x32xf32, #tpu.memory_space<vmem>>, vector<1x32xf32>
    %293 = vector.broadcast %292 : vector<1x32xf32> to vector<8x32xf32>
    %294 = arith.addf %291, %293 : vector<8x32xf32>
    %c0_173 = arith.constant 0 : index
    %c0_174 = arith.constant 0 : index
    %295 = vector.load %arg23[%c0_173, %c0_174] : memref<1x32xf32, #tpu.memory_space<vmem>>, vector<1x32xf32>
    %c0_175 = arith.constant 0 : index
    %c0_176 = arith.constant 0 : index
    %296 = vector.load %arg24[%c0_175, %c0_176] : memref<1x32xf32, #tpu.memory_space<vmem>>, vector<1x32xf32>
    %cst_177 = arith.constant dense<0.000000e+00> : vector<8xf32>
    %297 = vector.multi_reduction <add>, %294, %cst_177 [1] : vector<8x32xf32> to vector<8xf32>
    %298 = vector.shape_cast %297 : vector<8xf32> to vector<8x1xf32>
    %cst_178 = arith.constant 3.200000e+01 : f32
    %299 = vector.broadcast %cst_178 : f32 to vector<8x1xf32>
    %300 = arith.divf %298, %299 : vector<8x1xf32>
    %301 = vector.broadcast %300 : vector<8x1xf32> to vector<8x32xf32>
    %302 = arith.subf %294, %301 : vector<8x32xf32>
    %303 = arith.mulf %302, %302 : vector<8x32xf32>
    %cst_179 = arith.constant dense<0.000000e+00> : vector<8xf32>
    %304 = vector.multi_reduction <add>, %303, %cst_179 [1] : vector<8x32xf32> to vector<8xf32>
    %305 = vector.shape_cast %304 : vector<8xf32> to vector<8x1xf32>
    %cst_180 = arith.constant 3.200000e+01 : f32
    %306 = vector.broadcast %cst_180 : f32 to vector<8x1xf32>
    %307 = arith.divf %305, %306 : vector<8x1xf32>
    %308 = vector.broadcast %300 : vector<8x1xf32> to vector<8x32xf32>
    %309 = arith.subf %294, %308 : vector<8x32xf32>
    %cst_181 = arith.constant 9.99999974E-6 : f32
    %310 = vector.broadcast %cst_181 : f32 to vector<8x1xf32>
    %311 = arith.addf %307, %310 : vector<8x1xf32>
    %312 = math.rsqrt %311 : vector<8x1xf32>
    %313 = vector.broadcast %312 : vector<8x1xf32> to vector<8x32xf32>
    %314 = arith.mulf %309, %313 : vector<8x32xf32>
    %315 = vector.broadcast %295 : vector<1x32xf32> to vector<8x32xf32>
    %316 = arith.mulf %314, %315 : vector<8x32xf32>
    %317 = vector.broadcast %296 : vector<1x32xf32> to vector<8x32xf32>
    %318 = arith.addf %316, %317 : vector<8x32xf32>
    %319 = arith.truncf %318 : vector<8x32xf32> to vector<8x32xbf16>
    %c0_182 = arith.constant 0 : index
    %c0_183 = arith.constant 0 : index
    %c0_184 = arith.constant 0 : index
    %320 = vector.load %arg25[%c0_182, %c0_183, %c0_184] : memref<1x8x32xbf16, #tpu.memory_space<vmem>>, vector<1x8x32xbf16>
    %321 = vector.shape_cast %320 : vector<1x8x32xbf16> to vector<8x32xbf16>
    %322 = vector.shape_cast %319 : vector<8x32xbf16> to vector<1x8x32xbf16>
    tpu.vector_store %arg25[%c0_182, %c0_183, %c0_184], %322 {strides = array<i32>} : memref<1x8x32xbf16, #tpu.memory_space<vmem>>, vector<1x8x32xbf16>,
    return
  }
  func.func @transform_0(%arg0: i32) -> (i32, i32, i32) {
    %c0_i32 = arith.constant 0 : i32
    %c0_i32_0 = arith.constant 0 : i32
    %c0_i32_1 = arith.constant 0 : i32
    return %arg0, %c0_i32, %c0_i32_0 : i32, i32, i32
  }
  func.func @transform_1(%arg0: i32) -> (i32, i32, i32) {
    %c0_i32 = arith.constant 0 : i32
    %c0_i32_0 = arith.constant 0 : i32
    %c0_i32_1 = arith.constant 0 : i32
    return %arg0, %c0_i32, %c0_i32_0 : i32, i32, i32
  }
  func.func @transform_2(%arg0: i32) -> (i32, i32, i32) {
    %c0_i32 = arith.constant 0 : i32
    %c0_i32_0 = arith.constant 0 : i32
    %c0_i32_1 = arith.constant 0 : i32
    return %arg0, %c0_i32, %c0_i32_0 : i32, i32, i32
  }
  func.func @transform_3(%arg0: i32) -> (i32, i32, i32) {
    %c0_i32 = arith.constant 0 : i32
    %c0_i32_0 = arith.constant 0 : i32
    %c0_i32_1 = arith.constant 0 : i32
    return %arg0, %c0_i32, %c0_i32_0 : i32, i32, i32
  }
  func.func @transform_4(%arg0: i32) -> (i32, i32) {
    %c0_i32 = arith.constant 0 : i32
    %c0_i32_0 = arith.constant 0 : i32
    %c0_i32_1 = arith.constant 0 : i32
    return %c0_i32, %c0_i32_0 : i32, i32
  }
  func.func @transform_5(%arg0: i32) -> (i32, i32) {
    %c0_i32 = arith.constant 0 : i32
    %c0_i32_0 = arith.constant 0 : i32
    %c0_i32_1 = arith.constant 0 : i32
    return %c0_i32, %c0_i32_0 : i32, i32
  }
  func.func @transform_6(%arg0: i32) -> (i32, i32) {
    %c0_i32 = arith.constant 0 : i32
    %c0_i32_0 = arith.constant 0 : i32
    %c0_i32_1 = arith.constant 0 : i32
    return %c0_i32, %c0_i32_0 : i32, i32
  }
  func.func @transform_7(%arg0: i32) -> (i32, i32) {
    %c0_i32 = arith.constant 0 : i32
    %c0_i32_0 = arith.constant 0 : i32
    %c0_i32_1 = arith.constant 0 : i32
    return %c0_i32, %c0_i32_0 : i32, i32
  }
  func.func @transform_8(%arg0: i32) -> (i32, i32) {
    %c0_i32 = arith.constant 0 : i32
    %c0_i32_0 = arith.constant 0 : i32
    %c0_i32_1 = arith.constant 0 : i32
    return %c0_i32, %c0_i32_0 : i32, i32
  }
  func.func @transform_9(%arg0: i32) -> (i32, i32) {
    %c0_i32 = arith.constant 0 : i32
    %c0_i32_0 = arith.constant 0 : i32
    %c0_i32_1 = arith.constant 0 : i32
    return %c0_i32, %c0_i32_0 : i32, i32
  }
  func.func @transform_10(%arg0: i32) -> (i32, i32) {
    %c0_i32 = arith.constant 0 : i32
    %c0_i32_0 = arith.constant 0 : i32
    %c0_i32_1 = arith.constant 0 : i32
    return %c0_i32, %c0_i32_0 : i32, i32
  }
  func.func @transform_11(%arg0: i32) -> (i32, i32) {
    %c0_i32 = arith.constant 0 : i32
    %c0_i32_0 = arith.constant 0 : i32
    %c0_i32_1 = arith.constant 0 : i32
    return %c0_i32, %c0_i32_0 : i32, i32
  }
  func.func @transform_12(%arg0: i32) -> (i32, i32) {
    %c0_i32 = arith.constant 0 : i32
    %c0_i32_0 = arith.constant 0 : i32
    %c0_i32_1 = arith.constant 0 : i32
    return %c0_i32, %c0_i32_0 : i32, i32
  }
  func.func @transform_13(%arg0: i32) -> (i32, i32) {
    %c0_i32 = arith.constant 0 : i32
    %c0_i32_0 = arith.constant 0 : i32
    %c0_i32_1 = arith.constant 0 : i32
    return %c0_i32, %c0_i32_0 : i32, i32
  }
  func.func @transform_14(%arg0: i32) -> (i32, i32) {
    %c0_i32 = arith.constant 0 : i32
    %c0_i32_0 = arith.constant 0 : i32
    %c0_i32_1 = arith.constant 0 : i32
    return %c0_i32, %c0_i32_0 : i32, i32
  }
  func.func @transform_15(%arg0: i32) -> (i32, i32) {
    %c0_i32 = arith.constant 0 : i32
    %c0_i32_0 = arith.constant 0 : i32
    %c0_i32_1 = arith.constant 0 : i32
    return %c0_i32, %c0_i32_0 : i32, i32
  }
  func.func @transform_16(%arg0: i32) -> (i32, i32) {
    %c0_i32 = arith.constant 0 : i32
    %c0_i32_0 = arith.constant 0 : i32
    %c0_i32_1 = arith.constant 0 : i32
    return %c0_i32, %c0_i32_0 : i32, i32
  }
  func.func @transform_17(%arg0: i32) -> (i32, i32) {
    %c0_i32 = arith.constant 0 : i32
    %c0_i32_0 = arith.constant 0 : i32
    %c0_i32_1 = arith.constant 0 : i32
    return %c0_i32, %c0_i32_0 : i32, i32
  }
  func.func @transform_18(%arg0: i32) -> (i32, i32) {
    %c0_i32 = arith.constant 0 : i32
    %c0_i32_0 = arith.constant 0 : i32
    %c0_i32_1 = arith.constant 0 : i32
    return %c0_i32, %c0_i32_0 : i32, i32
  }
  func.func @transform_19(%arg0: i32) -> (i32, i32) {
    %c0_i32 = arith.constant 0 : i32
    %c0_i32_0 = arith.constant 0 : i32
    %c0_i32_1 = arith.constant 0 : i32
    return %c0_i32, %c0_i32_0 : i32, i32
  }
  func.func @transform_20(%arg0: i32) -> (i32, i32) {
    %c0_i32 = arith.constant 0 : i32
    %c0_i32_0 = arith.constant 0 : i32
    %c0_i32_1 = arith.constant 0 : i32
    return %c0_i32, %c0_i32_0 : i32, i32
  }
  func.func @transform_21(%arg0: i32) -> (i32, i32) {
    %c0_i32 = arith.constant 0 : i32
    %c0_i32_0 = arith.constant 0 : i32
    %c0_i32_1 = arith.constant 0 : i32
    return %c0_i32, %c0_i32_0 : i32, i32
  }
  func.func @transform_22(%arg0: i32) -> (i32, i32) {
    %c0_i32 = arith.constant 0 : i32
    %c0_i32_0 = arith.constant 0 : i32
    %c0_i32_1 = arith.constant 0 : i32
    return %c0_i32, %c0_i32_0 : i32, i32
  }
  func.func @transform_23(%arg0: i32) -> (i32, i32) {
    %c0_i32 = arith.constant 0 : i32
    %c0_i32_0 = arith.constant 0 : i32
    %c0_i32_1 = arith.constant 0 : i32
    return %c0_i32, %c0_i32_0 : i32, i32
  }
  func.func @transform_24(%arg0: i32) -> (i32, i32, i32) {
    %c0_i32 = arith.constant 0 : i32
    %c0_i32_0 = arith.constant 0 : i32
    %c0_i32_1 = arith.constant 0 : i32
    return %arg0, %c0_i32, %c0_i32_0 : i32, i32, i32
  }
}

</mosaic_0001>

<bundles_post_ra>
// kernel: transformer_forward.9
= control target key start
LH: loop header
LB: loop body
LE: loop exit
PB: predicated region body
PF: predicated region fallthrough
CT: control target
= control target key end

     0   :  { %v210_v0 = vmov 0.0   ;;  %vm211_vm0 = vmmov 0   ;;  %s268_s1 = inlined_call_operand.vmem [shape: bf16[128,128], index: 1, kind: input, shape index: {}]   ;;  %s269_s0 = inlined_call_operand.vmem [shape: bf16[16,128], index: 0, kind: input, shape index: {}]   ;;  %s270_s2 = inlined_call_operand.vmem [shape: f32[1,128], index: 2, kind: input, shape index: {}]   ;;  %s271_s3 = inlined_call_operand.vmem [shape: f32[16,128], index: 3, kind: output, shape index: {}]  }
   0x1   :  { %179 = vmatprep.subr.bf16.mxu0 %v210_v0  ;;  %v201_v1 = vld [vmem:[%s268_s1 + $0x38] sm:$0xff]   ;;  %195 = vmatprep.mubr.msk.bf16.mxu0 %vm211_vm0, %v210_v0  ;;  %v202_v2 = vld [vmem:[%s268_s1 + $0x30] sm:$0xff]   ;;  %v203_v3 = vld [vmem:[%s268_s1 + $0x28] sm:$0xff]  }
   0x2   :  { %180 = vmatpush3.bf16.msra.mxu0 %v201_v1  ;;  %v204_v4 = vld [vmem:[%s268_s1 + $0x20] sm:$0xff]   ;;  %v205_v5 = vld [vmem:[%s268_s1 + $0x18] sm:$0xff]   ;;  %v206_v6 = vld [vmem:[%s268_s1 + $0x10] sm:$0xff]  }
   0x3   :  { %181 = vmatprep.subr.bf16.mxu0 %v210_v0  ;;  %v207_v7 = vld [vmem:[%s268_s1 + $0x8] sm:$0xff]   ;;  %v208_v8 = vld [vmem:[%s268_s1] sm:$0xff]  }
   0x4   :  { %v209_v9 = vld [vmem:[%s269_s0] sm:$0xff]  }
   0x5   :  { %v169_v10 = vld [vmem:[%s270_s2] ss:$0 sm:$0xff] }
   0x6   :  { %182 = vmatpush3.bf16.msra.mxu0 %v202_v2 }
   0x7   :  { %183 = vmatprep.subr.bf16.mxu0 %v210_v0 }
   0xa   :  { %184 = vmatpush3.bf16.msra.mxu0 %v203_v3 }
   0xb   :  { %185 = vmatprep.subr.bf16.mxu0 %v210_v0 }
   0xe   :  { %186 = vmatpush3.bf16.msra.mxu0 %v204_v4 }
   0xf   :  { %187 = vmatprep.subr.bf16.mxu0 %v210_v0 }
  0x12   :  { %188 = vmatpush3.bf16.msra.mxu0 %v205_v5 }
  0x13   :  { %189 = vmatprep.subr.bf16.mxu0 %v210_v0 }
  0x16   :  { %190 = vmatpush3.bf16.msra.mxu0 %v206_v6 }
  0x17   :  { %191 = vmatprep.subr.bf16.mxu0 %v210_v0 }
  0x1a   :  { %192 = vmatpush3.bf16.msra.mxu0 %v207_v7 }
  0x1b   :  { %193 = vmatprep.subr.bf16.mxu0 %v210_v0 }
  0x1e   :  { %194 = vmatpush3.bf16.msra.mxu0 %v208_v8 }
  0x21   :  { %196 = vmatmul.mubr.bf16.vlgmr.msra.gmra.mxu0 %v209_v9 }
  0xe1   :  { %v129_v11 = vpop.f32.mrf.mxu0 }
  0xe2   :  { %v152_v12 = vadd.f32 %v169_v10, %v129_v11 }
  0xe3   :  { %v197_v13 = vpop.f32.mrf.mxu0 }
  0xe4   :  { %154 = vst [vmem:[%s271_s3] sm:$0xff] %v152_v12 }
  0xe5   :  { %v132_v14 = vpop.f32.mrf.mxu0 }
  0xe6   :  { %v153_v15 = vadd.f32 %v169_v10, %v132_v14 }
  0xe7   :  { %v198_v16 = vpop.f32.mrf.mxu0 }
  0xe8   :  { %155 = vst [vmem:[%s271_s3 + $0x8] sm:$0xff] %v153_v15 }

// kernel: transformer_forward.5
= control target key start
LH: loop header
LB: loop body
LE: loop exit
PB: predicated region body
PF: predicated region fallthrough
CT: control target
= control target key end

     0   :  { %s1721_s29 = smov 0   ;;  %s1899_s0 = inlined_call_operand.vmem [shape: bf16[2,8,32], index: 0, kind: input, shape index: {}]   ;;  %s1900_s1 = inlined_call_operand.vmem [shape: f32[2,1,8], index: 1, kind: input, shape index: {}]   ;;  %s1901_s2 = inlined_call_operand.vmem [shape: bf16[32,96], index: 2, kind: input, shape index: {}]   ;;  %s1902_s3 = inlined_call_operand.vmem [shape: f32[1,96], index: 3, kind: input, shape index: {}]   ;;  %s1903_s4 = inlined_call_operand.vmem [shape: bf16[32,32], index: 4, kind: input, shape index: {}]   ;;  %s1904_s5 = inlined_call_operand.vmem [shape: f32[1,32], index: 5, kind: input, shape index: {}]   ;;  %s1905_s6 = inlined_call_operand.vmem [shape: f32[1,32], index: 6, kind: input, shape index: {}]   ;;  %s1906_s7 = inlined_call_operand.vmem [shape: f32[1,32], index: 7, kind: input, shape index: {}]   ;;  %s1907_s8 = inlined_call_operand.vmem [shape: bf16[32,64], index: 8, kind: input, shape index: {}]   ;;  %s1908_s9 = inlined_call_operand.vmem [shape: f32[1,64], index: 9, kind: input, shape index: {}]   ;;  %s1909_s10 = inlined_call_operand.vmem [shape: bf16[64,32], index: 10, kind: input, shape index: {}]   ;;  %s1910_s11 = inlined_call_operand.vmem [shape: f32[1,32], index: 11, kind: input, shape index: {}]   ;;  %s1911_s12 = inlined_call_operand.vmem [shape: f32[1,32], index: 12, kind: input, shape index: {}]   ;;  %s1912_s13 = inlined_call_operand.vmem [shape: f32[1,32], index: 13, kind: input, shape index: {}]   ;;  %s1913_s14 = inlined_call_operand.vmem [shape: bf16[2,8,32], index: 14, kind: output, shape index: {}]  }
   0x1 LB: > { %s1399_s30 = sadd.s32 4294967295, %s1627_s29   ;;  %p1403_p0 = scmp.ge.s32.totalorder %s1627_s29, 1  ;;  %s1627_s29 = sphi %s1721_s29, %s24_s29  }
   0x2   : > { %p419_p1 = scmp.lt.s32.totalorder %s1627_s29, 3 }
   0x4   : > { %p420_p2 = pnand %p1403_p0, %p419_p1 }
   0x5   : > { %p466_p3 = scmp.lt.s32.totalorder (!%p420_p2), %s1399_s30, 1  ;;  %s1631_s25 = smov (!%p420_p2), 120  }
   0x6   : > { %423 = sbr.rel (%p420_p2) target bundleno = 2455 (0x997), region = 76  ;;  %s1632_s26 = smov (!%p420_p2), 96  }
   0x7   : > { %s1633_s27 = smov (!%p420_p2), 80   ;;  %s1634_s28 = smov (!%p420_p2), 88  }
   0x8   : > { %s1635_s15 = smov (!%p420_p2), 72   ;;  %s1636_s16 = smov (!%p420_p2), 112  }
   0x9   : > { %s1637_s17 = smov (!%p420_p2), 104   ;;  %s1640_s23 = smov (!%p420_p2), 64  }
   0xa   : > { %s1641_s24 = smov (!%p420_p2), 40   ;;  %s1645_s18 = smov (!%p420_p2), 24  }
   0xb   : > { %v1587_v0 = vld [vmem:[%s1901_s2 + $0x8] sm:$0xff]   ;;  %v1629_v1 = vmov 0.0   ;;  %v1588_v2 = vld [vmem:[%s1901_s2] sm:$0xff]   ;;  %vm1630_vm0 = vmmov 0   ;;  %s1915_s30 = smov (!%p466_p3, %s1399_s30), 1  ;;  %vm506_vm1 = vcmask 261120   ;;  %v608_v27 = vlaneseq }
   0xc   : > { %1478 = vmatprep.subr.bf16.mxu0 %v1629_v1  ;;  %1486 = vmatprep.subr.bf16.mxu1 %v1629_v1  ;;  %s1404_s19 = sshll.u32 %s1915_s30, 2  ;;  %v1406_v4 = vld [vmem:[%s1902_s3] ss:$0 sm:$0xff]  ;;  %vm551_vm2 = vcmask 781312   ;;  %vm559_vm3 = vcmask 64512   ;;  %s472_s21 = scalar_lea.vmem %s1900_s1, %s1915_s30  ;;  %vm631_vm5 = vcmask 1043456  }
   0xd   : > { %1479 = vmatpush3.bf16.msra.mxu0 %v1587_v0  ;;  %1482 = vmatprep.mubr.msk.bf16.mxu0 %vm1630_vm0, %v1629_v1  ;;  %s469_s22 = scalar_lea.vmem %s1899_s0, %s1404_s19  ;;  %v480_v28 = vld [vmem:[%s472_s21] sm:$0x1]  ;;  %v609_v29 = vshrl.u32 %v608_v27, 7  ;;  %v1638_v31 = vmov -1e+09   ;;  %vm676_vm6 = vcmask 60416  }
   0xe   : > { %1480 = vmatprep.subr.bf16.mxu0 %v1629_v1  ;;  %1488 = vmatprep.mubr.msk.bf16.mxu1 %vm1630_vm0, %v1629_v1  ;;  %v1751_v3 = vld [vmem:[%s469_s22] sm:$0xf]  ;;  %vm481_vm4 = vcmp.gt.f32.partialorder %v480_v28, 0.0  ;;  %s1639_s22 = smov 56   ;;  %vm801_vm7 = vcmask 126016   ;;  %vm926_vm8 = vcmask 191616  }
   0xf   : > { %v610_v30 = vsub.s32 0, %v609_v29  ;;  %v482_v32 = vsel %vm481_vm4, 0.0, %v1638_v31  ;;  %vm1051_vm9 = vcmask 257216   ;;  %vm1252_vm10 = vcmask 523264  }
  0x10   : > { %vm1335_vm11 = vcmask 257024  }
  0x11   : > { %1481 = vmatpush3.bf16.msra.mxu0 %v1588_v2  ;;  %v611_v33 = vrot.slane %v482_v32, %v610_v30 }
  0x12   : > { %1492 = vmatprep.subr.bf16.mxu0 %v1629_v1 }
  0x14   : > { %1483 = vmatmul.mubr.msk.bf16.vlgmr.msra.gmra.mxu0 %vm506_vm1, %v1751_v3 }
  0x15   : > { %1494 = vmatprep.mubr.msk.bf16.mxu0 %vm1630_vm0, %v1629_v1 }
  0xd4   : > { %v544_v5 = vpop.f32.mrf.mxu0 }
  0xd5   : > { %v545_v6 = vadd.f32 %v1406_v4, %v544_v5 }
  0xd6   : > { %v1484_v7 = vpop.f32.mrf.mxu0 }
  0xd7   : > { %v550_v8 = vpack.c.bf16 %v545_v6, %v545_v6 }
  0xd8   : > { %v547_v9 = vpop.f32.mrf.mxu0 }
  0xd9   : > { %552 = vst.msk [vmem:[#allocation2] sm:$0xf] %vm551_vm2, %v550_v8 }
  0xda   : > { %v1485_v10 = vpop.f32.mrf.mxu0 }
  0xe0   : > { %v1760_v11 = vld [vmem:[#allocation2] ss:$0 sps:$4 sm:$0xff]  }
  0xe1   : > { %v553_v12 = vld [vmem:[#allocation2] sm:$0xf]  ;;  %682 = vrot.lane.b32.xlu1 %v1760_v11, %s1631_s25  ;;  %s1642_s25 = smov 48  }
  0xe2   : > { %v1762_v13 = vcombine.low %v553_v12, %v553_v12  ;;  %v1766_v14 = vld [vmem:[#allocation2] ss:$0 sps:$4 sm:$0xff]  }
  0xe3   : > { %v1770_v15 = vld [vmem:[#allocation2] ss:$0 sps:$4 sm:$0xff]  }
  0xe4   : > { %557 = vrot.lane.b32.xlu0 %v1762_v13, %s1632_s26  ;;  %s1643_s26 = smov 8  }
  0xe5   : > { %809 = vrot.lane.b32.xlu1 %v1766_v14, %s1633_s27 }
  0xe8   : > { %684 = vrot.lane.b32.xlu0 %v1760_v11, %s1634_s28 }
  0xe9   : > { %934 = vrot.lane.b32.xlu1 %v1770_v15, %s1635_s15 }
  0xec   : > { %807 = vrot.lane.b32.xlu0 %v1766_v14, %s1636_s16 }
  0xf0   : > { %932 = vrot.lane.b32.xlu0 %v1770_v15, %s1637_s17  ;;  %s1644_s17 = smov 16  }
 0x153   : > { %v683_v19 = vpop.permute.xlu1 %682 }
 0x156   : > { %v558_v16 = vpop.permute.xlu0 %557 }
 0x157   : > { %v564_v17 = vsel %vm559_vm3, %v558_v16, 0  ;;  %v810_v21 = vpop.permute.xlu1 %809 }
 0x158   : > { %1487 = vmatpush3.bf16.xpose.msra.mxu1 %v564_v17  ;;  %v815_v22 = vsel %vm559_vm3, %v810_v21, 0 }
 0x159   : > { %1498 = vmatprep.subr.bf16.mxu1 %v1629_v1 }
 0x15a   : > { %v685_v18 = vpop.permute.xlu0 %684 }
 0x15b   : > { %v690_v20 = vsel %vm559_vm3, %v685_v18, 0  ;;  %v935_v23 = vpop.permute.xlu1 %934 }
 0x15c   : > { %v940_v25 = vsel %vm559_vm3, %v935_v23, 0 }
 0x15e   : > { %v808_v24 = vpop.permute.xlu0 %807 }
 0x15f   : > { %1489 = vmatmul.mubr.msk.bf16.vlgmr.msra.gmra.mxu1 %vm559_vm3, %v553_v12 }
 0x160   : > { %1499 = vmatpush3.bf16.xpose.msra.mxu1 %v690_v20  ;;  %1500 = vmatprep.mubr.msk.bf16.mxu1 %vm1630_vm0, %v1629_v1 }
 0x161   : > { %1510 = vmatprep.subr.bf16.mxu1 %v1629_v1 }
 0x162   : > { %v933_v26 = vpop.permute.xlu0 %932 }
 0x167   : > { %1501 = vmatmul.mubr.msk.bf16.vlgmr.msra.gmra.mxu1 %vm559_vm3, %v683_v19 }
 0x168   : > { %1511 = vmatpush3.bf16.xpose.msra.mxu1 %v815_v22  ;;  %1512 = vmatprep.mubr.msk.bf16.mxu1 %vm1630_vm0, %v1629_v1 }
 0x169   : > { %1522 = vmatprep.subr.bf16.mxu1 %v1629_v1 }
 0x16f   : > { %1513 = vmatmul.mubr.msk.bf16.vlgmr.msra.gmra.mxu1 %vm559_vm3, %v808_v24 }
 0x170   : > { %1523 = vmatpush3.bf16.xpose.msra.mxu1 %v940_v25  ;;  %1524 = vmatprep.mubr.msk.bf16.mxu1 %vm1630_vm0, %v1629_v1 }
 0x171   : > { %1534 = vmatprep.subr.bf16.mxu1 %v1629_v1 }
 0x177   : > { %1525 = vmatmul.mubr.msk.bf16.vlgmr.msra.gmra.mxu1 %vm559_vm3, %v933_v26 }
 0x178   : > { %1538 = vmatprep.mubr.msk.bf16.mxu1 %vm1630_vm0, %v1629_v1 }
 0x21f   : > { %v600_v34 = vpop.f32.mrf.mxu1 }
 0x220   : > { %v606_v35 = vmul.f32 0.35355338, %v600_v34 }
 0x221   : > { %v1490_v36 = vpop.f32.mrf.mxu1 }
 0x222   : > { %v613_v37 = vadd.f32 %v611_v33, %v606_v35 }
 0x223   : > { %v603_v38 = vpop.f32.mrf.mxu1 }
 0x224   : > { %v614_v39 = vsel %vm559_vm3, %v613_v37, -inf }
 0x225   : > { %615 = vmax.xlane.f32.xlu1 %v614_v39  ;;  %v1491_v40 = vpop.f32.mrf.mxu1 }
 0x227   : > { %v726_v41 = vpop.f32.mrf.mxu1 }
 0x228   : > { %v732_v42 = vmul.f32 0.35355338, %v726_v41 }
 0x229   : > { %v1502_v43 = vpop.f32.mrf.mxu1 }
 0x22a   : > { %v733_v44 = vadd.f32 %v732_v42, %v611_v33 }
 0x22b   : > { %v729_v45 = vpop.f32.mrf.mxu1 }
 0x22c   : > { %v734_v46 = vsel %vm559_vm3, %v733_v44, -inf }
 0x22d   : > { %735 = vmax.xlane.f32.xlu0 %v734_v46  ;;  %v1503_v47 = vpop.f32.mrf.mxu1 }
 0x22f   : > { %v851_v48 = vpop.f32.mrf.mxu1 }
 0x230   : > { %v857_v49 = vmul.f32 0.35355338, %v851_v48 }
 0x231   : > { %v1514_v50 = vpop.f32.mrf.mxu1 }
 0x232   : > { %v858_v51 = vadd.f32 %v857_v49, %v611_v33 }
 0x233   : > { %v854_v52 = vpop.f32.mrf.mxu1 }
 0x234   : > { %v859_v53 = vsel %vm559_vm3, %v858_v51, -inf }
 0x235   : > { %860 = vmax.xlane.f32.xlu0 %v859_v53  ;;  %v1515_v54 = vpop.f32.mrf.mxu1 }
 0x237   : > { %v976_v55 = vpop.f32.mrf.mxu1 }
 0x238   : > { %v982_v56 = vmul.f32 0.35355338, %v976_v55  ;;  %v1593_v55 = vld [vmem:[%s1903_s4 + $0x8] sm:$0xff]  }
 0x239   : > { %v1526_v57 = vpop.f32.mrf.mxu1  ;;  %1535 = vmatpush3.bf16.msra.mxu1 %v1593_v55 }
 0x23a   : > { %v983_v58 = vadd.f32 %v982_v56, %v611_v33  ;;  %1536 = vmatprep.subr.bf16.mxu1 %v1629_v1 }
 0x23b   : > { %v979_v59 = vpop.f32.mrf.mxu1 }
 0x23c   : > { %v984_v60 = vsel %vm559_vm3, %v983_v58, -inf }
 0x23d   : > { %985 = vmax.xlane.f32.xlu1 %v984_v60  ;;  %v1527_v61 = vpop.f32.mrf.mxu1 }
 0x2ae   : > { %v616_v62 = vpop.xlane.xlu1 %615 }
 0x2af   : > { %v617_v63 = vsub.f32 %v613_v37, %v616_v62 }
 0x2b1   : > { %v618_v0 = vmul.f32 1.442695, %v617_v63 }
 0x2b3   : > { %1601 = vpow2.f32 %v618_v0 }
 0x2b6   : > { %v736_v2 = vpop.xlane.xlu0 %735 }
 0x2b7   : > { %v737_v4 = vsub.f32 %v733_v44, %v736_v2 }
 0x2b9   : > { %v738_v5 = vmul.f32 1.442695, %v737_v4 }
 0x2bb   : > { %1603 = vpow2.f32 %v738_v5 }
 0x2be   : > { %v861_v6 = vpop.xlane.xlu0 %860 }
 0x2bf   : > { %v862_v7 = vsub.f32 %v858_v51, %v861_v6 }
 0x2c0   : > { %v1602_v8 = vpop.eup %1601 }
 0x2c1   : > { %v863_v9 = vmul.f32 1.442695, %v862_v7  ;;  %v620_v10 = vsel %vm559_vm3, %v1602_v8, 0.0 }
 0x2c2   : > { %621 = vadd.xlane.f32.xlu0 %v620_v10 }
 0x2c3   : > { %1605 = vpow2.f32 %v863_v9  ;;  %v479_v9 = vunpack.c.l.bf16 %v1751_v3  ;;  %v1595_v3 = vld [vmem:[%s1907_s8 + $0x8] sm:$0xff]  }
 0x2c6   : > { %v986_v19 = vpop.xlane.xlu1 %985 }
 0x2c7   : > { %v987_v20 = vsub.f32 %v983_v58, %v986_v19  ;;  %v1594_v58 = vld [vmem:[%s1903_s4] sm:$0xff]  }
 0x2c8   : > { %v1604_v12 = vpop.eup %1603  ;;  %1537 = vmatpush3.bf16.msra.mxu1 %v1594_v58 }
 0x2c9   : > { %v740_v16 = vsel %vm559_vm3, %v1604_v12, 0.0  ;;  %v988_v21 = vmul.f32 1.442695, %v987_v20  ;;  %1550 = vmatprep.subr.bf16.mxu1 %v1629_v1 }
 0x2ca   : > { %741 = vadd.xlane.f32.xlu1 %v740_v16 }
 0x2cb   : > { %1607 = vpow2.f32 %v988_v21 }
 0x2d0   : > { %v1606_v17 = vpop.eup %1605 }
 0x2d1   : > { %v865_v18 = vsel %vm559_vm3, %v1606_v17, 0.0 }
 0x2d2   : > { %866 = vadd.xlane.f32.xlu0 %v865_v18 }
 0x2d8   : > { %v1608_v22 = vpop.eup %1607 }
 0x2d9   : > { %v990_v23 = vsel %vm559_vm3, %v1608_v22, 0.0 }
 0x2db   : > { %746 = vrot.lane.b32.xlu1 %v1760_v11, %s1639_s22  ;;  %s476_s22 = scalar_lea.vmem %s1913_s14, %s1404_s19 }
 0x2e8   : > { %626 = vrot.lane.b32.xlu0 %v1762_v13, %s1640_s23 }
 0x2ec   : > { %996 = vrot.lane.b32.xlu0 %v1770_v15, %s1641_s24 }
 0x2ff   : > { %991 = vadd.xlane.f32.xlu1 %v990_v23 }
 0x310   : > { %871 = vrot.lane.b32.xlu1 %v1766_v14, %s1642_s25 }
 0x34b   : > { %v622_v24 = vpop.xlane.xlu0 %621 }
 0x34c   : > { %1609 = vrcp.f32 %v622_v24 }
 0x353   : > { %v742_v11 = vpop.xlane.xlu1 %741 }
 0x354   : > { %1611 = vrcp.f32 %v742_v11 }
 0x357   : > { %v747_v15 = vpop.permute.xlu1 %746 }
 0x358   : > { %v752_v31 = vsel %vm631_vm5, %v747_v15, 0 }
 0x359   : > { %v1610_v25 = vpop.eup %1609 }
 0x35a   : > { %v624_v27 = vmul.f32 %v1610_v25, %v1602_v8  ;;  %v1425_v8 = vld [vmem:[%s1904_s5] ss:$0 sm:$0xff] }
 0x35b   : > { %v867_v26 = vpop.xlane.xlu0 %866  ;;  %v1596_v25 = vld [vmem:[%s1907_s8] sm:$0xff]  }
 0x35c   : > { %v625_v29 = vpack.c.bf16 %v624_v27, %v624_v27  ;;  %1613 = vrcp.f32 %v867_v26  ;;  %v1597_v26 = vld [vmem:[%s1909_s10 + $0x18] sm:$0xff]   ;;  %v1598_v27 = vld [vmem:[%s1909_s10 + $0x10] sm:$0xff]  }
 0x35f   : > { %v627_v13 = vpop.permute.xlu0 %626 }
 0x360   : > { %v633_v28 = vsel %vm631_vm5, %v627_v13, 0 }
 0x361   : > { %1493 = vmatpush3.bf16.msra.mxu0 %v633_v28  ;;  %v1612_v30 = vpop.eup %1611 }
 0x362   : > { %1504 = vmatprep.subr.bf16.mxu0 %v1629_v1  ;;  %v744_v14 = vmul.f32 %v1612_v30, %v1604_v12  ;;  %v1429_v30 = vld [vmem:[%s1905_s6] ss:$0 sm:$0xff] }
 0x363   : > { %v997_v38 = vpop.permute.xlu0 %996 }
 0x364   : > { %1495 = vmatmul.mubr.msk.bf16.vlgmr.msra.gmra.mxu0 %vm559_vm3, %v625_v29  ;;  %v745_v32 = vpack.c.bf16 %v744_v14, %v744_v14  ;;  %v1002_v40 = vsel %vm631_vm5, %v997_v38, 0  ;;  %v1430_v14 = vld [vmem:[%s1906_s7] ss:$0 sm:$0xff] }
 0x365   : > { %1505 = vmatpush3.bf16.msra.mxu0 %v752_v31  ;;  %1506 = vmatprep.mubr.msk.bf16.mxu0 %vm1630_vm0, %v1629_v1 }
 0x366   : > { %1516 = vmatprep.subr.bf16.mxu0 %v1629_v1 }
 0x369   : > { %v1614_v33 = vpop.eup %1613 }
 0x36a   : > { %v869_v35 = vmul.f32 %v1614_v33, %v1606_v17 }
 0x36c   : > { %1507 = vmatmul.mubr.msk.bf16.vlgmr.msra.gmra.mxu0 %vm559_vm3, %v745_v32  ;;  %v870_v39 = vpack.c.bf16 %v869_v35, %v869_v35  ;;  %v1599_v35 = vld [vmem:[%s1909_s10 + $0x8] sm:$0xff]  }
 0x36d   : > { %1518 = vmatprep.mubr.msk.bf16.mxu0 %vm1630_vm0, %v1629_v1 }
 0x388   : > { %v992_v34 = vpop.xlane.xlu1 %991 }
 0x389   : > { %1615 = vrcp.f32 %v992_v34 }
 0x38c   : > { %v872_v36 = vpop.permute.xlu1 %871 }
 0x38d   : > { %v877_v37 = vsel %vm631_vm5, %v872_v36, 0  ;;  %v1600_v36 = vld [vmem:[%s1909_s10] sm:$0xff]  }
 0x38e   : > { %1517 = vmatpush3.bf16.msra.mxu0 %v877_v37  ;;  %v1431_v37 = vld [vmem:[%s1908_s9] ss:$0 sm:$0xff] }
 0x38f   : > { %1528 = vmatprep.subr.bf16.mxu0 %v1629_v1 }
 0x391   : > { %1519 = vmatmul.mubr.msk.bf16.vlgmr.msra.gmra.mxu0 %vm559_vm3, %v870_v39 }
 0x392   : > { %1529 = vmatpush3.bf16.msra.mxu0 %v1002_v40  ;;  %1530 = vmatprep.mubr.msk.bf16.mxu0 %vm1630_vm0, %v1629_v1 }
 0x393   : > { %1542 = vmatprep.subr.bf16.mxu0 %v1629_v1 }
 0x396   : > { %v1616_v41 = vpop.eup %1615 }
 0x397   : > { %v994_v42 = vmul.f32 %v1616_v41, %v1608_v22 }
 0x399   : > { %v995_v43 = vpack.c.bf16 %v994_v42, %v994_v42 }
 0x39b   : > { %1531 = vmatmul.mubr.msk.bf16.vlgmr.msra.gmra.mxu0 %vm559_vm3, %v995_v43 }
 0x39c   : > { %1546 = vmatprep.mubr.msk.bf16.mxu0 %vm1630_vm0, %v1629_v1  ;;  %1543 = vmatpush3.bf16.msra.mxu0 %v1595_v3 }
 0x39d   : > { %1544 = vmatprep.subr.bf16.mxu0 %v1629_v1 }
 0x3a0   : > { %1545 = vmatpush3.bf16.msra.mxu0 %v1596_v25 }
 0x424   : > { %v669_v44 = vpop.f32.mrf.mxu0 }
 0x425   : > { %v675_v45 = vpack.c.bf16 %v669_v44, %v669_v44 }
 0x426   : > { %v1496_v46 = vpop.f32.mrf.mxu0 }
 0x427   : > { %677 = vst.msk [vmem:[#allocation3] sm:$0xf] %vm676_vm6, %v675_v45 }
 0x428   : > { %v672_v47 = vpop.f32.mrf.mxu0 }
 0x42a   : > { %v1497_v48 = vpop.f32.mrf.mxu0 }
 0x42c   : > { %v788_v49 = vpop.f32.mrf.mxu0 }
 0x42d   : > { %v1445_v50 = vpack.c.bf16 %v788_v49, %v788_v49 }
 0x42e   : > { %v1508_v51 = vpop.f32.mrf.mxu0 }
 0x42f   : > { %798 = vrot.lane.b32.xlu1 %v1445_v50, %s1643_s26 }
 0x430   : > { %v791_v52 = vpop.f32.mrf.mxu0 }
 0x432   : > { %v1509_v53 = vpop.f32.mrf.mxu0 }
 0x451   : > { %v913_v54 = vpop.f32.mrf.mxu0 }
 0x452   : > { %v1446_v56 = vpack.c.bf16 %v913_v54, %v913_v54 }
 0x453   : > { %v1520_v57 = vpop.f32.mrf.mxu0 }
 0x454   : > { %923 = vrot.lane.b32.xlu0 %v1446_v56, %s1644_s17 }
 0x455   : > { %v916_v59 = vpop.f32.mrf.mxu0 }
 0x457   : > { %v1521_v60 = vpop.f32.mrf.mxu0 }
 0x45b   : > { %v1038_v61 = vpop.f32.mrf.mxu0 }
 0x45c   : > { %v1447_v62 = vpack.c.bf16 %v1038_v61, %v1038_v61  ;;  %v1441_v61 = vld [vmem:[%s1911_s12] ss:$0 sm:$0xff] }
 0x45d   : > { %v1532_v63 = vpop.f32.mrf.mxu0 }
 0x45e   : > { %1048 = vrot.lane.b32.xlu1 %v1447_v62, %s1645_s18  ;;  %v1442_v63 = vld [vmem:[%s1912_s13] ss:$0 sm:$0xff] }
 0x45f   : > { %v1041_v0 = vpop.f32.mrf.mxu0 }
 0x461   : > { %v1533_v2 = vpop.f32.mrf.mxu0 }
 0x4a1   : > { %v799_v4 = vpop.permute.xlu1 %798 }
 0x4a2   : > { %802 = vst.msk [vmem:[#allocation3] sm:$0xf] %vm801_vm7, %v799_v4 }
 0x4c6   : > { %v924_v5 = vpop.permute.xlu0 %923 }
 0x4c7   : > { %927 = vst.msk [vmem:[#allocation3] sm:$0xf] %vm926_vm8, %v924_v5 }
 0x4d0   : > { %v1049_v6 = vpop.permute.xlu1 %1048 }
 0x4d1   : > { %1052 = vst.msk [vmem:[#allocation3] sm:$0xf] %vm1051_vm9, %v1049_v6 }
 0x4d8   : > { %v1053_v7 = vld [vmem:[#allocation3] sm:$0xf] }
 0x4d9   : > { %1539 = vmatmul.mubr.msk.bf16.vlgmr.msra.gmra.mxu1 %vm506_vm1, %v1053_v7 }
 0x4da   : > { %1558 = vmatprep.mubr.msk.bf16.mxu1 %vm1630_vm0, %v1629_v1  ;;  %1551 = vmatpush3.bf16.msra.mxu1 %v1597_v26 }
 0x4db   : > { %1552 = vmatprep.subr.bf16.mxu1 %v1629_v1 }
 0x4de   : > { %1553 = vmatpush3.bf16.msra.mxu1 %v1598_v27 }
 0x4df   : > { %1554 = vmatprep.subr.bf16.mxu1 %v1629_v1 }
 0x4e2   : > { %1555 = vmatpush3.bf16.msra.mxu1 %v1599_v35 }
 0x4e3   : > { %1556 = vmatprep.subr.bf16.mxu1 %v1629_v1  ;;  %v1440_v1 = vld [vmem:[%s1910_s11] ss:$0 sm:$0xff] }
 0x4e6   : > { %1557 = vmatpush3.bf16.msra.mxu1 %v1600_v36 }
 0x599   : > { %v1114_v10 = vpop.f32.mrf.mxu1 }
 0x59a   : > { %v1115_v12 = vadd.f32 %v1425_v8, %v1114_v10 }
 0x59b   : > { %v1540_v16 = vpop.f32.mrf.mxu1 }
 0x59c   : > { %v1120_v17 = vadd.f32 %v1115_v12, %v479_v9 }
 0x59d   : > { %v1117_v18 = vpop.f32.mrf.mxu1 }
 0x59e   : > { %v1123_v19 = vsel %vm506_vm1, %v1120_v17, 0.0 }
 0x59f   : > { %v1541_v20 = vpop.f32.mrf.mxu1  ;;  %1124 = vadd.xlane.f32.xlu0 %v1123_v19 }
 0x628   : > { %v1125_v21 = vpop.xlane.xlu0 %1124 }
 0x629   : > { %v1127_v22 = vmul.f32 0.03125, %v1125_v21 }
 0x62b   : > { %v1128_v23 = vsub.f32 %v1120_v17, %v1127_v22 }
 0x62d   : > { %v1129_v24 = vmul.f32 %v1128_v23, %v1128_v23 }
 0x62f   : > { %v1130_v11 = vsel %vm506_vm1, %v1129_v24, 0.0 }
 0x630   : > { %1131 = vadd.xlane.f32.xlu1 %v1130_v11 }
 0x6b9   : > { %v1132_v13 = vpop.xlane.xlu1 %1131 }
 0x6ba   : > { %v1133_v28 = vmul.f32 0.03125, %v1132_v13 }
 0x6bc   : > { %v1134_v15 = vadd.f32 1e-05, %v1133_v28 }
 0x6be   : > { %1617 = vrsqrt.f32 %v1134_v15 }
 0x6cb   : > { %v1618_v29 = vpop.eup %1617 }
 0x6cc   : > { %v1136_v31 = vmul.f32 %v1618_v29, %v1128_v23 }
 0x6ce   : > { %v1143_v32 = vmul.f32 %v1429_v30, %v1136_v31 }
 0x6d0   : > { %v1150_v33 = vadd.f32 %v1430_v14, %v1143_v32 }
 0x6d2   : > { %v1151_v34 = vpack.c.bf16 %v1150_v33, %v1150_v33 }
 0x6d4   : > { %1547 = vmatmul.mubr.msk.bf16.vlgmr.msra.gmra.mxu0 %vm506_vm1, %v1151_v34 }
 0x794   : > { %v1212_v38 = vpop.f32.mrf.mxu0 }
 0x795   : > { %v1213_v39 = vadd.f32 %v1431_v37, %v1212_v38 }
 0x796   : > { %v1548_v40 = vpop.f32.mrf.mxu0 }
 0x797   : > { %v1218_v41 = vmax.f32 %v1213_v39, 0.0 }
 0x798   : > { %v1215_v42 = vpop.f32.mrf.mxu0 }
 0x799   : > { %v1219_v43 = vpack.c.bf16 %v1218_v41, %v1218_v41 }
 0x79a   : > { %v1549_v44 = vpop.f32.mrf.mxu0 }
 0x79b   : > { %1559 = vmatmul.mubr.msk.bf16.vlgmr.msra.gmra.mxu1 %vm1252_vm10, %v1219_v43 }
 0x85b   : > { %v1290_v45 = vpop.f32.mrf.mxu1 }
 0x85c   : > { %v1296_v46 = vadd.f32 %v1290_v45, %v1150_v33 }
 0x85d   : > { %v1560_v47 = vpop.f32.mrf.mxu1 }
 0x85e   : > { %v1304_v48 = vadd.f32 %v1440_v1, %v1296_v46 }
 0x85f   : > { %v1293_v49 = vpop.f32.mrf.mxu1 }
 0x860   : > { %v1307_v50 = vsel %vm506_vm1, %v1304_v48, 0.0 }
 0x861   : > { %1308 = vadd.xlane.f32.xlu0 %v1307_v50  ;;  %v1561_v51 = vpop.f32.mrf.mxu1 }
 0x8ea   : > { %v1309_v52 = vpop.xlane.xlu0 %1308 }
 0x8eb   : > { %v1310_v53 = vmul.f32 0.03125, %v1309_v52 }
 0x8ed   : > { %v1311_v54 = vsub.f32 %v1304_v48, %v1310_v53 }
 0x8ef   : > { %v1312_v55 = vmul.f32 %v1311_v54, %v1311_v54 }
 0x8f1   : > { %v1313_v56 = vsel %vm506_vm1, %v1312_v55, 0.0 }
 0x8f2   : > { %1314 = vadd.xlane.f32.xlu0 %v1313_v56 }
 0x97b   : > { %v1315_v57 = vpop.xlane.xlu0 %1314 }
 0x97c   : > { %v1316_v58 = vmul.f32 0.03125, %v1315_v57 }
 0x97e   : > { %v1317_v59 = vadd.f32 1e-05, %v1316_v58 }
 0x980   : > { %1619 = vrsqrt.f32 %v1317_v59 }
 0x98d   : > { %v1620_v60 = vpop.eup %1619 }
 0x98e   : > { %v1319_v62 = vmul.f32 %v1620_v60, %v1311_v54 }
 0x990   : > { %v1326_v0 = vmul.f32 %v1441_v61, %v1319_v62 }
 0x992   : > { %v1333_v2 = vadd.f32 %v1442_v63, %v1326_v0 }
 0x994   : > { %v1334_v4 = vpack.c.bf16 %v1333_v2, %v1333_v2 }
 0x996   : > { %1336 = vst.msk [vmem:[%s476_s22] sm:$0xf] %vm1335_vm11, %v1334_v4 }
 0x997 PF: > { %s24_s29 = sadd.s32 1, %s1627_s29  }
 0x998   : > { %p21_p4 = scmp.ge.s32.totalorder %s24_s29, 4  }
 0x99a   :  { %23 = sbr.rel (!%p21_p4) target bundleno = 1 (0x1), region = 109 }

// kernel: transformer_forward.7
= control target key start
LH: loop header
LB: loop body
LE: loop exit
PB: predicated region body
PF: predicated region fallthrough
CT: control target
= control target key end

     0   :  { %s3362_s0 = inlined_call_operand.vmem [shape: bf16[2,8,32], index: 0, kind: input, shape index: {}]   ;;  %s3363_s1 = inlined_call_operand.vmem [shape: bf16[2,8,32], index: 1, kind: input, shape index: {}]   ;;  %s3364_s2 = inlined_call_operand.vmem [shape: f32[2,8,1], index: 2, kind: input, shape index: {}]   ;;  %s3365_s3 = inlined_call_operand.vmem [shape: f32[2,1,8], index: 3, kind: input, shape index: {}]   ;;  %s3366_s4 = inlined_call_operand.vmem [shape: bf16[32,96], index: 4, kind: input, shape index: {}]   ;;  %s3367_s5 = inlined_call_operand.vmem [shape: f32[1,96], index: 5, kind: input, shape index: {}]   ;;  %s3368_s6 = inlined_call_operand.vmem [shape: bf16[32,32], index: 6, kind: input, shape index: {}]   ;;  %s3369_s7 = inlined_call_operand.vmem [shape: f32[1,32], index: 7, kind: input, shape index: {}]   ;;  %s3370_s8 = inlined_call_operand.vmem [shape: f32[1,32], index: 8, kind: input, shape index: {}]   ;;  %s3371_s9 = inlined_call_operand.vmem [shape: f32[1,32], index: 9, kind: input, shape index: {}]   ;;  %s3372_s10 = inlined_call_operand.vmem [shape: bf16[32,32], index: 10, kind: input, shape index: {}]   ;;  %s3373_s11 = inlined_call_operand.vmem [shape: f32[1,32], index: 11, kind: input, shape index: {}]   ;;  %s3374_s12 = inlined_call_operand.vmem [shape: bf16[32,64], index: 12, kind: input, shape index: {}]   ;;  %s3375_s13 = inlined_call_operand.vmem [shape: f32[1,64], index: 13, kind: input, shape index: {}]   ;;  %s3376_s14 = inlined_call_operand.vmem [shape: bf16[32,32], index: 14, kind: input, shape index: {}]   ;;  %s3377_s15 = inlined_call_operand.vmem [shape: f32[1,32], index: 15, kind: input, shape index: {}]   ;;  %s3378_s16 = inlined_call_operand.vmem [shape: f32[1,32], index: 16, kind: input, shape index: {}]   ;;  %s3379_s17 = inlined_call_operand.vmem [shape: f32[1,32], index: 17, kind: input, shape index: {}]   ;;  %s3380_s18 = inlined_call_operand.vmem [shape: bf16[32,64], index: 18, kind: input, shape index: {}]   ;;  %s3381_s19 = inlined_call_operand.vmem [shape: f32[1,64], index: 19, kind: input, shape index: {}]   ;;  %s3382_s20 = inlined_call_operand.vmem [shape: bf16[64,32], index: 20, kind: input, shape index: {}]   ;;  %s3383_s21 = inlined_call_operand.vmem [shape: f32[1,32], index: 21, kind: input, shape index: {}]   ;;  %s3384_s22 = inlined_call_operand.vmem [shape: f32[1,32], index: 22, kind: input, shape index: {}]   ;;  %s3385_s23 = inlined_call_operand.vmem [shape: f32[1,32], index: 23, kind: input, shape index: {}]   ;;  %s3386_s24 = inlined_call_operand.vmem [shape: bf16[2,8,32], index: 24, kind: output, shape index: {}]  }
   0x1   :  { %3398 = sst [smem:[#allocation5_spill]] %s3362_s0 }
   0x2   :  { %3399 = sst [smem:[#allocation6_spill]] %s3363_s1 }
   0x3   :  { %3400 = sst [smem:[#allocation7_spill]] %s3364_s2 }
   0x4   :  { %3401 = sst [smem:[#allocation8_spill]] %s3365_s3 }
   0x5   :  { %3402 = sst [smem:[#allocation9_spill]] %s3366_s4 }
   0x6   :  { %3403 = sst [smem:[#allocation10_spill]] %s3367_s5  ;;  %s3017_s5 = smov 0  }
   0x7   :  { %3404 = sst [smem:[#allocation11_spill]] %s3368_s6 }
   0x8   :  { %3405 = sst [smem:[#allocation12_spill]] %s3369_s7 }
   0x9   :  { %3406 = sst [smem:[#allocation13_spill]] %s3370_s8 }
   0xa LB: > { %s2476_s26 = sadd.s32 4294967295, %s2872_s5   ;;  %p2480_p0 = scmp.ge.s32.totalorder %s2872_s5, 1  ;;  %s2872_s5 = sphi %s3017_s5, %s34_s5  }
   0xb   : > { %p687_p1 = scmp.lt.s32.totalorder %s2872_s5, 3 }
   0xd   : > { %p688_p2 = pnand %p2480_p0, %p687_p1 }
   0xe   : > { %s3407_s6 = sld [smem:[#allocation9_spill]] (!%p688_p2)  ;;  %p762_p3 = scmp.lt.s32.totalorder (!%p688_p2), %s2476_s26, 1 }
   0xf   : > { %691 = sbr.rel (%p688_p2) target bundleno = 4175 (0x104f), region = 116  ;;  %s3408_s3 = sld [smem:[#allocation5_spill]] (!%p688_p2) }
  0x10   : > { %s3409_s1 = sld [smem:[#allocation10_spill]] (!%p688_p2)  ;;  %s2876_s27 = smov (!%p688_p2), 120  }
  0x11   : > { %s3391_s28 = smov (!%p688_p2), 96   ;;  %s3389_s2 = smov (!%p688_p2), 80  }
  0x12   : > { %s3395_s29 = smov (!%p688_p2), 88   ;;  %s3390_s7 = smov (!%p688_p2), 72  }
  0x13   : > { %s2881_s30 = smov (!%p688_p2), 112   ;;  %s2887_s8 = smov (!%p688_p2), 48  }
  0x14   : > { %v2801_v0 = vld [vmem:[%s3407_s6 + $0x8] sm:$0xff]   ;;  %v2874_v1 = vmov 0.0   ;;  %v2802_v2 = vld [vmem:[%s3407_s6] sm:$0xff]   ;;  %vm2875_vm0 = vmmov 0   ;;  %s3425_s26 = smov (!%p762_p3, %s2476_s26), 1  ;;  %vm822_vm1 = vcmask 261120   ;;  %v785_v30 = vlaneseq }
  0x15   : > { %2617 = vmatprep.subr.bf16.mxu1 %v2874_v1  ;;  %2631 = vmatprep.subr.bf16.mxu0 %v2874_v1  ;;  %s3041_s0 = sshll.u32 %s3425_s26, 2  ;;  %vm867_vm2 = vcmask 781312   ;;  %v2883_v16 = vmov 0   ;;  %vm875_vm4 = vcmask 64512   ;;  %v2884_v34 = vmov -1e+09  }
  0x16   : > { %2618 = vmatpush3.bf16.msra.mxu1 %v2801_v0  ;;  %2621 = vmatprep.mubr.msk.bf16.mxu1 %vm2875_vm0, %v2874_v1  ;;  %s765_s25 = scalar_lea.vmem %s3408_s3, %s3041_s0  ;;  %v2485_v4 = vld [vmem:[%s3409_s1] ss:$0 sm:$0xff]  ;;  %s3396_s3 = smov 104   ;;  %v3103_v31 = vshrl.u32 %v785_v30, 7  ;;  %v788_v32 = vand.u32 127, %v785_v30  ;;  %vm941_vm8 = vcmask 1043456  }
  0x17   : > { %2619 = vmatprep.subr.bf16.mxu1 %v2874_v1  ;;  %2633 = vmatprep.mubr.msk.bf16.mxu0 %vm2875_vm0, %v2874_v1  ;;  %v3048_v3 = vld [vmem:[%s765_s25] sm:$0xf]  ;;  %s2483_s25 = sshll.u32 %s3425_s26, 3  ;;  %s3410_s1 = sld [smem:[#allocation7_spill]]  ;;  %vm986_vm9 = vcmask 60416   ;;  %vm1111_vm10 = vcmask 126016  }
  0x18   : > { %2799 = vset.pattern.permute.xlu1 %v2883_v16  ;;  %2800 = vset.pattern.permute.xlu0 %v2883_v16  ;;  %vm789_vm5 = vcmp.le.s32.totalorder %v788_v32, %v3103_v31  ;;  %s2888_s4 = smov 40   ;;  %vm1236_vm11 = vcmask 191616   ;;  %vm1361_vm12 = vcmask 257216   ;;  %vm1601_vm13 = vcmask 519168  }
  0x19   : > { %vm1532_vm14 = vcmask 257024  }
  0x1a   : > { %2620 = vmatpush3.bf16.msra.mxu1 %v2802_v2 }
  0x1b   : > { %2625 = vmatprep.subr.bf16.mxu1 %v2874_v1 }
  0x1d   : > { %2622 = vmatmul.mubr.msk.bf16.vlgmr.msra.gmra.mxu1 %vm822_vm1, %v3048_v3 }
  0x1e   : > { %2627 = vmatprep.mubr.msk.bf16.mxu1 %vm2875_vm0, %v2874_v1 }
  0xdd   : > { %v860_v5 = vpop.f32.mrf.mxu1 }
  0xde   : > { %v861_v6 = vadd.f32 %v2485_v4, %v860_v5 }
  0xdf   : > { %v2623_v7 = vpop.f32.mrf.mxu1 }
  0xe0   : > { %v866_v8 = vpack.c.bf16 %v861_v6, %v861_v6 }
  0xe1   : > { %v863_v9 = vpop.f32.mrf.mxu1 }
  0xe2   : > { %868 = vst.msk [vmem:[#allocation2] sm:$0xf] %vm867_vm2, %v866_v8 }
  0xe3   : > { %v2624_v10 = vpop.f32.mrf.mxu1 }
  0xe9   : > { %v3057_v11 = vld [vmem:[#allocation2] ss:$0 sps:$4 sm:$0xff]  }
  0xea   : > { %v869_v12 = vld [vmem:[#allocation2] sm:$0xf]  ;;  %992 = vrot.lane.b32.xlu1 %v3057_v11, %s2876_s27 }
  0xeb   : > { %v3059_v13 = vcombine.low %v869_v12, %v869_v12  ;;  %v3065_v14 = vld [vmem:[#allocation2] ss:$0 sps:$4 sm:$0xff]  }
  0xec   : > { %v3071_v15 = vld [vmem:[#allocation2] ss:$0 sps:$4 sm:$0xff]  }
  0xed   : > { %873 = vrot.lane.b32.xlu0 %v3059_v13, %s3391_s28  ;;  %s3393_s28 = smov 16  }
  0xee   : > { %1119 = vrot.lane.b32.xlu1 %v3065_v14, %s3389_s2  ;;  %s773_s2 = scalar_lea.vmem %s3410_s1, %s2483_s25  ;;  %s2886_s25 = smov 56  }
  0xef   : > { %v790_v17 = vld [vmem:[%s773_s2] sm:$0xff]  ;;  %s2885_s2 = smov 64   ;;  %s3394_s1 = smov 8  }
  0xf0   : > { %vm791_vm3 = vcmp.gt.f32.partialorder %v790_v17, 0.0 }
  0xf1   : > { %994 = vrot.lane.b32.xlu0 %v3057_v11, %s3395_s29  ;;  %v792_v18 = vsel %vm791_vm3, 1, %v2883_v16  ;;  %s3413_s29 = sld [smem:[#allocation6_spill]] }
  0xf2   : > { %1244 = vrot.lane.b32.xlu1 %v3071_v15, %s3390_s7  ;;  %s3418_s7 = smov 96  }
  0xf5   : > { %1117 = vrot.lane.b32.xlu0 %v3065_v14, %s2881_s30 }
  0xf6   : > { %794 = vperm.xlu1 %2799, %v792_v18  }
  0xf9   : > { %1242 = vrot.lane.b32.xlu0 %v3071_v15, %s3396_s3  ;;  %s769_s3 = scalar_lea.vmem %s3413_s29, %s3041_s0  ;;  %s3415_s29 = smov 104  }
 0x15c   : > { %v993_v22 = vpop.permute.xlu1 %992 }
 0x15f   : > { %v874_v19 = vpop.permute.xlu0 %873 }
 0x160   : > { %v880_v20 = vsel %vm875_vm4, %v874_v19, 0  ;;  %v1120_v24 = vpop.permute.xlu1 %1119 }
 0x161   : > { %2626 = vmatpush3.bf16.xpose.msra.mxu1 %v880_v20  ;;  %v1125_v25 = vsel %vm875_vm4, %v1120_v24, 0 }
 0x162   : > { %2637 = vmatprep.subr.bf16.mxu1 %v2874_v1 }
 0x163   : > { %v995_v21 = vpop.permute.xlu0 %994 }
 0x164   : > { %v1000_v23 = vsel %vm875_vm4, %v995_v21, 0  ;;  %v1245_v26 = vpop.permute.xlu1 %1244 }
 0x165   : > { %v1250_v28 = vsel %vm875_vm4, %v1245_v26, 0 }
 0x167   : > { %v1118_v27 = vpop.permute.xlu0 %1117 }
 0x168   : > { %2628 = vmatmul.mubr.msk.bf16.vlgmr.msra.gmra.mxu1 %vm875_vm4, %v869_v12 }
 0x169   : > { %2638 = vmatpush3.bf16.xpose.msra.mxu1 %v1000_v23  ;;  %2639 = vmatprep.mubr.msk.bf16.mxu1 %vm2875_vm0, %v2874_v1 }
 0x16a   : > { %2649 = vmatprep.subr.bf16.mxu1 %v2874_v1 }
 0x16b   : > { %v1243_v29 = vpop.permute.xlu0 %1242 }
 0x170   : > { %2640 = vmatmul.mubr.msk.bf16.vlgmr.msra.gmra.mxu1 %vm875_vm4, %v993_v22 }
 0x171   : > { %2650 = vmatpush3.bf16.xpose.msra.mxu1 %v1125_v25  ;;  %2651 = vmatprep.mubr.msk.bf16.mxu1 %vm2875_vm0, %v2874_v1  ;;  %v795_v33 = vpop.permute.xlu1 %794 }
 0x172   : > { %2661 = vmatprep.subr.bf16.mxu1 %v2874_v1  ;;  %vm796_vm6 = vcmp.eq.s32.totalorder %v795_v33, 1 }
 0x173   : > { %vm797_vm7 = vmand %vm789_vm5, %vm796_vm6 }
 0x174   : > { %v798_v35 = vsel %vm797_vm7, 0.0, %v2884_v34 }
 0x178   : > { %2652 = vmatmul.mubr.msk.bf16.vlgmr.msra.gmra.mxu1 %vm875_vm4, %v1118_v27 }
 0x179   : > { %2662 = vmatpush3.bf16.xpose.msra.mxu1 %v1250_v28  ;;  %2663 = vmatprep.mubr.msk.bf16.mxu1 %vm2875_vm0, %v2874_v1 }
 0x17a   : > { %2673 = vmatprep.subr.bf16.mxu1 %v2874_v1 }
 0x180   : > { %2664 = vmatmul.mubr.msk.bf16.vlgmr.msra.gmra.mxu1 %vm875_vm4, %v1243_v29 }
 0x181   : > { %2677 = vmatprep.mubr.msk.bf16.mxu1 %vm2875_vm0, %v2874_v1 }
 0x228   : > { %v916_v36 = vpop.f32.mrf.mxu1 }
 0x229   : > { %v922_v37 = vmul.f32 0.35355338, %v916_v36 }
 0x22a   : > { %v2629_v38 = vpop.f32.mrf.mxu1 }
 0x22b   : > { %v923_v39 = vadd.f32 %v922_v37, %v798_v35 }
 0x22c   : > { %v919_v40 = vpop.f32.mrf.mxu1 }
 0x22d   : > { %v924_v41 = vsel %vm875_vm4, %v923_v39, -inf }
 0x22e   : > { %925 = vmax.xlane.f32.xlu0 %v924_v41  ;;  %v2630_v42 = vpop.f32.mrf.mxu1 }
 0x230   : > { %v1036_v43 = vpop.f32.mrf.mxu1 }
 0x231   : > { %v1042_v44 = vmul.f32 0.35355338, %v1036_v43 }
 0x232   : > { %v2641_v45 = vpop.f32.mrf.mxu1 }
 0x233   : > { %v1043_v46 = vadd.f32 %v1042_v44, %v798_v35 }
 0x234   : > { %v1039_v47 = vpop.f32.mrf.mxu1 }
 0x235   : > { %v1044_v48 = vsel %vm875_vm4, %v1043_v46, -inf }
 0x236   : > { %1045 = vmax.xlane.f32.xlu1 %v1044_v48  ;;  %v2642_v49 = vpop.f32.mrf.mxu1 }
 0x238   : > { %v1161_v50 = vpop.f32.mrf.mxu1 }
 0x239   : > { %v1167_v51 = vmul.f32 0.35355338, %v1161_v50 }
 0x23a   : > { %v2653_v52 = vpop.f32.mrf.mxu1 }
 0x23b   : > { %v1168_v53 = vadd.f32 %v1167_v51, %v798_v35 }
 0x23c   : > { %v1164_v54 = vpop.f32.mrf.mxu1 }
 0x23d   : > { %v1169_v55 = vsel %vm875_vm4, %v1168_v53, -inf }
 0x23e   : > { %1170 = vmax.xlane.f32.xlu0 %v1169_v55  ;;  %v2654_v56 = vpop.f32.mrf.mxu1 }
 0x240   : > { %v1286_v57 = vpop.f32.mrf.mxu1 }
 0x241   : > { %v1292_v58 = vmul.f32 0.35355338, %v1286_v57 }
 0x242   : > { %v2665_v59 = vpop.f32.mrf.mxu1 }
 0x243   : > { %v1293_v60 = vadd.f32 %v1292_v58, %v798_v35 }
 0x244   : > { %v1289_v61 = vpop.f32.mrf.mxu1 }
 0x245   : > { %v1294_v62 = vsel %vm875_vm4, %v1293_v60, -inf }
 0x246   : > { %1295 = vmax.xlane.f32.xlu0 %v1294_v62  ;;  %v2666_v63 = vpop.f32.mrf.mxu1 }
 0x2b7   : > { %v926_v0 = vpop.xlane.xlu0 %925 }
 0x2b8   : > { %v927_v2 = vsub.f32 %v923_v39, %v926_v0 }
 0x2ba   : > { %v928_v4 = vmul.f32 1.442695, %v927_v2 }
 0x2bc   : > { %2828 = vpow2.f32 %v928_v4 }
 0x2bf   : > { %v1046_v5 = vpop.xlane.xlu1 %1045 }
 0x2c0   : > { %v1047_v6 = vsub.f32 %v1043_v46, %v1046_v5 }
 0x2c2   : > { %v1048_v7 = vmul.f32 1.442695, %v1047_v6 }
 0x2c4   : > { %2830 = vpow2.f32 %v1048_v7 }
 0x2c7   : > { %v1171_v10 = vpop.xlane.xlu0 %1170 }
 0x2c8   : > { %v1172_v22 = vsub.f32 %v1168_v53, %v1171_v10 }
 0x2c9   : > { %v2829_v8 = vpop.eup %2828 }
 0x2ca   : > { %v930_v9 = vsel %vm875_vm4, %v2829_v8, 0.0  ;;  %v1173_v23 = vmul.f32 1.442695, %v1172_v22 }
 0x2cb   : > { %931 = vadd.xlane.f32.xlu1 %v930_v9 }
 0x2cf   : > { %v1296_v12 = vpop.xlane.xlu0 %1295 }
 0x2d0   : > { %v1297_v16 = vsub.f32 %v1293_v60, %v1296_v12 }
 0x2d1   : > { %v2831_v17 = vpop.eup %2830 }
 0x2d2   : > { %v1298_v18 = vmul.f32 1.442695, %v1297_v16  ;;  %v1050_v19 = vsel %vm875_vm4, %v2831_v17, 0.0 }
 0x2d3   : > { %1051 = vadd.xlane.f32.xlu0 %v1050_v19 }
 0x2d4   : > { %2832 = vpow2.f32 %v1298_v18 }
 0x2d5   : > { %2834 = vpow2.f32 %v1173_v23 }
 0x2dc   : > { %936 = vrot.lane.b32.xlu1 %v3059_v13, %s2885_s2  ;;  %s3392_s2 = smov 24  }
 0x2e1   : > { %v2833_v20 = vpop.eup %2832 }
 0x2e2   : > { %v1300_v21 = vsel %vm875_vm4, %v2833_v20, 0.0  ;;  %v2835_v24 = vpop.eup %2834 }
 0x2e3   : > { %1301 = vadd.xlane.f32.xlu0 %v1300_v21  ;;  %v1175_v25 = vsel %vm875_vm4, %v2835_v24, 0.0 }
 0x2f9   : > { %1056 = vrot.lane.b32.xlu0 %v3057_v11, %s2886_s25  ;;  %s3419_s25 = smov 72  }
 0x300   : > { %1176 = vadd.xlane.f32.xlu1 %v1175_v25 }
 0x311   : > { %1181 = vrot.lane.b32.xlu1 %v3065_v14, %s2887_s8  ;;  %s3411_s8 = sld [smem:[#allocation11_spill]] }
 0x315   : > { %1306 = vrot.lane.b32.xlu1 %v3071_v15, %s2888_s4  ;;  %s3412_s4 = sld [smem:[#allocation12_spill]] }
 0x317   : > { %v2807_v58 = vld [vmem:[%s3411_s8 + $0x8] sm:$0xff]   ;;  %v2808_v60 = vld [vmem:[%s3411_s8] sm:$0xff]  }
 0x318   : > { %2674 = vmatpush3.bf16.msra.mxu1 %v2807_v58 }
 0x319   : > { %2675 = vmatprep.subr.bf16.mxu1 %v2874_v1 }
 0x31b   : > { %v2504_v16 = vld [vmem:[%s3412_s4] ss:$0 sm:$0xff]  ;;  %s3421_s4 = smov 8  }
 0x31c   : > { %2676 = vmatpush3.bf16.msra.mxu1 %v2808_v60 }
 0x31d   : > { %2689 = vmatprep.subr.bf16.mxu1 %v2874_v1 }
 0x354   : > { %v932_v13 = vpop.xlane.xlu1 %931 }
 0x355   : > { %2836 = vrcp.f32 %v932_v13 }
 0x358   : > { %v937_v26 = vpop.permute.xlu1 %936 }
 0x359   : > { %v943_v27 = vsel %vm941_vm8, %v937_v26, 0 }
 0x35a   : > { %2632 = vmatpush3.bf16.msra.mxu0 %v943_v27 }
 0x35b   : > { %2643 = vmatprep.subr.bf16.mxu0 %v2874_v1 }
 0x35c   : > { %v1052_v11 = vpop.xlane.xlu0 %1051 }
 0x35d   : > { %2838 = vrcp.f32 %v1052_v11 }
 0x362   : > { %v2837_v28 = vpop.eup %2836 }
 0x363   : > { %v934_v29 = vmul.f32 %v2837_v28, %v2829_v8  ;;  %v2810_v28 = vld [vmem:[%s3374_s12] sm:$0xff]  }
 0x365   : > { %v935_v30 = vpack.c.bf16 %v934_v29, %v934_v29  ;;  %v783_v29 = vld [vmem:[%s769_s3] sm:$0xf]  ;;  %s3414_s3 = sld [smem:[#allocation13_spill]] }
 0x367   : > { %2634 = vmatmul.mubr.msk.bf16.vlgmr.msra.gmra.mxu0 %vm875_vm4, %v935_v30  ;;  %v2811_v30 = vld [vmem:[%s3372_s10 + $0x8] sm:$0xff]  }
 0x368   : > { %2645 = vmatprep.mubr.msk.bf16.mxu0 %vm2875_vm0, %v2874_v1 }
 0x36a   : > { %v2839_v14 = vpop.eup %2838 }
 0x36b   : > { %v1054_v32 = vmul.f32 %v2839_v14, %v2831_v17  ;;  %v784_v17 = vunpack.c.l.bf16 %v3048_v3  ;;  %v2809_v3 = vld [vmem:[%s3374_s12 + $0x8] sm:$0xff]   ;;  %v2812_v14 = vld [vmem:[%s3372_s10] sm:$0xff]  }
 0x36c   : > { %v1302_v15 = vpop.xlane.xlu0 %1301 }
 0x36d   : > { %v1055_v36 = vpack.c.bf16 %v1054_v32, %v1054_v32 }
 0x370   : > { %v1057_v33 = vpop.permute.xlu0 %1056 }
 0x371   : > { %v1062_v35 = vsel %vm941_vm8, %v1057_v33, 0 }
 0x372   : > { %2644 = vmatpush3.bf16.msra.mxu0 %v1062_v35 }
 0x373   : > { %2655 = vmatprep.subr.bf16.mxu0 %v2874_v1 }
 0x375   : > { %2646 = vmatmul.mubr.msk.bf16.vlgmr.msra.gmra.mxu0 %vm875_vm4, %v1055_v36  ;;  %v2508_v36 = vld [vmem:[%s3414_s3] ss:$0 sm:$0xff]  ;;  %s3416_s3 = sld [smem:[#allocation8_spill]] }
 0x376   : > { %2657 = vmatprep.mubr.msk.bf16.mxu0 %vm2875_vm0, %v2874_v1 }
 0x389   : > { %v1177_v37 = vpop.xlane.xlu1 %1176 }
 0x38a   : > { %2840 = vrcp.f32 %v1177_v37 }
 0x38b   : > { %2842 = vrcp.f32 %v1302_v15 }
 0x38d   : > { %v1182_v38 = vpop.permute.xlu1 %1181 }
 0x38e   : > { %v1187_v39 = vsel %vm941_vm8, %v1182_v38, 0  ;;  %v2509_v38 = vld [vmem:[%s3371_s9] ss:$0 sm:$0xff] }
 0x38f   : > { %2656 = vmatpush3.bf16.msra.mxu0 %v1187_v39 }
 0x390   : > { %2667 = vmatprep.subr.bf16.mxu0 %v2874_v1 }
 0x391   : > { %v1307_v42 = vpop.permute.xlu1 %1306 }
 0x392   : > { %v1312_v45 = vsel %vm941_vm8, %v1307_v42, 0  ;;  %v2514_v42 = vld [vmem:[%s3375_s13] ss:$0 sm:$0xff] }
 0x397   : > { %v2841_v40 = vpop.eup %2840 }
 0x398   : > { %v1179_v41 = vmul.f32 %v2841_v40, %v2835_v24  ;;  %v2843_v44 = vpop.eup %2842 }
 0x399   : > { %v1304_v46 = vmul.f32 %v2843_v44, %v2833_v20 }
 0x39a   : > { %v1180_v43 = vpack.c.bf16 %v1179_v41, %v1179_v41 }
 0x39b   : > { %v1305_v47 = vpack.c.bf16 %v1304_v46, %v1304_v46 }
 0x39c   : > { %2658 = vmatmul.mubr.msk.bf16.vlgmr.msra.gmra.mxu0 %vm875_vm4, %v1180_v43 }
 0x39d   : > { %2668 = vmatpush3.bf16.msra.mxu0 %v1312_v45  ;;  %2669 = vmatprep.mubr.msk.bf16.mxu0 %vm2875_vm0, %v2874_v1 }
 0x39e   : > { %2681 = vmatprep.subr.bf16.mxu0 %v2874_v1 }
 0x3a4   : > { %2670 = vmatmul.mubr.msk.bf16.vlgmr.msra.gmra.mxu0 %vm875_vm4, %v1305_v47 }
 0x3a5   : > { %2685 = vmatprep.mubr.msk.bf16.mxu0 %vm2875_vm0, %v2874_v1  ;;  %2682 = vmatpush3.bf16.msra.mxu0 %v2811_v30 }
 0x3a6   : > { %2683 = vmatprep.subr.bf16.mxu0 %v2874_v1 }
 0x3a9   : > { %2684 = vmatpush3.bf16.msra.mxu0 %v2812_v14 }
 0x3aa   : > { %2697 = vmatprep.subr.bf16.mxu0 %v2874_v1 }
 0x427   : > { %v979_v48 = vpop.f32.mrf.mxu0 }
 0x428   : > { %v985_v49 = vpack.c.bf16 %v979_v48, %v979_v48 }
 0x429   : > { %v2635_v50 = vpop.f32.mrf.mxu0 }
 0x42a   : > { %987 = vst.msk [vmem:[#allocation4] sm:$0xf] %vm986_vm9, %v985_v49 }
 0x42b   : > { %v982_v51 = vpop.f32.mrf.mxu0 }
 0x42d   : > { %v2636_v52 = vpop.f32.mrf.mxu0 }
 0x42e   : > { %v2510_v52 = vld [vmem:[%s3373_s11] ss:$0 sm:$0xff] }
 0x435   : > { %v1098_v53 = vpop.f32.mrf.mxu0 }
 0x436   : > { %v2556_v54 = vpack.c.bf16 %v1098_v53, %v1098_v53 }
 0x437   : > { %v2647_v55 = vpop.f32.mrf.mxu0 }
 0x438   : > { %1108 = vrot.lane.b32.xlu0 %v2556_v54, %s3394_s1  ;;  %s776_s1 = scalar_lea.vmem %s3416_s3, %s3425_s26  ;;  %s3417_s26 = smov 88  }
 0x439   : > { %v1101_v56 = vpop.f32.mrf.mxu0  ;;  %s3422_s3 = smov 16  }
 0x43b   : > { %v2648_v57 = vpop.f32.mrf.mxu0 }
 0x45c   : > { %v1223_v59 = vpop.f32.mrf.mxu0 }
 0x45d   : > { %v2557_v61 = vpack.c.bf16 %v1223_v59, %v1223_v59 }
 0x45e   : > { %v2659_v62 = vpop.f32.mrf.mxu0 }
 0x45f   : > { %1233 = vrot.lane.b32.xlu1 %v2557_v61, %s3393_s28 }
 0x460   : > { %v1226_v63 = vpop.f32.mrf.mxu0 }
 0x462   : > { %v2660_v0 = vpop.f32.mrf.mxu0 }
 0x464   : > { %v1348_v2 = vpop.f32.mrf.mxu0 }
 0x465   : > { %v2558_v4 = vpack.c.bf16 %v1348_v2, %v1348_v2 }
 0x466   : > { %v2671_v5 = vpop.f32.mrf.mxu0 }
 0x467   : > { %1358 = vrot.lane.b32.xlu0 %v2558_v4, %s3392_s2  ;;  %s3420_s2 = smov 80  }
 0x468   : > { %v1351_v6 = vpop.f32.mrf.mxu0 }
 0x46a   : > { %v2672_v7 = vpop.f32.mrf.mxu0 }
 0x4aa   : > { %v1109_v8 = vpop.permute.xlu0 %1108 }
 0x4ab   : > { %1112 = vst.msk [vmem:[#allocation4] sm:$0xf] %vm1111_vm10, %v1109_v8 }
 0x4d1   : > { %v1234_v9 = vpop.permute.xlu1 %1233 }
 0x4d2   : > { %1237 = vst.msk [vmem:[#allocation4] sm:$0xf] %vm1236_vm11, %v1234_v9 }
 0x4d9   : > { %v1359_v10 = vpop.permute.xlu0 %1358 }
 0x4da   : > { %1362 = vst.msk [vmem:[#allocation4] sm:$0xf] %vm1361_vm12, %v1359_v10 }
 0x4e1   : > { %v1363_v12 = vld [vmem:[#allocation4] sm:$0xf] }
 0x4e2   : > { %2678 = vmatmul.mubr.msk.bf16.vlgmr.msra.gmra.mxu1 %vm822_vm1, %v1363_v12 }
 0x4e3   : > { %2693 = vmatprep.mubr.msk.bf16.mxu1 %vm2875_vm0, %v2874_v1  ;;  %2690 = vmatpush3.bf16.msra.mxu1 %v2809_v3 }
 0x4e4   : > { %2691 = vmatprep.subr.bf16.mxu1 %v2874_v1 }
 0x4e7   : > { %2692 = vmatpush3.bf16.msra.mxu1 %v2810_v28 }
 0x4e8   : > { %2703 = vmatprep.subr.bf16.mxu1 %v2874_v1 }
 0x4ea   : > { %2694 = vmatmul.mubr.msk.bf16.vlgmr.msra.gmra.mxu1 %vm822_vm1, %v783_v29 }
 0x4eb   : > { %2705 = vmatprep.mubr.msk.bf16.mxu1 %vm2875_vm0, %v2874_v1 }
 0x5a2   : > { %v1424_v18 = vpop.f32.mrf.mxu1 }
 0x5a3   : > { %v1425_v19 = vadd.f32 %v2504_v16, %v1424_v18  ;;  %v1461_v16 = vld [vmem:[%s776_s1] sm:$0x1]  ;;  %s3423_s1 = smov 24  }
 0x5a4   : > { %v2679_v20 = vpop.f32.mrf.mxu1  ;;  %vm1462_vm15 = vcmp.gt.f32.partialorder %v1461_v16, 0.0 }
 0x5a5   : > { %v1430_v21 = vadd.f32 %v1425_v19, %v784_v17  ;;  %v1655_v17 = vsub.s32 0, %v3103_v31  ;;  %v1463_v18 = vsel %vm1462_vm15, 0.0, %v2884_v34 }
 0x5a6   : > { %v1427_v22 = vpop.f32.mrf.mxu1 }
 0x5a7   : > { %v1433_v23 = vsel %vm822_vm1, %v1430_v21, 0.0  ;;  %v1656_v19 = vrot.slane %v1463_v18, %v1655_v17 }
 0x5a8   : > { %v2680_v24 = vpop.f32.mrf.mxu1  ;;  %1434 = vadd.xlane.f32.xlu1 %v1433_v23 }
 0x5aa   : > { %v1594_v43 = vpop.f32.mrf.mxu1 }
 0x5ab   : > { %v1595_v44 = vadd.f32 %v2514_v42, %v1594_v43 }
 0x5ac   : > { %v2695_v45 = vpop.f32.mrf.mxu1 }
 0x5ad   : > { %v1600_v46 = vpack.c.bf16 %v1595_v44, %v1595_v44 }
 0x5ae   : > { %v1597_v47 = vpop.f32.mrf.mxu1 }
 0x5af   : > { %1602 = vst.msk [vmem:[#allocation3] sm:$0xf] %vm1601_vm13, %v1600_v46 }
 0x5b0   : > { %v2696_v48 = vpop.f32.mrf.mxu1 }
 0x5b6   : > { %v3202_v49 = vld [vmem:[#allocation3] sm:$0xf] }
 0x5b7   : > { %v3204_v50 = vld [vmem:[#allocation3] ss:$0 sps:$4 sm:$0xff]   ;;  %v1609_v51 = vsel %vm875_vm4, %v3202_v49, 0 }
 0x5b8   : > { %v3222_v2 = vld [vmem:[#allocation3] ss:$0 sps:$4 sm:$0xff]  }
 0x5b9   : > { %v3227_v4 = vld [vmem:[#allocation3] ss:$0 sps:$4 sm:$0xff]  }
 0x631   : > { %v1435_v25 = vpop.xlane.xlu1 %1434 }
 0x632   : > { %v1437_v13 = vmul.f32 0.03125, %v1435_v25 }
 0x634   : > { %v1438_v26 = vsub.f32 %v1430_v21, %v1437_v13 }
 0x636   : > { %v1439_v27 = vmul.f32 %v1438_v26, %v1438_v26 }
 0x638   : > { %v1440_v11 = vsel %vm822_vm1, %v1439_v27, 0.0 }
 0x639   : > { %1441 = vadd.xlane.f32.xlu0 %v1440_v11 }
 0x64f   : > { %1734 = vrot.lane.b32.xlu0 %v3204_v50, %s2876_s27 }
 0x6c2   : > { %v1442_v15 = vpop.xlane.xlu0 %1441 }
 0x6c3   : > { %v1443_v32 = vmul.f32 0.03125, %v1442_v15 }
 0x6c5   : > { %v1444_v33 = vadd.f32 1e-05, %v1443_v32 }
 0x6c6   : > { %v1735_v59 = vpop.permute.xlu0 %1734 }
 0x6c7   : > { %2844 = vrsqrt.f32 %v1444_v33  ;;  %v1740_v60 = vsel %vm875_vm4, %v1735_v59, 0 }
 0x6d4   : > { %v2845_v35 = vpop.eup %2844 }
 0x6d5   : > { %v1446_v37 = vmul.f32 %v2845_v35, %v1438_v26 }
 0x6d7   : > { %v1453_v39 = vmul.f32 %v2508_v36, %v1446_v37 }
 0x6d9   : > { %v3192_v40 = vadd.f32 %v2509_v38, %v1453_v39 }
 0x6db   : > { %v1464_v41 = vpack.c.bf16 %v3192_v40, %v3192_v40 }
 0x6dd   : > { %2686 = vmatmul.mubr.msk.bf16.vlgmr.msra.gmra.mxu0 %vm822_vm1, %v1464_v41 }
 0x6de   : > { %2699 = vmatprep.mubr.msk.bf16.mxu0 %vm2875_vm0, %v2874_v1  ;;  %2698 = vmatpush3.bf16.xpose.msra.mxu0 %v1609_v51 }
 0x6df   : > { %2709 = vmatprep.subr.bf16.mxu0 %v2874_v1 }
 0x79d   : > { %v1525_v53 = vpop.f32.mrf.mxu0 }
 0x79e   : > { %v1526_v54 = vadd.f32 %v2510_v52, %v1525_v53 }
 0x79f   : > { %v2687_v55 = vpop.f32.mrf.mxu0 }
 0x7a0   : > { %v1531_v56 = vpack.c.bf16 %v1526_v54, %v1526_v54 }
 0x7a1   : > { %v1528_v57 = vpop.f32.mrf.mxu0 }
 0x7a2   : > { %1533 = vst.msk [vmem:[#allocation2] sm:$0xf] %vm1532_vm14, %v1531_v56 }
 0x7a3   : > { %v2688_v58 = vpop.f32.mrf.mxu0 }
 0x7a9   : > { %v1603_v61 = vld [vmem:[#allocation2] sm:$0xf] }
 0x7aa   : > { %v2814_v62 = vld [vmem:[#allocation2] ss:$0 sps:$4 sm:$0xff]   ;;  %2700 = vmatmul.mubr.msk.bf16.vlgmr.msra.gmra.mxu0 %vm875_vm4, %v1603_v61 }
 0x7ab   : > { %v2815_v63 = vld [vmem:[#allocation2] ss:$0 sps:$4 sm:$0xff]   ;;  %1857 = vrot.lane.b32.xlu0 %v2814_v62, %s2881_s30  ;;  %2710 = vmatpush3.bf16.xpose.msra.mxu0 %v1740_v60 }
 0x7ac   : > { %1729 = vrot.lane.b32.xlu1 %v2815_v63, %s2876_s27  ;;  %2711 = vmatprep.mubr.msk.bf16.mxu0 %vm2875_vm0, %v2874_v1  ;;  %v2816_v0 = vld [vmem:[#allocation2] ss:$0 sps:$4 sm:$0xff]  }
 0x7ad   : > { %2721 = vmatprep.subr.bf16.mxu0 %v2874_v1 }
 0x7af   : > { %1985 = vrot.lane.b32.xlu0 %v2816_v0, %s3415_s29  ;;  %v2519_v0 = vcombine.low %v3202_v49, %v3202_v49 }
 0x7b0   : > { %1862 = vrot.lane.b32.xlu1 %v3222_v2, %s2881_s30 }
 0x7b4   : > { %1990 = vrot.lane.b32.xlu1 %v3227_v4, %s3415_s29  ;;  %s780_s29 = scalar_lea.vmem %s3386_s24, %s3041_s0 }
 0x81d   : > { %v1858_v9 = vpop.permute.xlu0 %1857 }
 0x81e   : > { %v1730_v5 = vpop.permute.xlu1 %1729 }
 0x81f   : > { %2712 = vmatmul.mubr.msk.bf16.vlgmr.msra.gmra.mxu0 %vm875_vm4, %v1730_v5 }
 0x820   : > { %2723 = vmatprep.mubr.msk.bf16.mxu0 %vm2875_vm0, %v2874_v1 }
 0x821   : > { %v1986_v12 = vpop.permute.xlu0 %1985 }
 0x822   : > { %v1863_v6 = vpop.permute.xlu1 %1862 }
 0x823   : > { %v1868_v7 = vsel %vm875_vm4, %v1863_v6, 0 }
 0x824   : > { %2722 = vmatpush3.bf16.xpose.msra.mxu0 %v1868_v7 }
 0x825   : > { %2733 = vmatprep.subr.bf16.mxu0 %v2874_v1 }
 0x826   : > { %v1991_v8 = vpop.permute.xlu1 %1990 }
 0x827   : > { %v1996_v10 = vsel %vm875_vm4, %v1991_v8, 0 }
 0x82b   : > { %2724 = vmatmul.mubr.msk.bf16.vlgmr.msra.gmra.mxu0 %vm875_vm4, %v1858_v9 }
 0x82c   : > { %2734 = vmatpush3.bf16.xpose.msra.mxu0 %v1996_v10  ;;  %2735 = vmatprep.mubr.msk.bf16.mxu0 %vm2875_vm0, %v2874_v1 }
 0x82d   : > { %2745 = vmatprep.subr.bf16.mxu0 %v2874_v1 }
 0x833   : > { %2736 = vmatmul.mubr.msk.bf16.vlgmr.msra.gmra.mxu0 %vm875_vm4, %v1986_v12 }
 0x834   : > { %2749 = vmatprep.mubr.msk.bf16.mxu0 %vm2875_vm0, %v2874_v1 }
 0x86a   : > { %v1645_v20 = vpop.f32.mrf.mxu0 }
 0x86b   : > { %v1651_v21 = vmul.f32 0.35355338, %v1645_v20 }
 0x86c   : > { %v2701_v22 = vpop.f32.mrf.mxu0 }
 0x86d   : > { %v1658_v23 = vadd.f32 %v1656_v19, %v1651_v21 }
 0x86e   : > { %v1648_v24 = vpop.f32.mrf.mxu0 }
 0x86f   : > { %v1659_v25 = vsel %vm875_vm4, %v1658_v23, -inf }
 0x870   : > { %1660 = vmax.xlane.f32.xlu1 %v1659_v25  ;;  %v2702_v13 = vpop.f32.mrf.mxu0 }
 0x8df   : > { %v1776_v26 = vpop.f32.mrf.mxu0 }
 0x8e0   : > { %v1782_v27 = vmul.f32 0.35355338, %v1776_v26 }
 0x8e1   : > { %v2713_v11 = vpop.f32.mrf.mxu0 }
 0x8e2   : > { %v1783_v3 = vadd.f32 %v1782_v27, %v1656_v19 }
 0x8e3   : > { %v1779_v28 = vpop.f32.mrf.mxu0 }
 0x8e4   : > { %v1784_v29 = vsel %vm875_vm4, %v1783_v3, -inf }
 0x8e5   : > { %1785 = vmax.xlane.f32.xlu0 %v1784_v29  ;;  %v2714_v31 = vpop.f32.mrf.mxu0 }
 0x8eb   : > { %v1904_v34 = vpop.f32.mrf.mxu0 }
 0x8ec   : > { %v1910_v30 = vmul.f32 0.35355338, %v1904_v34 }
 0x8ed   : > { %v2725_v14 = vpop.f32.mrf.mxu0 }
 0x8ee   : > { %v1911_v15 = vadd.f32 %v1910_v30, %v1656_v19 }
 0x8ef   : > { %v1907_v32 = vpop.f32.mrf.mxu0 }
 0x8f0   : > { %v1912_v33 = vsel %vm875_vm4, %v1911_v15, -inf }
 0x8f1   : > { %1913 = vmax.xlane.f32.xlu0 %v1912_v33  ;;  %v2726_v35 = vpop.f32.mrf.mxu0 }
 0x8f3   : > { %v2032_v36 = vpop.f32.mrf.mxu0 }
 0x8f4   : > { %v2038_v37 = vmul.f32 0.35355338, %v2032_v36 }
 0x8f5   : > { %v2737_v38 = vpop.f32.mrf.mxu0 }
 0x8f6   : > { %v2039_v39 = vadd.f32 %v2038_v37, %v1656_v19  ;;  %v2820_v37 = vld [vmem:[%s3376_s14 + $0x8] sm:$0xff]  }
 0x8f7   : > { %v2035_v41 = vpop.f32.mrf.mxu0  ;;  %2746 = vmatpush3.bf16.msra.mxu0 %v2820_v37 }
 0x8f8   : > { %v2040_v42 = vsel %vm875_vm4, %v2039_v39, -inf  ;;  %v2821_v41 = vld [vmem:[%s3376_s14] sm:$0xff]   ;;  %2747 = vmatprep.subr.bf16.mxu0 %v2874_v1 }
 0x8f9   : > { %v1661_v43 = vpop.xlane.xlu1 %1660  ;;  %2041 = vmax.xlane.f32.xlu1 %v2040_v42  ;;  %v2738_v44 = vpop.f32.mrf.mxu0 }
 0x8fa   : > { %v1662_v45 = vsub.f32 %v1658_v23, %v1661_v43 }
 0x8fb   : > { %2748 = vmatpush3.bf16.msra.mxu0 %v2821_v41 }
 0x8fc   : > { %v1663_v46 = vmul.f32 1.442695, %v1662_v45  ;;  %2761 = vmatprep.subr.bf16.mxu0 %v2874_v1 }
 0x8fe   : > { %2846 = vpow2.f32 %v1663_v46 }
 0x90b   : > { %v2847_v47 = vpop.eup %2846 }
 0x90c   : > { %v1665_v48 = vsel %vm875_vm4, %v2847_v47, 0.0 }
 0x90d   : > { %1666 = vadd.xlane.f32.xlu0 %v1665_v48 }
 0x96e   : > { %v1786_v51 = vpop.xlane.xlu0 %1785 }
 0x96f   : > { %v1787_v52 = vsub.f32 %v1783_v3, %v1786_v51 }
 0x971   : > { %v1788_v53 = vmul.f32 1.442695, %v1787_v52 }
 0x973   : > { %2848 = vpow2.f32 %v1788_v53 }
 0x97a   : > { %v1914_v54 = vpop.xlane.xlu0 %1913 }
 0x97b   : > { %v1915_v55 = vsub.f32 %v1911_v15, %v1914_v54 }
 0x97d   : > { %v1916_v56 = vmul.f32 1.442695, %v1915_v55  ;;  %v2536_v55 = vld [vmem:[%s3377_s15] ss:$0 sm:$0xff] }
 0x97f   : > { %2850 = vpow2.f32 %v1916_v56 }
 0x980   : > { %v2849_v57 = vpop.eup %2848 }
 0x981   : > { %v1790_v58 = vsel %vm875_vm4, %v2849_v57, 0.0 }
 0x982   : > { %1791 = vadd.xlane.f32.xlu1 %v1790_v58  ;;  %v2042_v61 = vpop.xlane.xlu1 %2041 }
 0x983   : > { %v2043_v62 = vsub.f32 %v2039_v39, %v2042_v61 }
 0x985   : > { %v2044_v63 = vmul.f32 1.442695, %v2043_v62 }
 0x987   : > { %2852 = vpow2.f32 %v2044_v63 }
 0x98c   : > { %v2851_v59 = vpop.eup %2850 }
 0x98d   : > { %v1918_v60 = vsel %vm875_vm4, %v2851_v59, 0.0 }
 0x98e   : > { %1919 = vadd.xlane.f32.xlu0 %v1918_v60 }
 0x993   : > { %1796 = vrot.lane.b32.xlu1 %v3204_v50, %s3417_s26 }
 0x994   : > { %v2853_v5 = vpop.eup %2852 }
 0x995   : > { %v2046_v6 = vsel %vm875_vm4, %v2853_v5, 0.0 }
 0x996   : > { %v1667_v50 = vpop.xlane.xlu0 %1666 }
 0x997   : > { %2854 = vrcp.f32 %v1667_v50 }
 0x9a4   : > { %1674 = vrot.lane.b32.xlu0 %v2519_v0, %s3418_s7  ;;  %v2855_v8 = vpop.eup %2854 }
 0x9a5   : > { %v1669_v49 = vmul.f32 %v2855_v8, %v2847_v47  ;;  %v2824_v8 = vld [vmem:[%s3382_s20 + $0x18] sm:$0xff]  }
 0x9a8   : > { %2052 = vrot.lane.b32.xlu0 %v3227_v4, %s3419_s25  ;;  %v1670_v4 = vpack.c.bf16 %v1669_v49, %v1669_v49 }
 0x9b7   : > { %2047 = vadd.xlane.f32.xlu1 %v2046_v6 }
 0x9c8   : > { %1924 = vrot.lane.b32.xlu1 %v3222_v2, %s3420_s2 }
 0xa0b   : > { %v1792_v7 = vpop.xlane.xlu1 %1791 }
 0xa0c   : > { %2856 = vrcp.f32 %v1792_v7  ;;  %v2822_v7 = vld [vmem:[%s3380_s18 + $0x8] sm:$0xff]  }
 0xa0f   : > { %v1797_v16 = vpop.permute.xlu1 %1796 }
 0xa10   : > { %v1802_v18 = vsel %vm941_vm8, %v1797_v16, 0 }
 0xa17   : > { %v1920_v9 = vpop.xlane.xlu0 %1919 }
 0xa18   : > { %2858 = vrcp.f32 %v1920_v9  ;;  %v2825_v9 = vld [vmem:[%s3382_s20 + $0x10] sm:$0xff]  }
 0xa19   : > { %v2857_v17 = vpop.eup %2856 }
 0xa1a   : > { %v1794_v2 = vmul.f32 %v2857_v17, %v2849_v57 }
 0xa1b   : > { %v1675_v10 = vpop.permute.xlu0 %1674 }
 0xa1c   : > { %v1680_v12 = vsel %vm941_vm8, %v1675_v10, 0  ;;  %v1795_v19 = vpack.c.bf16 %v1794_v2, %v1794_v2 }
 0xa1d   : > { %2704 = vmatpush3.bf16.msra.mxu1 %v1680_v12 }
 0xa1e   : > { %2715 = vmatprep.subr.bf16.mxu1 %v2874_v1 }
 0xa1f   : > { %v2053_v25 = vpop.permute.xlu0 %2052 }
 0xa20   : > { %2706 = vmatmul.mubr.msk.bf16.vlgmr.msra.gmra.mxu1 %vm875_vm4, %v1670_v4  ;;  %v2058_v26 = vsel %vm941_vm8, %v2053_v25, 0  ;;  %v2540_v4 = vld [vmem:[%s3378_s16] ss:$0 sm:$0xff] }
 0xa21   : > { %2716 = vmatpush3.bf16.msra.mxu1 %v1802_v18  ;;  %2717 = vmatprep.mubr.msk.bf16.mxu1 %vm2875_vm0, %v2874_v1  ;;  %v2541_v18 = vld [vmem:[%s3379_s17] ss:$0 sm:$0xff] }
 0xa22   : > { %2727 = vmatprep.subr.bf16.mxu1 %v2874_v1 }
 0xa25   : > { %v2859_v20 = vpop.eup %2858 }
 0xa26   : > { %v1922_v22 = vmul.f32 %v2859_v20, %v2851_v59 }
 0xa28   : > { %2718 = vmatmul.mubr.msk.bf16.vlgmr.msra.gmra.mxu1 %vm875_vm4, %v1795_v19  ;;  %v1923_v13 = vpack.c.bf16 %v1922_v22, %v1922_v22  ;;  %v2827_v22 = vld [vmem:[%s3382_s20] sm:$0xff]  }
 0xa29   : > { %2729 = vmatprep.mubr.msk.bf16.mxu1 %vm2875_vm0, %v2874_v1 }
 0xa40   : > { %v2048_v21 = vpop.xlane.xlu1 %2047 }
 0xa41   : > { %2860 = vrcp.f32 %v2048_v21  ;;  %v2826_v21 = vld [vmem:[%s3382_s20 + $0x8] sm:$0xff]  }
 0xa44   : > { %v1925_v23 = vpop.permute.xlu1 %1924 }
 0xa45   : > { %v1930_v24 = vsel %vm941_vm8, %v1925_v23, 0  ;;  %v2542_v23 = vld [vmem:[%s3381_s19] ss:$0 sm:$0xff] }
 0xa46   : > { %2728 = vmatpush3.bf16.msra.mxu1 %v1930_v24 }
 0xa47   : > { %2739 = vmatprep.subr.bf16.mxu1 %v2874_v1 }
 0xa49   : > { %2730 = vmatmul.mubr.msk.bf16.vlgmr.msra.gmra.mxu1 %vm875_vm4, %v1923_v13 }
 0xa4a   : > { %2740 = vmatpush3.bf16.msra.mxu1 %v2058_v26  ;;  %2741 = vmatprep.mubr.msk.bf16.mxu1 %vm2875_vm0, %v2874_v1 }
 0xa4b   : > { %2753 = vmatprep.subr.bf16.mxu1 %v2874_v1 }
 0xa4e   : > { %v2861_v27 = vpop.eup %2860 }
 0xa4f   : > { %v2050_v11 = vmul.f32 %v2861_v27, %v2853_v5 }
 0xa51   : > { %v2051_v3 = vpack.c.bf16 %v2050_v11, %v2050_v11 }
 0xa53   : > { %2742 = vmatmul.mubr.msk.bf16.vlgmr.msra.gmra.mxu1 %vm875_vm4, %v2051_v3 }
 0xa54   : > { %2757 = vmatprep.mubr.msk.bf16.mxu1 %vm2875_vm0, %v2874_v1  ;;  %2754 = vmatpush3.bf16.msra.mxu1 %v2822_v7 }
 0xa55   : > { %2755 = vmatprep.subr.bf16.mxu1 %v2874_v1 }
 0xae0   : > { %v1716_v28 = vpop.f32.mrf.mxu1 }
 0xae1   : > { %v1722_v29 = vpack.c.bf16 %v1716_v28, %v1716_v28 }
 0xae2   : > { %v2707_v31 = vpop.f32.mrf.mxu1 }
 0xae3   : > { %1723 = vst.msk [vmem:[#allocation4] sm:$0xf] %vm986_vm9, %v1722_v29 }
 0xae4   : > { %v1719_v34 = vpop.f32.mrf.mxu1 }
 0xae6   : > { %v2708_v30 = vpop.f32.mrf.mxu1 }
 0xae8   : > { %v1838_v14 = vpop.f32.mrf.mxu1 }
 0xae9   : > { %v2559_v15 = vpack.c.bf16 %v1838_v14, %v1838_v14 }
 0xaea   : > { %v2719_v32 = vpop.f32.mrf.mxu1 }
 0xaeb   : > { %1848 = vrot.lane.b32.xlu1 %v2559_v15, %s3421_s4 }
 0xaec   : > { %v1841_v33 = vpop.f32.mrf.mxu1 }
 0xaee   : > { %v2720_v35 = vpop.f32.mrf.mxu1 }
 0xb09   : > { %v1966_v36 = vpop.f32.mrf.mxu1 }
 0xb0a   : > { %v2560_v38 = vpack.c.bf16 %v1966_v36, %v1966_v36 }
 0xb0b   : > { %v2731_v39 = vpop.f32.mrf.mxu1 }
 0xb0c   : > { %1976 = vrot.lane.b32.xlu0 %v2560_v38, %s3422_s3 }
 0xb0d   : > { %v1969_v42 = vpop.f32.mrf.mxu1 }
 0xb0f   : > { %v2732_v43 = vpop.f32.mrf.mxu1 }
 0xb10   : > { %v2552_v43 = vld [vmem:[%s3384_s22] ss:$0 sm:$0xff] }
 0xb13   : > { %v2094_v44 = vpop.f32.mrf.mxu1 }
 0xb14   : > { %v2561_v45 = vpack.c.bf16 %v2094_v44, %v2094_v44 }
 0xb15   : > { %v2743_v46 = vpop.f32.mrf.mxu1 }
 0xb16   : > { %2104 = vrot.lane.b32.xlu1 %v2561_v45, %s3423_s1  ;;  %v2553_v45 = vld [vmem:[%s3385_s23] ss:$0 sm:$0xff] }
 0xb17   : > { %v2097_v47 = vpop.f32.mrf.mxu1 }
 0xb19   : > { %v2744_v48 = vpop.f32.mrf.mxu1 }
 0xb5d   : > { %v1849_v51 = vpop.permute.xlu1 %1848 }
 0xb5e   : > { %1851 = vst.msk [vmem:[#allocation4] sm:$0xf] %vm1111_vm10, %v1849_v51 }
 0xb7e   : > { %v1977_v52 = vpop.permute.xlu0 %1976 }
 0xb7f   : > { %1979 = vst.msk [vmem:[#allocation4] sm:$0xf] %vm1236_vm11, %v1977_v52 }
 0xb88   : > { %v2105_v53 = vpop.permute.xlu1 %2104 }
 0xb89   : > { %2107 = vst.msk [vmem:[#allocation4] sm:$0xf] %vm1361_vm12, %v2105_v53 }
 0xb90   : > { %v2108_v54 = vld [vmem:[#allocation4] sm:$0xf] }
 0xb91   : > { %2750 = vmatmul.mubr.msk.bf16.vlgmr.msra.gmra.mxu0 %vm822_vm1, %v2108_v54 }
 0xb92   : > { %2769 = vmatprep.mubr.msk.bf16.mxu0 %vm2875_vm0, %v2874_v1  ;;  %2762 = vmatpush3.bf16.msra.mxu0 %v2824_v8  ;;  %vm2306_vm0 = vcmask 523264  }
 0xb93   : > { %2763 = vmatprep.subr.bf16.mxu0 %v2874_v1 }
 0xb96   : > { %2764 = vmatpush3.bf16.msra.mxu0 %v2825_v9 }
 0xb97   : > { %2765 = vmatprep.subr.bf16.mxu0 %v2874_v1 }
 0xb9a   : > { %2766 = vmatpush3.bf16.msra.mxu0 %v2826_v21 }
 0xb9b   : > { %2767 = vmatprep.subr.bf16.mxu0 %v2874_v1  ;;  %v2551_v1 = vld [vmem:[%s3383_s21] ss:$0 sm:$0xff] }
 0xb9e   : > { %2768 = vmatpush3.bf16.msra.mxu0 %v2827_v22 }
 0xc51   : > { %v2169_v56 = vpop.f32.mrf.mxu0 }
 0xc52   : > { %v2170_v57 = vadd.f32 %v2536_v55, %v2169_v56 }
 0xc53   : > { %v2751_v58 = vpop.f32.mrf.mxu0 }
 0xc54   : > { %v2175_v59 = vadd.f32 %v2170_v57, %v3192_v40  ;;  %v2823_v40 = vld [vmem:[%s3380_s18] sm:$0xff]  }
 0xc55   : > { %v2172_v60 = vpop.f32.mrf.mxu0  ;;  %2756 = vmatpush3.bf16.msra.mxu1 %v2823_v40 }
 0xc56   : > { %v2178_v61 = vsel %vm822_vm1, %v2175_v59, 0.0 }
 0xc57   : > { %2179 = vadd.xlane.f32.xlu0 %v2178_v61  ;;  %v2752_v62 = vpop.f32.mrf.mxu0 }
 0xce0   : > { %v2180_v63 = vpop.xlane.xlu0 %2179 }
 0xce1   : > { %v2181_v0 = vmul.f32 0.03125, %v2180_v63 }
 0xce3   : > { %v2182_v5 = vsub.f32 %v2175_v59, %v2181_v0 }
 0xce5   : > { %v2183_v6 = vmul.f32 %v2182_v5, %v2182_v5 }
 0xce7   : > { %v2184_v50 = vsel %vm822_vm1, %v2183_v6, 0.0 }
 0xce8   : > { %2185 = vadd.xlane.f32.xlu1 %v2184_v50 }
 0xd71   : > { %v2186_v49 = vpop.xlane.xlu1 %2185 }
 0xd72   : > { %v2187_v10 = vmul.f32 0.03125, %v2186_v49 }
 0xd74   : > { %v2188_v12 = vadd.f32 1e-05, %v2187_v10 }
 0xd76   : > { %2862 = vrsqrt.f32 %v2188_v12 }
 0xd83   : > { %v2863_v16 = vpop.eup %2862 }
 0xd84   : > { %v2190_v17 = vmul.f32 %v2863_v16, %v2182_v5 }
 0xd86   : > { %v2197_v2 = vmul.f32 %v2540_v4, %v2190_v17 }
 0xd88   : > { %v2204_v19 = vadd.f32 %v2541_v18, %v2197_v2 }
 0xd8a   : > { %v2205_v20 = vpack.c.bf16 %v2204_v19, %v2204_v19 }
 0xd8c   : > { %2758 = vmatmul.mubr.msk.bf16.vlgmr.msra.gmra.mxu1 %vm822_vm1, %v2205_v20 }
 0xe4c   : > { %v2266_v24 = vpop.f32.mrf.mxu1 }
 0xe4d   : > { %v2267_v25 = vadd.f32 %v2542_v23, %v2266_v24 }
 0xe4e   : > { %v2759_v13 = vpop.f32.mrf.mxu1 }
 0xe4f   : > { %v2272_v26 = vmax.f32 %v2267_v25, 0.0 }
 0xe50   : > { %v2269_v27 = vpop.f32.mrf.mxu1 }
 0xe51   : > { %v2273_v11 = vpack.c.bf16 %v2272_v26, %v2272_v26 }
 0xe52   : > { %v2760_v3 = vpop.f32.mrf.mxu1 }
 0xe53   : > { %2770 = vmatmul.mubr.msk.bf16.vlgmr.msra.gmra.mxu0 %vm2306_vm0, %v2273_v11 }
 0xf13   : > { %v2344_v28 = vpop.f32.mrf.mxu0 }
 0xf14   : > { %v2350_v29 = vadd.f32 %v2344_v28, %v2204_v19 }
 0xf15   : > { %v2771_v31 = vpop.f32.mrf.mxu0 }
 0xf16   : > { %v2358_v34 = vadd.f32 %v2551_v1, %v2350_v29 }
 0xf17   : > { %v2347_v30 = vpop.f32.mrf.mxu0 }
 0xf18   : > { %v2361_v14 = vsel %vm822_vm1, %v2358_v34, 0.0 }
 0xf19   : > { %2362 = vadd.xlane.f32.xlu0 %v2361_v14  ;;  %v2772_v15 = vpop.f32.mrf.mxu0 }
 0xfa2   : > { %v2363_v32 = vpop.xlane.xlu0 %2362 }
 0xfa3   : > { %v2364_v33 = vmul.f32 0.03125, %v2363_v32 }
 0xfa5   : > { %v2365_v35 = vsub.f32 %v2358_v34, %v2364_v33 }
 0xfa7   : > { %v2366_v36 = vmul.f32 %v2365_v35, %v2365_v35 }
 0xfa9   : > { %v2367_v37 = vsel %vm822_vm1, %v2366_v36, 0.0 }
 0xfaa   : > { %2368 = vadd.xlane.f32.xlu0 %v2367_v37 }
0x1033   : > { %v2369_v38 = vpop.xlane.xlu0 %2368 }
0x1034   : > { %v2370_v39 = vmul.f32 0.03125, %v2369_v38 }
0x1036   : > { %v2371_v41 = vadd.f32 1e-05, %v2370_v39 }
0x1038   : > { %2864 = vrsqrt.f32 %v2371_v41 }
0x1045   : > { %v2865_v42 = vpop.eup %2864 }
0x1046   : > { %v2373_v44 = vmul.f32 %v2865_v42, %v2365_v35 }
0x1048   : > { %v2380_v46 = vmul.f32 %v2552_v43, %v2373_v44 }
0x104a   : > { %v2387_v47 = vadd.f32 %v2553_v45, %v2380_v46 }
0x104c   : > { %v2388_v48 = vpack.c.bf16 %v2387_v47, %v2387_v47 }
0x104e   : > { %2389 = vst.msk [vmem:[%s780_s29] sm:$0xf] %vm1532_vm14, %v2388_v48 }
0x104f PF: > { %s34_s5 = sadd.s32 1, %s2872_s5  }
0x1050   : > { %p31_p4 = scmp.ge.s32.totalorder %s34_s5, 4  }
0x1052   :  { %33 = sbr.rel (!%p31_p4) target bundleno = 10 (0xa), region = 155 }

</bundles_post_ra>
